<compile_context>
chip_gen: v5e
topology: v5e:2x2
jax: 0.10.0
libtpu: 0.0.40
codegen_flags: <defaults>
</compile_context>

<pallas_src>
from functools import partial

import numpy as np
import jax
import jax.numpy as jnp
from jax.experimental import pallas as pl
from jax.experimental.pallas import tpu as pltpu


def _round_up(x, m):
    return (x + m - 1) // m * m


# ----------------------------------------------------------------------------- 
# Constant builders (host-side numpy; become resident VMEM operands of the kernel)
# -----------------------------------------------------------------------------
def _hann_window(win_length):
    # torch.hann_window(win_length, periodic=False)
    if win_length == 1:
        return np.ones((1,), np.float64)
    n = np.arange(win_length, dtype=np.float64)
    return 0.5 - 0.5 * np.cos(2.0 * np.pi * n / (win_length - 1))


def _mel_filterbank(sample_rate, n_fft, n_mels, fmin=0.0, fmax=None):
    # librosa-style Slaney mel filterbank with Slaney normalization.
    if fmax is None:
        fmax = sample_rate / 2.0
    n_freq = n_fft // 2 + 1
    fftfreqs = np.linspace(0.0, sample_rate / 2.0, n_freq)

    def hz_to_mel(f):
        f = np.asarray(f, dtype=np.float64)
        f_sp = 200.0 / 3.0
        min_log_hz = 1000.0
        min_log_mel = min_log_hz / f_sp
        logstep = np.log(6.4) / 27.0
        return np.where(f >= min_log_hz,
                        min_log_mel + np.log(np.maximum(f, 1e-10) / min_log_hz) / logstep,
                        f / f_sp)

    def mel_to_hz(m):
        m = np.asarray(m, dtype=np.float64)
        f_sp = 200.0 / 3.0
        min_log_hz = 1000.0
        min_log_mel = min_log_hz / f_sp
        logstep = np.log(6.4) / 27.0
        return np.where(m >= min_log_mel,
                        min_log_hz * np.exp(logstep * (m - min_log_mel)),
                        f_sp * m)

    mels = np.linspace(hz_to_mel(fmin), hz_to_mel(fmax), n_mels + 2)
    mel_f = mel_to_hz(mels)
    fdiff = np.diff(mel_f)
    ramps = mel_f[:, None] - fftfreqs[None, :]
    lower = -ramps[:-2] / fdiff[:-1, None]
    upper = ramps[2:] / fdiff[1:, None]
    weights = np.maximum(0.0, np.minimum(lower, upper))
    enorm = 2.0 / (mel_f[2:n_mels + 2] - mel_f[:n_mels])
    weights = weights * enorm[:, None]
    return weights.astype(np.float32)  # (n_mels, n_freq)


def _featurizer_constants(sample_rate, n_fft, win_length, n_mels, lowfreq, highfreq):
    """Window-folded DFT matrices (cos/sin, transposed) and mel filterbank, with the
    frequency axis zero-padded to a multiple of 128 for clean MXU/lane shapes."""
    n_freq = n_fft // 2 + 1
    f_pad = _round_up(n_freq, 128)

    window = np.zeros((n_fft,), np.float64)
    off = (n_fft - win_length) // 2
    window[off:off + win_length] = _hann_window(win_length)  # torch.stft centers the window

    k = np.arange(n_fft, dtype=np.float64)
    f = np.arange(n_freq, dtype=np.float64)
    ang = 2.0 * np.pi * np.outer(f, k) / n_fft               # (n_freq, n_fft)

    wct = np.zeros((f_pad, n_fft), np.float32)
    wst = np.zeros((f_pad, n_fft), np.float32)
    wct[:n_freq] = (np.cos(ang) * window[None, :]).astype(np.float32)
    wst[:n_freq] = (-np.sin(ang) * window[None, :]).astype(np.float32)

    fb = np.zeros((n_mels, f_pad), np.float32)
    fb[:, :n_freq] = _mel_filterbank(sample_rate, n_fft, n_mels, lowfreq, highfreq)
    return jnp.asarray(wct), jnp.asarray(wst), jnp.asarray(fb)


# -----------------------------------------------------------------------------
# Pallas kernel: windowed DFT (2 matmuls) -> power -> mel matmul -> log
# -----------------------------------------------------------------------------
def _logmel_kernel(frames_ref, wct_ref, wst_ref, fb_ref, out_ref, *, log_eps):
    # frames_ref : (1, n_fft, tile_t)  raw frames, time on lanes
    # wct_ref    : (f_pad, n_fft)      window-folded cos DFT matrix (resident)
    # wst_ref    : (f_pad, n_fft)      window-folded sin DFT matrix (resident)
    # fb_ref     : (n_mels, f_pad)     mel filterbank (resident)
    # out_ref    : (1, n_mels, tile_t) log-mel features, time on lanes (lane-dense)
    f = frames_ref[0]                                                        # (n_fft, tile_t)
    re = jnp.dot(wct_ref[...], f, preferred_element_type=jnp.float32)       # MXU
    im = jnp.dot(wst_ref[...], f, preferred_element_type=jnp.float32)       # MXU
    power = re * re + im * im                                                # VPU
    mel = jnp.dot(fb_ref[...], power, preferred_element_type=jnp.float32)   # MXU
    out_ref[0] = jnp.log(mel + log_eps)                                      # EUP


def _choose_time_tiling(num_frames):
    # Single block for short utterances; otherwise 512-frame lane tiles
    # (~1 MiB f32 frames block at n_fft=512; double-buffered blocks + resident
    # constants stay well under the 32 MiB VMEM budget on v5e/v6e/v7x).
    if num_frames <= 512:
        t_pad = _round_up(num_frames, 8)
        return t_pad, t_pad
    tile_t = 512
    return tile_t, _round_up(num_frames, tile_t)


def _logmel_pallas(frames, wct, wst, fb, *, n_mels, tile_t, log_eps):
    B, n_fft, t_pad = frames.shape
    f_pad = wct.shape[0]
    num_t = t_pad // tile_t
    return pl.pallas_call(
        partial(_logmel_kernel, log_eps=log_eps),
        out_shape=jax.ShapeDtypeStruct((B, n_mels, t_pad), jnp.float32),
        grid_spec=pltpu.PrefetchScalarGridSpec(
            num_scalar_prefetch=0,
            grid=(B, num_t),
            in_specs=[
                pl.BlockSpec((1, n_fft, tile_t), lambda b, t: (b, 0, t)),
                pl.BlockSpec((f_pad, n_fft), lambda b, t: (0, 0)),   # resident across grid
                pl.BlockSpec((f_pad, n_fft), lambda b, t: (0, 0)),   # resident across grid
                pl.BlockSpec((n_mels, f_pad), lambda b, t: (0, 0)),  # resident across grid
            ],
            out_specs=pl.BlockSpec((1, n_mels, tile_t), lambda b, t: (b, 0, t)),
        ),
        compiler_params=pltpu.CompilerParams(
            dimension_semantics=("parallel", "parallel"),
            vmem_limit_bytes=32 * 1024 * 1024,
        ),
    )(frames, wct, wst, fb)


# -----------------------------------------------------------------------------
# AudioPreprocessing.forward equivalent
# -----------------------------------------------------------------------------
def quartznet_audio_preprocess(input_signal, length, *,
                               sample_rate=16000, n_fft=512, win_length=320,
                               hop_length=160, n_mels=64, preemph=0.97,
                               lowfreq=0.0, highfreq=None,
                               log_eps=1e-20, std_eps=1e-5, pad_to=0,
                               transpose_out=False, use_pallas=True):
    """Returns (processed_signal, processed_length) like AudioPreprocessing.forward."""
    B, L = input_signal.shape
    x = input_signal.astype(jnp.float32)

    # get_seq_len: ceil(length / hop_length)
    processed_length = jnp.ceil(length.astype(jnp.float32) / hop_length).astype(jnp.int32)

    # Preemphasis (dither omitted; see TODO at top).
    if preemph is not None and preemph != 0.0:
        x = jnp.concatenate([x[:, :1], x[:, 1:] - preemph * x[:, :-1]], axis=1)

    # Centered STFT framing (torch.stft(center=True) reflect-pads by n_fft//2).
    num_frames = 1 + L // hop_length
    tile_t, t_pad = _choose_time_tiling(num_frames)
    half = n_fft // 2
    xp = jnp.pad(x, ((0, 0), (half, half)), mode="reflect")
    need = (t_pad - 1) * hop_length + n_fft
    if xp.shape[1] < need:
        xp = jnp.pad(xp, ((0, 0), (0, need - xp.shape[1])))
    # Frame index laid out (n_fft, t_pad) so frames land with time on the lane axis.
    idx = np.arange(n_fft)[:, None] + hop_length * np.arange(t_pad)[None, :]
    frames = xp[:, jnp.asarray(idx, dtype=jnp.int32)]          # (B, n_fft, t_pad)

    wct, wst, fb = _featurizer_constants(sample_rate, n_fft, win_length, n_mels,
                                         lowfreq, highfreq)

    if use_pallas:
        logmel = _logmel_pallas(frames, wct, wst, fb, n_mels=n_mels,
                                tile_t=tile_t, log_eps=log_eps)
    else:  # pure-JAX reference path
        re = jnp.einsum("fk,bkt->bft", wct, frames)
        im = jnp.einsum("fk,bkt->bft", wst, frames)
        power = re * re + im * im
        logmel = jnp.log(jnp.einsum("mf,bft->bmt", fb, power) + log_eps)

    feats = logmel[:, :, :num_frames]                           # (B, n_mels, T)

    # Per-feature normalization over valid frames (matches normalize_batch('per_feature')).
    T = num_frames
    t_idx = jnp.arange(T, dtype=jnp.int32)
    valid = (t_idx[None, :] < processed_length[:, None]).astype(jnp.float32)   # (B, T)
    vmask = valid[:, None, :]
    cnt = jnp.maximum(processed_length.astype(jnp.float32), 1.0)               # (B,)
    mean = (feats * vmask).sum(axis=2) / cnt[:, None]                          # (B, n_mels)
    centered = feats - mean[:, :, None]
    var = (centered * centered * vmask).sum(axis=2) / jnp.maximum(cnt - 1.0, 1.0)[:, None]
    std = jnp.sqrt(var) + std_eps
    feats = (centered / std[:, :, None]) * vmask                # normalize + mask_fill(0)

    if pad_to > 0 and (feats.shape[-1] % pad_to) != 0:
        feats = jnp.pad(feats, ((0, 0), (0, 0), (0, pad_to - feats.shape[-1] % pad_to)))

    if transpose_out:
        feats = jnp.swapaxes(feats, 1, 2)
    return feats, processed_length


if __name__ == "__main__":
    key = jax.random.PRNGKey(0)
    # Small, module-consistent shapes: batch=2 raw waveforms, 16 kHz, ~0.16 s.
    B, L = 2, 2560
    sig = 0.5 * jax.random.normal(key, (B, L), jnp.float32)
    length = jnp.array([2560, 2000], dtype=jnp.int32)
    # Emulate batch collation: zero-pad beyond each utterance's length.
    sig = sig * (jnp.arange(L)[None, :] < length[:, None]).astype(jnp.float32)

    feats, feat_len = quartznet_audio_preprocess(sig, length, use_pallas=True)
    feats = jax.block_until_ready(feats)

    ref, ref_len = quartznet_audio_preprocess(sig, length, use_pallas=False)
    ref = jax.block_until_ready(ref)

    n_frames = 1 + L // 160
    assert feats.shape == (B, 64, n_frames) and feats.dtype == jnp.float32
    assert feat_len.shape == (B,) and feat_len.dtype == jnp.int32
    assert bool(jnp.all(feat_len == ref_len))
    assert bool(jnp.all(jnp.isfinite(feats)))
    err = float(jnp.max(jnp.abs(feats - ref)))
    assert err < 5e-2, f"max abs err vs reference: {err}"

    print("KERNEL_OK")
</pallas_src>

<mosaic_0001>
module attributes {stable_mosaic.version = 11 : i64} {
  func.func @_logmel_kernel(%arg0: i32, %arg1: i32, %arg2: memref<1x512x24xf32, #tpu.memory_space<vmem>>, %arg3: memref<384x512xf32, #tpu.memory_space<vmem>>, %arg4: memref<384x512xf32, #tpu.memory_space<vmem>>, %arg5: memref<64x384xf32, #tpu.memory_space<vmem>>, %arg6: memref<1x64x24xf32, #tpu.memory_space<vmem>>) attributes {dimension_semantics = [#tpu.dimension_semantics<parallel>, #tpu.dimension_semantics<parallel>], iteration_bounds = array<i64: 2, 1>, scalar_prefetch = 0 : i64, scratch_operands = 0 : i64, tpu.core_type = #tpu.core_type<tc>, window_params = [{transform_indices = @transform_0, window_bounds = array<i64: 1, 512, 24>}, {pipeline_mode = #tpu.pipeline_mode<synchronous>, transform_indices = @transform_1, window_bounds = array<i64: 384, 512>}, {pipeline_mode = #tpu.pipeline_mode<synchronous>, transform_indices = @transform_2, window_bounds = array<i64: 384, 512>}, {pipeline_mode = #tpu.pipeline_mode<synchronous>, transform_indices = @transform_3, window_bounds = array<i64: 64, 384>}, {transform_indices = @transform_4, window_bounds = array<i64: 1, 64, 24>}]} {
    %c0 = arith.constant 0 : index
    %c0_0 = arith.constant 0 : index
    %c0_1 = arith.constant 0 : index
    %0 = vector.load %arg2[%c0, %c0_0, %c0_1] : memref<1x512x24xf32, #tpu.memory_space<vmem>>, vector<1x512x24xf32>
    %1 = vector.shape_cast %0 : vector<1x512x24xf32> to vector<512x24xf32>
    %c0_2 = arith.constant 0 : index
    %c0_3 = arith.constant 0 : index
    %2 = vector.load %arg3[%c0_2, %c0_3] : memref<384x512xf32, #tpu.memory_space<vmem>>, vector<384x512xf32>
    %cst = arith.constant dense<0.000000e+00> : vector<384x24xf32>
    %3 = tpu.matmul %2, %1, %cst {dimension_numbers = #tpu.dot_dimension_numbers<[1], [0], [0], [1], [0, 0, 1, 1], [], []>} : vector<384x512xf32>, vector<512x24xf32>, vector<384x24xf32> -> vector<384x24xf32>
    %c0_4 = arith.constant 0 : index
    %c0_5 = arith.constant 0 : index
    %4 = vector.load %arg4[%c0_4, %c0_5] : memref<384x512xf32, #tpu.memory_space<vmem>>, vector<384x512xf32>
    %cst_6 = arith.constant dense<0.000000e+00> : vector<384x24xf32>
    %5 = tpu.matmul %4, %1, %cst_6 {dimension_numbers = #tpu.dot_dimension_numbers<[1], [0], [0], [1], [0, 0, 1, 1], [], []>} : vector<384x512xf32>, vector<512x24xf32>, vector<384x24xf32> -> vector<384x24xf32>
    %6 = arith.mulf %3, %3 : vector<384x24xf32>
    %7 = arith.mulf %5, %5 : vector<384x24xf32>
    %8 = arith.addf %6, %7 : vector<384x24xf32>
    %c0_7 = arith.constant 0 : index
    %c0_8 = arith.constant 0 : index
    %9 = vector.load %arg5[%c0_7, %c0_8] : memref<64x384xf32, #tpu.memory_space<vmem>>, vector<64x384xf32>
    %cst_9 = arith.constant dense<0.000000e+00> : vector<64x24xf32>
    %10 = tpu.matmul %9, %8, %cst_9 {dimension_numbers = #tpu.dot_dimension_numbers<[1], [0], [0], [1], [0, 0, 1, 1], [], []>} : vector<64x384xf32>, vector<384x24xf32>, vector<64x24xf32> -> vector<64x24xf32>
    %cst_10 = arith.constant 9.99999968E-21 : f32
    %11 = vector.broadcast %cst_10 : f32 to vector<64x24xf32>
    %12 = arith.addf %10, %11 : vector<64x24xf32>
    %13 = math.log %12 : vector<64x24xf32>
    %c0_11 = arith.constant 0 : index
    %c0_12 = arith.constant 0 : index
    %c0_13 = arith.constant 0 : index
    %14 = vector.load %arg6[%c0_11, %c0_12, %c0_13] : memref<1x64x24xf32, #tpu.memory_space<vmem>>, vector<1x64x24xf32>
    %15 = vector.shape_cast %14 : vector<1x64x24xf32> to vector<64x24xf32>
    %16 = vector.shape_cast %13 : vector<64x24xf32> to vector<1x64x24xf32>
    tpu.vector_store %arg6[%c0_11, %c0_12, %c0_13], %16 {strides = array<i32>} : memref<1x64x24xf32, #tpu.memory_space<vmem>>, vector<1x64x24xf32>,
    return
  }
  func.func @transform_0(%arg0: i32, %arg1: i32) -> (i32, i32, i32) {
    %c0_i32 = arith.constant 0 : i32
    %c0_i32_0 = arith.constant 0 : i32
    return %arg0, %c0_i32, %arg1 : i32, i32, i32
  }
  func.func @transform_1(%arg0: i32, %arg1: i32) -> (i32, i32) {
    %c0_i32 = arith.constant 0 : i32
    %c0_i32_0 = arith.constant 0 : i32
    %c0_i32_1 = arith.constant 0 : i32
    return %c0_i32, %c0_i32_0 : i32, i32
  }
  func.func @transform_2(%arg0: i32, %arg1: i32) -> (i32, i32) {
    %c0_i32 = arith.constant 0 : i32
    %c0_i32_0 = arith.constant 0 : i32
    %c0_i32_1 = arith.constant 0 : i32
    return %c0_i32, %c0_i32_0 : i32, i32
  }
  func.func @transform_3(%arg0: i32, %arg1: i32) -> (i32, i32) {
    %c0_i32 = arith.constant 0 : i32
    %c0_i32_0 = arith.constant 0 : i32
    %c0_i32_1 = arith.constant 0 : i32
    return %c0_i32, %c0_i32_0 : i32, i32
  }
  func.func @transform_4(%arg0: i32, %arg1: i32) -> (i32, i32, i32) {
    %c0_i32 = arith.constant 0 : i32
    %c0_i32_0 = arith.constant 0 : i32
    return %arg0, %c0_i32, %arg1 : i32, i32, i32
  }
}

</mosaic_0001>

<bundles_post_ra>
// kernel: tpu_custom_call.1
= control target key start
LH: loop header
LB: loop body
LE: loop exit
PB: predicated region body
PF: predicated region fallthrough
CT: control target
= control target key end

     0   :  { %9 = vsyncpa [#allocation3], 0  ;;  %s3495_s0 = inlined_call_operand.vmem [shape: f32[2,512,24], index: 0, kind: input, shape index: {}]   ;;  %s3496_s1 = inlined_call_operand.hbm [shape: f32[384,512], index: 1, kind: input, shape index: {}]   ;;  %s3497_s2 = inlined_call_operand.hbm [shape: f32[384,512], index: 2, kind: input, shape index: {}]   ;;  %s3498_s3 = inlined_call_operand.vmem [shape: f32[64,384], index: 3, kind: input, shape index: {}]   ;;  %s3499_s4 = inlined_call_operand.vmem [shape: f32[2,64,24], index: 4, kind: output, shape index: {}]  }
   0x1   :  { %10 = vsyncpa [#allocation5], 0  ;;  %s2654_s15 = smov 0   ;;  %s2656_s16 = smov 0  }
   0x2   :  { %s2658_s17 = smov 0  }
   0x3 LB: > { %s2421_s18 = sadd.s32 4294967295, %s2623_s17   ;;  %s28_s19 = sadd.s32 1, %s2619_s16  ;;  %s2623_s17 = sphi %s2658_s17, %s16_s17   ;;  %s2619_s16 = sphi %s2656_s16, %s3569_s16   ;;  %s2615_s15 = sphi %s2654_s15, %s3568_s15  }
   0x4   : > { %p30_p0 = scmp.ge.s32.totalorder %s28_s19, 2  ;;  %p2423_p1 = scmp.ge.s32.totalorder %s2623_s17, 1 }
   0x5   : > { %p152_p2 = scmp.lt.s32.totalorder %s2623_s17, 3  ;;  %p2679_p4 = scmp.eq.s32.totalorder %s2421_s18, 0 }
   0x6   : > { %s3571_s19 = smov (%p30_p0, %s28_s19), 0  ;;  %s163_s24 = sshll.u32 %s3496_s1, 4  ;;  %s164_s24 = int_to_ptr.hbm [resolvable:$true] %s163_s24 }
   0x7   : > { %p2675_p3 = pnand %p2423_p1, %p152_p2  ;;  %s2625_s25 = smov [#allocation2]  }
   0x8   : > { %s165_s26 = sshll.u32 %s2625_s25, 4  ;;  %s177_s29 = sshll.u32 %s3497_s2, 4  ;;  %s166_s26 = int_to_ptr.vmem [resolvable:$true] %s165_s26  ;;  %s178_s29 = int_to_ptr.hbm [resolvable:$true] %s177_s29 }
   0x9   : > { %p2478_p5 = pneg %p2675_p3  ;;  %s2626_s30 = smov 512  }
   0xa   : > { %s2627_s5 = smov 32   ;;  %s2628_s6 = smov [#allocation4]  }
   0xb   : > { %p2479_p6 = pnand %p2679_p4, %p2478_p5  ;;  %s179_s7 = sshll.u32 %s2628_s6, 4  ;;  %s180_s7 = int_to_ptr.vmem [resolvable:$true] %s179_s7 }
   0xc   : > { %209 = sbr.rel (%p2675_p3) target bundleno = 1189 (0x4a5), region = 36 }
   0xd   : > { %2481 = dma.hbm_to_vmem [thread:$0]  (!%p2479_p6), %s164_s24, 24576, %s166_s26, [#allocation3], %s2626_s30, %s2626_s30, %s2627_s5  }
   0xe   : > { %2484 = dma.hbm_to_vmem [thread:$0]  (!%p2479_p6), %s178_s29, 24576, %s180_s7, [#allocation5], %s2626_s30, %s2626_s30, %s2627_s5  }
  0x11   : > { %2606 = dma.done.wait (%p2679_p4), [#allocation3], 24576  }
  0x12   : > { %2608 = vsyncadd (%p2679_p4), [#allocation3], 4294942720 }
  0x13   : > { %2610 = dma.done.wait (%p2679_p4), [#allocation5], 24576  }
  0x14   : > { %2612 = vsyncadd (%p2679_p4), [#allocation5], 4294942720  ;;  %p247_p7 = scmp.lt.s32.totalorder %s2615_s15, 1  ;;  %v329_v62 = vld [vmem:[#allocation2 + $0x10] sm:$0xff]  ;;  %v330_v63 = vld [vmem:[#allocation2 + $0x18] sm:$0xff]  ;;  %vm2306_vm0 = vcmask 195584  }
  0x16   : > { %s3573_s15 = smov (!%p247_p7, %s2615_s15), 1 }
  0x17   : > { %s2436_s8 = sshll.u32 %s3573_s15, 9  ;;  %s2437_s20 = sshll.u32 %s3573_s15, 6 }
  0x18   : > { %s2711_s11 = scalar_lea.vmem %s3495_s0, %s2436_s8  ;;  %s3468_s23 = scalar_lea.vmem %s3499_s4, %s2437_s20 }
  0x19   : > { %v2714_v0 = vld [vmem:[%s2711_s11 + $0x178] sm:$0xff]  ;;  %v2717_v1 = vld [vmem:[%s2711_s11 + $0x170] sm:$0xff]  ;;  %v2731_v5 = vld [vmem:[%s2711_s11 + $0x168] sm:$0xff] }
  0x1a   : > { %v2720_v2 = vld [vmem:[%s2711_s11 + $0x1f8] sm:$0xff]  ;;  %841 = vmatpush.msra.mxu2 %v2714_v0  ;;  %v2736_v6 = vld [vmem:[%s2711_s11 + $0x1f0] sm:$0xff]  ;;  %v2747_v9 = vld [vmem:[%s2711_s11 + $0x1e8] sm:$0xff] }
  0x1b   : > { %1002 = vmatpush.msra.mxu3 %v2720_v2  ;;  %v2725_v3 = vld [vmem:[%s2711_s11 + $0x78] sm:$0xff]  ;;  %v2739_v7 = vld [vmem:[%s2711_s11 + $0x70] sm:$0xff]  ;;  %v2750_v10 = vld [vmem:[%s2711_s11 + $0x68] sm:$0xff] }
  0x1c   : > { %v2728_v4 = vld [vmem:[%s2711_s11 + $0xf8] sm:$0xff]  ;;  %519 = vmatpush.msra.mxu0 %v2725_v3  ;;  %v2742_v8 = vld [vmem:[%s2711_s11 + $0xf0] sm:$0xff]  ;;  %842 = vmatpush.msra.mxu2 %v2717_v1  ;;  %v2755_v11 = vld [vmem:[%s2711_s11 + $0x160] sm:$0xff] }
  0x1d   : > { %680 = vmatpush.msra.mxu1 %v2728_v4  ;;  %1003 = vmatpush.msra.mxu3 %v2736_v6  ;;  %v2758_v12 = vld [vmem:[%s2711_s11 + $0xe8] sm:$0xff]  ;;  %v2761_v13 = vld [vmem:[%s2711_s11 + $0x1e0] sm:$0xff]  ;;  %v2774_v16 = vld [vmem:[%s2711_s11 + $0x158] sm:$0xff] }
  0x1e   : > { %520 = vmatpush.msra.mxu0 %v2739_v7  ;;  %843 = vmatpush.msra.mxu2 %v2731_v5  ;;  %v2766_v14 = vld [vmem:[%s2711_s11 + $0x60] sm:$0xff]  ;;  %v2777_v17 = vld [vmem:[%s2711_s11 + $0x1d8] sm:$0xff]  ;;  %v2790_v20 = vld [vmem:[%s2711_s11 + $0x150] sm:$0xff] }
  0x1f   : > { %681 = vmatpush.msra.mxu1 %v2742_v8  ;;  %1004 = vmatpush.msra.mxu3 %v2747_v9  ;;  %v2769_v15 = vld [vmem:[%s2711_s11 + $0xe0] sm:$0xff]  ;;  %v2782_v18 = vld [vmem:[%s2711_s11 + $0x58] sm:$0xff]  ;;  %v2793_v21 = vld [vmem:[%s2711_s11 + $0x1d0] sm:$0xff] }
  0x20   : > { %521 = vmatpush.msra.mxu0 %v2750_v10  ;;  %844 = vmatpush.msra.mxu2 %v2755_v11  ;;  %v2785_v19 = vld [vmem:[%s2711_s11 + $0xd8] sm:$0xff]  ;;  %v2798_v22 = vld [vmem:[%s2711_s11 + $0x50] sm:$0xff]  ;;  %v2806_v24 = vld [vmem:[%s2711_s11 + $0x148] sm:$0xff] }
  0x21   : > { %682 = vmatpush.msra.mxu1 %v2758_v12  ;;  %1005 = vmatpush.msra.mxu3 %v2761_v13  ;;  %v2801_v23 = vld [vmem:[%s2711_s11 + $0xd0] sm:$0xff]  ;;  %v2809_v25 = vld [vmem:[%s2711_s11 + $0x1c8] sm:$0xff]  ;;  %v2822_v28 = vld [vmem:[%s2711_s11 + $0x140] sm:$0xff] }
  0x22   : > { %522 = vmatpush.msra.mxu0 %v2766_v14  ;;  %845 = vmatpush.msra.mxu2 %v2774_v16  ;;  %v2814_v26 = vld [vmem:[%s2711_s11 + $0x48] sm:$0xff]  ;;  %v2825_v29 = vld [vmem:[%s2711_s11 + $0x1c0] sm:$0xff]  ;;  %v2838_v32 = vld [vmem:[%s2711_s11 + $0x138] sm:$0xff] }
  0x23   : > { %683 = vmatpush.msra.mxu1 %v2769_v15  ;;  %1006 = vmatpush.msra.mxu3 %v2777_v17  ;;  %v2817_v27 = vld [vmem:[%s2711_s11 + $0xc8] sm:$0xff]  ;;  %v2830_v30 = vld [vmem:[%s2711_s11 + $0x40] sm:$0xff]  ;;  %v2841_v33 = vld [vmem:[%s2711_s11 + $0x1b8] sm:$0xff] }
  0x24   : > { %523 = vmatpush.msra.mxu0 %v2782_v18  ;;  %846 = vmatpush.msra.mxu2 %v2790_v20  ;;  %v2833_v31 = vld [vmem:[%s2711_s11 + $0xc0] sm:$0xff]  ;;  %v2846_v34 = vld [vmem:[%s2711_s11 + $0x38] sm:$0xff]  ;;  %v2854_v36 = vld [vmem:[%s2711_s11 + $0x130] sm:$0xff] }
  0x25   : > { %684 = vmatpush.msra.mxu1 %v2785_v19  ;;  %1007 = vmatpush.msra.mxu3 %v2793_v21  ;;  %v2849_v35 = vld [vmem:[%s2711_s11 + $0xb8] sm:$0xff]  ;;  %v2857_v37 = vld [vmem:[%s2711_s11 + $0x1b0] sm:$0xff]  ;;  %v2870_v40 = vld [vmem:[%s2711_s11 + $0x128] sm:$0xff] }
  0x26   : > { %524 = vmatpush.msra.mxu0 %v2798_v22  ;;  %847 = vmatpush.msra.mxu2 %v2806_v24  ;;  %v2862_v38 = vld [vmem:[%s2711_s11 + $0x30] sm:$0xff]  ;;  %v2873_v41 = vld [vmem:[%s2711_s11 + $0x1a8] sm:$0xff]  ;;  %v2886_v44 = vld [vmem:[%s2711_s11 + $0x120] sm:$0xff] }
  0x27   : > { %685 = vmatpush.msra.mxu1 %v2801_v23  ;;  %1008 = vmatpush.msra.mxu3 %v2809_v25  ;;  %v2865_v39 = vld [vmem:[%s2711_s11 + $0xb0] sm:$0xff]  ;;  %v2878_v42 = vld [vmem:[%s2711_s11 + $0x28] sm:$0xff]  ;;  %v2889_v45 = vld [vmem:[%s2711_s11 + $0x1a0] sm:$0xff] }
  0x28   : > { %525 = vmatpush.msra.mxu0 %v2814_v26  ;;  %848 = vmatpush.msra.mxu2 %v2822_v28  ;;  %v2881_v43 = vld [vmem:[%s2711_s11 + $0xa8] sm:$0xff]  ;;  %v2894_v46 = vld [vmem:[%s2711_s11 + $0x20] sm:$0xff]  ;;  %v2902_v48 = vld [vmem:[%s2711_s11 + $0x118] sm:$0xff] }
  0x29   : > { %686 = vmatpush.msra.mxu1 %v2817_v27  ;;  %1009 = vmatpush.msra.mxu3 %v2825_v29  ;;  %v2897_v47 = vld [vmem:[%s2711_s11 + $0xa0] sm:$0xff]  ;;  %v2905_v49 = vld [vmem:[%s2711_s11 + $0x198] sm:$0xff]  ;;  %v2918_v52 = vld [vmem:[%s2711_s11 + $0x110] sm:$0xff] }
  0x2a   : > { %526 = vmatpush.msra.mxu0 %v2830_v30  ;;  %849 = vmatpush.msra.mxu2 %v2838_v32  ;;  %v2910_v50 = vld [vmem:[%s2711_s11 + $0x18] sm:$0xff]  ;;  %v2921_v53 = vld [vmem:[%s2711_s11 + $0x190] sm:$0xff]  ;;  %v2934_v56 = vld [vmem:[%s2711_s11 + $0x108] sm:$0xff] }
  0x2b   : > { %687 = vmatpush.msra.mxu1 %v2833_v31  ;;  %1010 = vmatpush.msra.mxu3 %v2841_v33  ;;  %v2913_v51 = vld [vmem:[%s2711_s11 + $0x98] sm:$0xff]  ;;  %3509 = vst [vmem:[#allocation9_spill] sm:$0xff] %v2921_v53  ;;  %v2926_v54 = vld [vmem:[%s2711_s11 + $0x10] sm:$0xff]  ;;  %v2937_v57 = vld [vmem:[%s2711_s11 + $0x188] sm:$0xff] }
  0x2c   : > { %527 = vmatpush.msra.mxu0 %v2846_v34  ;;  %850 = vmatpush.msra.mxu2 %v2854_v36  ;;  %3508 = vst [vmem:[#allocation8_spill] sm:$0xff] %v2913_v51  ;;  %v2929_v55 = vld [vmem:[%s2711_s11 + $0x90] sm:$0xff]  ;;  %v2942_v58 = vld [vmem:[%s2711_s11 + $0x8] sm:$0xff]  ;;  %v2950_v60 = vld [vmem:[%s2711_s11 + $0x100] sm:$0xff] }
  0x2d   : > { %688 = vmatpush.msra.mxu1 %v2849_v35  ;;  %1011 = vmatpush.msra.mxu3 %v2857_v37  ;;  %3510 = vst [vmem:[#allocation10_spill] sm:$0xff] %v2926_v54  ;;  %v2945_v59 = vld [vmem:[%s2711_s11 + $0x88] sm:$0xff]  ;;  %v2953_v61 = vld [vmem:[%s2711_s11 + $0x180] sm:$0xff] }
  0x2e   : > { %528 = vmatpush.msra.mxu0 %v2862_v38  ;;  %851 = vmatpush.msra.mxu2 %v2870_v40  ;;  %3511 = vst [vmem:[#allocation11_spill] sm:$0xff] %v2929_v55 }
  0x2f   : > { %689 = vmatpush.msra.mxu1 %v2865_v39  ;;  %1012 = vmatpush.msra.mxu3 %v2873_v41  ;;  %3512 = vst [vmem:[#allocation12_spill] sm:$0xff] %v2945_v59 }
  0x30   : > { %529 = vmatpush.msra.mxu0 %v2878_v42  ;;  %852 = vmatpush.msra.mxu2 %v2886_v44  ;;  %3513 = vst [vmem:[#allocation13_spill] sm:$0xff] %v2953_v61 }
  0x31   : > { %690 = vmatpush.msra.mxu1 %v2881_v43  ;;  %1013 = vmatpush.msra.mxu3 %v2889_v45 }
  0x32   : > { %530 = vmatpush.msra.mxu0 %v2894_v46  ;;  %853 = vmatpush.msra.mxu2 %v2902_v48 }
  0x33   : > { %691 = vmatpush.msra.mxu1 %v2897_v47  ;;  %1014 = vmatpush.msra.mxu3 %v2905_v49 }
  0x34   : > { %531 = vmatpush.msra.mxu0 %v2910_v50  ;;  %854 = vmatpush.msra.mxu2 %v2918_v52 }
  0x35   : > { %692 = vmatpush.msra.mxu1 %v2913_v51  ;;  %1015 = vmatpush.msra.mxu3 %v2921_v53  ;;  %v2960_v53 = vld [vmem:[%s2711_s11] sm:$0xff] }
  0x36   : > { %532 = vmatpush.msra.mxu0 %v2926_v54  ;;  %855 = vmatpush.msra.mxu2 %v2934_v56  ;;  %v2963_v51 = vld [vmem:[%s2711_s11 + $0x80] sm:$0xff]  ;;  %v328_v54 = vld [vmem:[#allocation2 + $0x8] sm:$0xff] }
  0x37   : > { %693 = vmatpush.msra.mxu1 %v2929_v55  ;;  %1016 = vmatpush.msra.mxu3 %v2937_v57  ;;  %v327_v55 = vld [vmem:[#allocation2] sm:$0xff] }
  0x38   : > { %533 = vmatpush.msra.mxu0 %v2942_v58  ;;  %856 = vmatpush.msra.mxu2 %v2950_v60 }
  0x39   : > { %694 = vmatpush.msra.mxu1 %v2945_v59  ;;  %1017 = vmatpush.msra.mxu3 %v2953_v61  ;;  %v333_v59 = vld [vmem:[#allocation2 + $0x30] sm:$0xff]  ;;  %v334_v61 = vld [vmem:[#allocation2 + $0x38] sm:$0xff] }
  0x3a   : > { %857 = vmatmul.f32.vlgmr.msra.gmra.mxu2 %v329_v62  ;;  %1018 = vmatmul.f32.vlgmr.msra.gmra.mxu3 %v330_v63  ;;  %v387_v62 = vld [vmem:[#allocation2 + $0x1e0] sm:$0xff]  ;;  %v388_v63 = vld [vmem:[#allocation2 + $0x1e8] sm:$0xff] }
  0x3b   : > { %534 = vmatpush.msra.mxu0 %v2960_v53  ;;  %695 = vmatpush.msra.mxu1 %v2963_v51 }
  0x3c   : > { %535 = vmatmul.f32.vlgmr.msra.gmra.mxu0 %v327_v55  ;;  %696 = vmatmul.f32.vlgmr.msra.gmra.mxu1 %v328_v54  ;;  %v331_v55 = vld [vmem:[#allocation2 + $0x20] sm:$0xff]  ;;  %v332_v54 = vld [vmem:[#allocation2 + $0x28] sm:$0xff] }
  0x3d   : > { %1677 = vmatpush.msrb.mxu2 %v2714_v0  ;;  %1838 = vmatpush.msrb.mxu3 %v2720_v2  ;;  %v337_v0 = vld [vmem:[#allocation2 + $0x50] sm:$0xff]  ;;  %v335_v2 = vld [vmem:[#allocation2 + $0x40] sm:$0xff] }
  0x3e   : > { %1355 = vmatpush.msrb.mxu0 %v2725_v3  ;;  %1516 = vmatpush.msrb.mxu1 %v2728_v4  ;;  %v336_v3 = vld [vmem:[#allocation2 + $0x48] sm:$0xff]  ;;  %v341_v4 = vld [vmem:[#allocation2 + $0x70] sm:$0xff] }
  0x3f   : > { %1678 = vmatpush.msrb.mxu2 %v2717_v1  ;;  %1839 = vmatpush.msrb.mxu3 %v2736_v6  ;;  %v338_v1 = vld [vmem:[#allocation2 + $0x58] sm:$0xff]  ;;  %v339_v6 = vld [vmem:[#allocation2 + $0x60] sm:$0xff] }
  0x40   : > { %1356 = vmatpush.msrb.mxu0 %v2739_v7  ;;  %1517 = vmatpush.msrb.mxu1 %v2742_v8  ;;  %v340_v7 = vld [vmem:[#allocation2 + $0x68] sm:$0xff]  ;;  %v345_v8 = vld [vmem:[#allocation2 + $0x90] sm:$0xff] }
  0x41   : > { %1679 = vmatpush.msrb.mxu2 %v2731_v5  ;;  %1840 = vmatpush.msrb.mxu3 %v2747_v9  ;;  %v342_v5 = vld [vmem:[#allocation2 + $0x78] sm:$0xff] }
  0x42   : > { %860 = vmatmul.f32.gmra.mxu2 %v333_v59  ;;  %1021 = vmatmul.f32.gmra.mxu3 %v334_v61  ;;  %v346_v9 = vld [vmem:[#allocation2 + $0x98] sm:$0xff]  ;;  %v384_v59 = vld [vmem:[#allocation2 + $0x1c8] sm:$0xff] }
  0x43   : > { %1680 = vmatpush.msrb.mxu2 %v2755_v11  ;;  %1357 = vmatpush.msrb.mxu0 %v2750_v10  ;;  %v343_v10 = vld [vmem:[#allocation2 + $0x80] sm:$0xff]  ;;  %v344_v11 = vld [vmem:[#allocation2 + $0x88] sm:$0xff]  ;;  %v390_v61 = vld [vmem:[#allocation2 + $0x1f8] sm:$0xff] }
  0x44   : > { %538 = vmatmul.f32.gmra.mxu0 %v331_v55  ;;  %699 = vmatmul.f32.gmra.mxu1 %v332_v54  ;;  %v393_v55 = vld [vmem:[#allocation2 + $0x210] sm:$0xff]  ;;  %v394_v54 = vld [vmem:[#allocation2 + $0x218] sm:$0xff] }
  0x45   : > { %1518 = vmatpush.msrb.mxu1 %v2758_v12  ;;  %1681 = vmatpush.msrb.mxu2 %v2774_v16  ;;  %v349_v12 = vld [vmem:[#allocation2 + $0xb0] sm:$0xff] }
  0x46   : > { %1841 = vmatpush.msrb.mxu3 %v2761_v13  ;;  %1358 = vmatpush.msrb.mxu0 %v2766_v14  ;;  %v350_v13 = vld [vmem:[#allocation2 + $0xb8] sm:$0xff]  ;;  %v3514_v14 = vld [vmem:[#allocation8_spill] sm:$0xff]  ;;  %v3516_v16 = vld [vmem:[#allocation10_spill] sm:$0xff] }
  0x47   : > { %1519 = vmatpush.msrb.mxu1 %v2769_v15  ;;  %1682 = vmatpush.msrb.mxu2 %v2790_v20  ;;  %v3515_v15 = vld [vmem:[#allocation9_spill] sm:$0xff]  ;;  %v3518_v20 = vld [vmem:[#allocation12_spill] sm:$0xff] }
  0x48   : > { %1842 = vmatpush.msrb.mxu3 %v2777_v17  ;;  %1359 = vmatpush.msrb.mxu0 %v2782_v18  ;;  %v347_v17 = vld [vmem:[#allocation2 + $0xa0] sm:$0xff]  ;;  %v348_v18 = vld [vmem:[#allocation2 + $0xa8] sm:$0xff] }
  0x49   : > { %1520 = vmatpush.msrb.mxu1 %v2785_v19  ;;  %1683 = vmatpush.msrb.mxu2 %v2806_v24  ;;  %v3517_v19 = vld [vmem:[#allocation11_spill] sm:$0xff]  ;;  %v351_v24 = vld [vmem:[#allocation2 + $0xc0] sm:$0xff] }
  0x4a   : > { %863 = vmatmul.f32.gmra.mxu2 %v337_v0  ;;  %1024 = vmatmul.f32.gmra.mxu3 %v338_v1 }
  0x4b   : > { %1843 = vmatpush.msrb.mxu3 %v2793_v21  ;;  %1360 = vmatpush.msrb.mxu0 %v2798_v22  ;;  %v3519_v21 = vld [vmem:[#allocation13_spill] sm:$0xff]  ;;  %v353_v22 = vld [vmem:[#allocation2 + $0xd0] sm:$0xff] }
  0x4c   : > { %541 = vmatmul.f32.gmra.mxu0 %v335_v2  ;;  %702 = vmatmul.f32.gmra.mxu1 %v336_v3  ;;  %v391_v2 = vld [vmem:[#allocation2 + $0x200] sm:$0xff]  ;;  %v392_v3 = vld [vmem:[#allocation2 + $0x208] sm:$0xff] }
  0x4d   : > { %1521 = vmatpush.msrb.mxu1 %v2801_v23  ;;  %1684 = vmatpush.msrb.mxu2 %v2822_v28  ;;  %v354_v23 = vld [vmem:[#allocation2 + $0xd8] sm:$0xff]  ;;  %v355_v28 = vld [vmem:[#allocation2 + $0xe0] sm:$0xff] }
  0x4e   : > { %1844 = vmatpush.msrb.mxu3 %v2809_v25  ;;  %1361 = vmatpush.msrb.mxu0 %v2814_v26  ;;  %v352_v25 = vld [vmem:[#allocation2 + $0xc8] sm:$0xff]  ;;  %v357_v26 = vld [vmem:[#allocation2 + $0xf0] sm:$0xff] }
  0x4f   : > { %1522 = vmatpush.msrb.mxu1 %v2817_v27  ;;  %1685 = vmatpush.msrb.mxu2 %v2838_v32  ;;  %v358_v27 = vld [vmem:[#allocation2 + $0xf8] sm:$0xff]  ;;  %v359_v32 = vld [vmem:[#allocation2 + $0x100] sm:$0xff] }
  0x50   : > { %1845 = vmatpush.msrb.mxu3 %v2825_v29  ;;  %1362 = vmatpush.msrb.mxu0 %v2830_v30  ;;  %v356_v29 = vld [vmem:[#allocation2 + $0xe8] sm:$0xff]  ;;  %v361_v30 = vld [vmem:[#allocation2 + $0x110] sm:$0xff] }
  0x51   : > { %1523 = vmatpush.msrb.mxu1 %v2833_v31  ;;  %1686 = vmatpush.msrb.mxu2 %v2854_v36  ;;  %v362_v31 = vld [vmem:[#allocation2 + $0x118] sm:$0xff]  ;;  %v363_v36 = vld [vmem:[#allocation2 + $0x120] sm:$0xff] }
  0x52   : > { %866 = vmatmul.f32.gmra.mxu2 %v341_v4  ;;  %1027 = vmatmul.f32.gmra.mxu3 %v342_v5 }
  0x53   : > { %1846 = vmatpush.msrb.mxu3 %v2841_v33  ;;  %1363 = vmatpush.msrb.mxu0 %v2846_v34  ;;  %v360_v33 = vld [vmem:[#allocation2 + $0x108] sm:$0xff]  ;;  %v365_v34 = vld [vmem:[#allocation2 + $0x130] sm:$0xff] }
  0x54   : > { %544 = vmatmul.f32.gmra.mxu0 %v339_v6  ;;  %705 = vmatmul.f32.gmra.mxu1 %v340_v7 }
  0x55   : > { %1524 = vmatpush.msrb.mxu1 %v2849_v35  ;;  %1687 = vmatpush.msrb.mxu2 %v2870_v40  ;;  %v366_v35 = vld [vmem:[#allocation2 + $0x138] sm:$0xff]  ;;  %v367_v40 = vld [vmem:[#allocation2 + $0x140] sm:$0xff] }
  0x56   : > { %1847 = vmatpush.msrb.mxu3 %v2857_v37  ;;  %1364 = vmatpush.msrb.mxu0 %v2862_v38  ;;  %v364_v37 = vld [vmem:[#allocation2 + $0x128] sm:$0xff]  ;;  %v369_v38 = vld [vmem:[#allocation2 + $0x150] sm:$0xff] }
  0x57   : > { %1525 = vmatpush.msrb.mxu1 %v2865_v39  ;;  %1688 = vmatpush.msrb.mxu2 %v2886_v44  ;;  %v370_v39 = vld [vmem:[#allocation2 + $0x158] sm:$0xff]  ;;  %v371_v44 = vld [vmem:[#allocation2 + $0x160] sm:$0xff] }
  0x58   : > { %1848 = vmatpush.msrb.mxu3 %v2873_v41  ;;  %1365 = vmatpush.msrb.mxu0 %v2878_v42  ;;  %v368_v41 = vld [vmem:[#allocation2 + $0x148] sm:$0xff]  ;;  %v373_v42 = vld [vmem:[#allocation2 + $0x170] sm:$0xff] }
  0x59   : > { %1526 = vmatpush.msrb.mxu1 %v2881_v43  ;;  %1689 = vmatpush.msrb.mxu2 %v2902_v48  ;;  %v374_v43 = vld [vmem:[#allocation2 + $0x178] sm:$0xff]  ;;  %v375_v48 = vld [vmem:[#allocation2 + $0x180] sm:$0xff] }
  0x5a   : > { %869 = vmatmul.f32.gmra.mxu2 %v345_v8  ;;  %1030 = vmatmul.f32.gmra.mxu3 %v346_v9  ;;  %v397_v8 = vld [vmem:[#allocation2 + $0x230] sm:$0xff]  ;;  %v398_v9 = vld [vmem:[#allocation2 + $0x238] sm:$0xff] }
  0x5b   : > { %1849 = vmatpush.msrb.mxu3 %v2889_v45  ;;  %1366 = vmatpush.msrb.mxu0 %v2894_v46  ;;  %v372_v45 = vld [vmem:[#allocation2 + $0x168] sm:$0xff]  ;;  %v377_v46 = vld [vmem:[#allocation2 + $0x190] sm:$0xff] }
  0x5c   : > { %547 = vmatmul.f32.gmra.mxu0 %v343_v10  ;;  %708 = vmatmul.f32.gmra.mxu1 %v344_v11 }
  0x5d   : > { %1527 = vmatpush.msrb.mxu1 %v2897_v47  ;;  %1690 = vmatpush.msrb.mxu2 %v2918_v52  ;;  %v378_v47 = vld [vmem:[#allocation2 + $0x198] sm:$0xff]  ;;  %v379_v52 = vld [vmem:[#allocation2 + $0x1a0] sm:$0xff] }
  0x5e   : > { %1850 = vmatpush.msrb.mxu3 %v2905_v49  ;;  %1367 = vmatpush.msrb.mxu0 %v2910_v50  ;;  %v376_v49 = vld [vmem:[#allocation2 + $0x188] sm:$0xff]  ;;  %v381_v50 = vld [vmem:[#allocation2 + $0x1b0] sm:$0xff] }
  0x5f   : > { %1528 = vmatpush.msrb.mxu1 %v3514_v14  ;;  %1691 = vmatpush.msrb.mxu2 %v2934_v56  ;;  %v385_v56 = vld [vmem:[#allocation2 + $0x1d0] sm:$0xff]  ;;  %v396_v14 = vld [vmem:[#allocation2 + $0x228] sm:$0xff] }
  0x60   : > { %1851 = vmatpush.msrb.mxu3 %v3515_v15  ;;  %1368 = vmatpush.msrb.mxu0 %v3516_v16 }
  0x61   : > { %1529 = vmatpush.msrb.mxu1 %v3517_v19  ;;  %1692 = vmatpush.msrb.mxu2 %v2950_v60  ;;  %v389_v60 = vld [vmem:[#allocation2 + $0x1f0] sm:$0xff] }
  0x62   : > { %872 = vmatmul.f32.gmra.mxu2 %v349_v12  ;;  %1033 = vmatmul.f32.gmra.mxu3 %v350_v13  ;;  %v395_v13 = vld [vmem:[#allocation2 + $0x220] sm:$0xff]  ;;  %v401_v19 = vld [vmem:[#allocation2 + $0x250] sm:$0xff] }
  0x63   : > { %1852 = vmatpush.msrb.mxu3 %v2937_v57  ;;  %1369 = vmatpush.msrb.mxu0 %v2942_v58  ;;  %v386_v57 = vld [vmem:[#allocation2 + $0x1d8] sm:$0xff]  ;;  %v383_v58 = vld [vmem:[#allocation2 + $0x1c0] sm:$0xff] }
  0x64   : > { %550 = vmatmul.f32.gmra.mxu0 %v347_v17  ;;  %711 = vmatmul.f32.gmra.mxu1 %v348_v18 }
  0x65   : > { %1530 = vmatpush.msrb.mxu1 %v3518_v20  ;;  %1853 = vmatpush.msrb.mxu3 %v3519_v21  ;;  %v402_v20 = vld [vmem:[#allocation2 + $0x258] sm:$0xff] }
  0x66   : > { %1370 = vmatpush.msrb.mxu0 %v2960_v53  ;;  %v380_v53 = vld [vmem:[#allocation2 + $0x1a8] sm:$0xff] }
  0x67   : > { %1531 = vmatpush.msrb.mxu1 %v2963_v51  ;;  %v382_v51 = vld [vmem:[#allocation2 + $0x1b8] sm:$0xff] }
  0x6a   : > { %875 = vmatmul.f32.gmra.mxu2 %v353_v22  ;;  %1036 = vmatmul.f32.gmra.mxu3 %v354_v23 }
  0x6c   : > { %553 = vmatmul.f32.gmra.mxu0 %v351_v24  ;;  %714 = vmatmul.f32.gmra.mxu1 %v352_v25  ;;  %v399_v24 = vld [vmem:[#allocation2 + $0x240] sm:$0xff]  ;;  %v400_v25 = vld [vmem:[#allocation2 + $0x248] sm:$0xff] }
  0x72   : > { %878 = vmatmul.f32.gmra.mxu2 %v357_v26  ;;  %1039 = vmatmul.f32.gmra.mxu3 %v358_v27 }
  0x74   : > { %556 = vmatmul.f32.gmra.mxu0 %v355_v28  ;;  %717 = vmatmul.f32.gmra.mxu1 %v356_v29 }
  0x7a   : > { %881 = vmatmul.f32.gmra.mxu2 %v361_v30  ;;  %1042 = vmatmul.f32.gmra.mxu3 %v362_v31  ;;  %v405_v30 = vld [vmem:[#allocation2 + $0x270] sm:$0xff]  ;;  %v406_v31 = vld [vmem:[#allocation2 + $0x278] sm:$0xff] }
  0x7c   : > { %559 = vmatmul.f32.gmra.mxu0 %v359_v32  ;;  %720 = vmatmul.f32.gmra.mxu1 %v360_v33 }
  0x82   : > { %884 = vmatmul.f32.gmra.mxu2 %v365_v34  ;;  %1045 = vmatmul.f32.gmra.mxu3 %v366_v35  ;;  %v403_v35 = vld [vmem:[#allocation2 + $0x260] sm:$0xff] }
  0x84   : > { %562 = vmatmul.f32.gmra.mxu0 %v363_v36  ;;  %723 = vmatmul.f32.gmra.mxu1 %v364_v37  ;;  %v404_v36 = vld [vmem:[#allocation2 + $0x268] sm:$0xff] }
  0x8a   : > { %887 = vmatmul.f32.gmra.mxu2 %v369_v38  ;;  %1048 = vmatmul.f32.gmra.mxu3 %v370_v39 }
  0x8c   : > { %565 = vmatmul.f32.gmra.mxu0 %v367_v40  ;;  %726 = vmatmul.f32.gmra.mxu1 %v368_v41  ;;  %v409_v41 = vld [vmem:[#allocation2 + $0x290] sm:$0xff] }
  0x92   : > { %890 = vmatmul.f32.gmra.mxu2 %v373_v42  ;;  %1051 = vmatmul.f32.gmra.mxu3 %v374_v43  ;;  %v410_v42 = vld [vmem:[#allocation2 + $0x298] sm:$0xff] }
  0x94   : > { %568 = vmatmul.f32.gmra.mxu0 %v371_v44  ;;  %729 = vmatmul.f32.gmra.mxu1 %v372_v45 }
  0x9a   : > { %893 = vmatmul.f32.gmra.mxu2 %v377_v46  ;;  %1054 = vmatmul.f32.gmra.mxu3 %v378_v47  ;;  %v407_v46 = vld [vmem:[#allocation2 + $0x280] sm:$0xff]  ;;  %v408_v47 = vld [vmem:[#allocation2 + $0x288] sm:$0xff] }
  0x9c   : > { %571 = vmatmul.f32.gmra.mxu0 %v375_v48  ;;  %732 = vmatmul.f32.gmra.mxu1 %v376_v49 }
  0xa2   : > { %896 = vmatmul.f32.gmra.mxu2 %v381_v50  ;;  %1057 = vmatmul.f32.gmra.mxu3 %v382_v51 }
  0xa4   : > { %574 = vmatmul.f32.gmra.mxu0 %v379_v52  ;;  %735 = vmatmul.f32.gmra.mxu1 %v380_v53  ;;  %v413_v52 = vld [vmem:[#allocation2 + $0x2b0] sm:$0xff]  ;;  %v414_v53 = vld [vmem:[#allocation2 + $0x2b8] sm:$0xff] }
  0xaa   : > { %899 = vmatmul.f32.gmra.mxu2 %v385_v56  ;;  %1060 = vmatmul.f32.gmra.mxu3 %v386_v57 }
  0xac   : > { %577 = vmatmul.f32.gmra.mxu0 %v383_v58  ;;  %738 = vmatmul.f32.gmra.mxu1 %v384_v59  ;;  %v411_v59 = vld [vmem:[#allocation2 + $0x2a0] sm:$0xff] }
  0xb2   : > { %902 = vmatmul.f32.gmra.mxu2 %v389_v60  ;;  %1063 = vmatmul.f32.gmra.mxu3 %v390_v61  ;;  %v412_v60 = vld [vmem:[#allocation2 + $0x2a8] sm:$0xff] }
  0xb4   : > { %580 = vmatmul.f32.gmra.mxu0 %v387_v62  ;;  %741 = vmatmul.f32.gmra.mxu1 %v388_v63 }
  0xb9   : > { %v536_v0 = vpop.f32.mrf.mxu0  ;;  %v697_v1 = vpop.f32.mrf.mxu1 }
  0xba   : > { %905 = vmatmul.f32.gmra.mxu2 %v393_v55  ;;  %v698_v4 = vadd.f32 %v697_v1, %v536_v0  ;;  %1066 = vmatmul.f32.gmra.mxu3 %v394_v54  ;;  %v417_v54 = vld [vmem:[#allocation2 + $0x2d0] sm:$0xff]  ;;  %v418_v0 = vld [vmem:[#allocation2 + $0x2d8] sm:$0xff] }
  0xbc   : > { %583 = vmatmul.f32.gmra.mxu0 %v391_v2  ;;  %744 = vmatmul.f32.gmra.mxu1 %v392_v3 }
  0xbd   : > { %v858_v5 = vpop.f32.mrf.mxu2  ;;  %v1019_v6 = vpop.f32.mrf.mxu3 }
  0xbe   : > { %v859_v7 = vadd.f32 %v858_v5, %v698_v4  ;;  %v415_v4 = vld [vmem:[#allocation2 + $0x2c0] sm:$0xff]  ;;  %v416_v5 = vld [vmem:[#allocation2 + $0x2c8] sm:$0xff] }
  0xc0   : > { %v3033_v10 = vadd.f32 %v1019_v6, %v859_v7 }
  0xc1   : > { %v539_v11 = vpop.f32.mrf.mxu0  ;;  %v700_v12 = vpop.f32.mrf.mxu1 }
  0xc2   : > { %908 = vmatmul.f32.gmra.mxu2 %v397_v8  ;;  %v701_v15 = vadd.f32 %v700_v12, %v539_v11  ;;  %1069 = vmatmul.f32.gmra.mxu3 %v398_v9  ;;  %v421_v11 = vld [vmem:[#allocation2 + $0x2f0] sm:$0xff]  ;;  %v422_v12 = vld [vmem:[#allocation2 + $0x2f8] sm:$0xff] }
  0xc4   : > { %586 = vmatmul.f32.gmra.mxu0 %v395_v13  ;;  %747 = vmatmul.f32.gmra.mxu1 %v396_v14 }
  0xc5   : > { %v861_v16 = vpop.f32.mrf.mxu2  ;;  %v1022_v17 = vpop.f32.mrf.mxu3 }
  0xc6   : > { %v862_v18 = vadd.f32 %v861_v16, %v701_v15  ;;  %v419_v16 = vld [vmem:[#allocation2 + $0x2e0] sm:$0xff] }
  0xc8   : > { %v3035_v21 = vadd.f32 %v1022_v17, %v862_v18  ;;  %v420_v17 = vld [vmem:[#allocation2 + $0x2e8] sm:$0xff] }
  0xc9   : > { %v542_v22 = vpop.f32.mrf.mxu0  ;;  %v703_v23 = vpop.f32.mrf.mxu1 }
  0xca   : > { %911 = vmatmul.f32.gmra.mxu2 %v401_v19  ;;  %v704_v26 = vadd.f32 %v703_v23, %v542_v22  ;;  %1072 = vmatmul.f32.gmra.mxu3 %v402_v20  ;;  %v425_v23 = vld [vmem:[#allocation2 + $0x310] sm:$0xff] }
  0xcc   : > { %589 = vmatmul.f32.gmra.mxu0 %v399_v24  ;;  %750 = vmatmul.f32.gmra.mxu1 %v400_v25  ;;  %v426_v24 = vld [vmem:[#allocation2 + $0x318] sm:$0xff] }
  0xcd   : > { %v864_v27 = vpop.f32.mrf.mxu2  ;;  %v1025_v28 = vpop.f32.mrf.mxu3 }
  0xce   : > { %v865_v29 = vadd.f32 %v864_v27, %v704_v26 }
  0xd0   : > { %v3037_v32 = vadd.f32 %v1025_v28, %v865_v29  ;;  %v423_v28 = vld [vmem:[#allocation2 + $0x300] sm:$0xff]  ;;  %v424_v29 = vld [vmem:[#allocation2 + $0x308] sm:$0xff] }
  0xd1   : > { %v545_v33 = vpop.f32.mrf.mxu0  ;;  %v706_v34 = vpop.f32.mrf.mxu1 }
  0xd2   : > { %914 = vmatmul.f32.gmra.mxu2 %v405_v30  ;;  %v707_v37 = vadd.f32 %v706_v34, %v545_v33  ;;  %1075 = vmatmul.f32.gmra.mxu3 %v406_v31 }
  0xd4   : > { %592 = vmatmul.f32.gmra.mxu0 %v403_v35  ;;  %753 = vmatmul.f32.gmra.mxu1 %v404_v36  ;;  %v429_v35 = vld [vmem:[#allocation2 + $0x330] sm:$0xff]  ;;  %v430_v36 = vld [vmem:[#allocation2 + $0x338] sm:$0xff] }
  0xd5   : > { %v867_v38 = vpop.f32.mrf.mxu2  ;;  %v1028_v39 = vpop.f32.mrf.mxu3 }
  0xd6   : > { %v868_v40 = vadd.f32 %v867_v38, %v707_v37 }
  0xd8   : > { %v3039_v43 = vadd.f32 %v1028_v39, %v868_v40  ;;  %v427_v40 = vld [vmem:[#allocation2 + $0x320] sm:$0xff] }
  0xd9   : > { %v548_v44 = vpop.f32.mrf.mxu0  ;;  %v709_v45 = vpop.f32.mrf.mxu1 }
  0xda   : > { %917 = vmatmul.f32.gmra.mxu2 %v409_v41  ;;  %v710_v48 = vadd.f32 %v709_v45, %v548_v44  ;;  %1078 = vmatmul.f32.gmra.mxu3 %v410_v42  ;;  %v428_v41 = vld [vmem:[#allocation2 + $0x328] sm:$0xff] }
  0xdc   : > { %595 = vmatmul.f32.gmra.mxu0 %v407_v46  ;;  %756 = vmatmul.f32.gmra.mxu1 %v408_v47  ;;  %v433_v47 = vld [vmem:[#allocation2 + $0x350] sm:$0xff] }
  0xdd   : > { %v870_v49 = vpop.f32.mrf.mxu2  ;;  %v1031_v50 = vpop.f32.mrf.mxu3 }
  0xde   : > { %v871_v51 = vadd.f32 %v870_v49, %v710_v48  ;;  %v434_v48 = vld [vmem:[#allocation2 + $0x358] sm:$0xff] }
  0xe0   : > { %v3041_v56 = vadd.f32 %v1031_v50, %v871_v51 }
  0xe1   : > { %v551_v57 = vpop.f32.mrf.mxu0  ;;  %v712_v58 = vpop.f32.mrf.mxu1 }
  0xe2   : > { %920 = vmatmul.f32.gmra.mxu2 %v413_v52  ;;  %v713_v61 = vadd.f32 %v712_v58, %v551_v57  ;;  %1081 = vmatmul.f32.gmra.mxu3 %v414_v53  ;;  %v431_v52 = vld [vmem:[#allocation2 + $0x340] sm:$0xff]  ;;  %v432_v53 = vld [vmem:[#allocation2 + $0x348] sm:$0xff] }
  0xe4   : > { %598 = vmatmul.f32.gmra.mxu0 %v411_v59  ;;  %759 = vmatmul.f32.gmra.mxu1 %v412_v60 }
  0xe5   : > { %v873_v62 = vpop.f32.mrf.mxu2  ;;  %v1034_v63 = vpop.f32.mrf.mxu3 }
  0xe6   : > { %v874_v55 = vadd.f32 %v873_v62, %v713_v61  ;;  %v437_v61 = vld [vmem:[#allocation2 + $0x370] sm:$0xff]  ;;  %v438_v62 = vld [vmem:[#allocation2 + $0x378] sm:$0xff] }
  0xe8   : > { %v3043_v1 = vadd.f32 %v1034_v63, %v874_v55 }
  0xe9   : > { %v554_v2 = vpop.f32.mrf.mxu0  ;;  %v715_v3 = vpop.f32.mrf.mxu1 }
  0xea   : > { %923 = vmatmul.f32.gmra.mxu2 %v417_v54  ;;  %v716_v6 = vadd.f32 %v715_v3, %v554_v2  ;;  %1084 = vmatmul.f32.gmra.mxu3 %v418_v0  ;;  %v435_v0 = vld [vmem:[#allocation2 + $0x360] sm:$0xff]  ;;  %v436_v2 = vld [vmem:[#allocation2 + $0x368] sm:$0xff] }
  0xec   : > { %601 = vmatmul.f32.gmra.mxu0 %v415_v4  ;;  %762 = vmatmul.f32.gmra.mxu1 %v416_v5 }
  0xed   : > { %v876_v7 = vpop.f32.mrf.mxu2  ;;  %v1037_v8 = vpop.f32.mrf.mxu3 }
  0xee   : > { %v877_v9 = vadd.f32 %v876_v7, %v716_v6  ;;  %v441_v7 = vld [vmem:[#allocation2 + $0x390] sm:$0xff] }
  0xf0   : > { %v3045_v13 = vadd.f32 %v1037_v8, %v877_v9  ;;  %v442_v8 = vld [vmem:[#allocation2 + $0x398] sm:$0xff] }
  0xf1   : > { %v557_v14 = vpop.f32.mrf.mxu0  ;;  %v718_v15 = vpop.f32.mrf.mxu1 }
  0xf2   : > { %926 = vmatmul.f32.gmra.mxu2 %v421_v11  ;;  %v719_v18 = vadd.f32 %v718_v15, %v557_v14  ;;  %1087 = vmatmul.f32.gmra.mxu3 %v422_v12  ;;  %v439_v14 = vld [vmem:[#allocation2 + $0x380] sm:$0xff]  ;;  %v440_v15 = vld [vmem:[#allocation2 + $0x388] sm:$0xff] }
  0xf4   : > { %604 = vmatmul.f32.gmra.mxu0 %v419_v16  ;;  %765 = vmatmul.f32.gmra.mxu1 %v420_v17 }
  0xf5   : > { %v879_v19 = vpop.f32.mrf.mxu2  ;;  %v1040_v20 = vpop.f32.mrf.mxu3 }
  0xf6   : > { %v880_v22 = vadd.f32 %v879_v19, %v719_v18 }
  0xf8   : > { %v3047_v25 = vadd.f32 %v1040_v20, %v880_v22  ;;  %v445_v20 = vld [vmem:[#allocation2 + $0x3b0] sm:$0xff]  ;;  %v446_v22 = vld [vmem:[#allocation2 + $0x3b8] sm:$0xff] }
  0xf9   : > { %v560_v26 = vpop.f32.mrf.mxu0  ;;  %v721_v27 = vpop.f32.mrf.mxu1 }
  0xfa   : > { %929 = vmatmul.f32.gmra.mxu2 %v425_v23  ;;  %v722_v30 = vadd.f32 %v721_v27, %v560_v26  ;;  %1090 = vmatmul.f32.gmra.mxu3 %v426_v24  ;;  %v443_v27 = vld [vmem:[#allocation2 + $0x3a0] sm:$0xff] }
  0xfc   : > { %607 = vmatmul.f32.gmra.mxu0 %v423_v28  ;;  %768 = vmatmul.f32.gmra.mxu1 %v424_v29  ;;  %v444_v28 = vld [vmem:[#allocation2 + $0x3a8] sm:$0xff] }
  0xfd   : > { %v882_v31 = vpop.f32.mrf.mxu2  ;;  %v1043_v33 = vpop.f32.mrf.mxu3 }
  0xfe   : > { %v883_v34 = vadd.f32 %v882_v31, %v722_v30 }
 0x100   : > { %v3049_v37 = vadd.f32 %v1043_v33, %v883_v34  ;;  %v449_v34 = vld [vmem:[#allocation2 + $0x3d0] sm:$0xff] }
 0x101   : > { %v563_v38 = vpop.f32.mrf.mxu0  ;;  %v724_v39 = vpop.f32.mrf.mxu1 }
 0x102   : > { %932 = vmatmul.f32.gmra.mxu2 %v429_v35  ;;  %v725_v42 = vadd.f32 %v724_v39, %v563_v38  ;;  %1093 = vmatmul.f32.gmra.mxu3 %v430_v36  ;;  %v450_v35 = vld [vmem:[#allocation2 + $0x3d8] sm:$0xff] }
 0x104   : > { %610 = vmatmul.f32.gmra.mxu0 %v427_v40  ;;  %771 = vmatmul.f32.gmra.mxu1 %v428_v41  ;;  %v447_v40 = vld [vmem:[#allocation2 + $0x3c0] sm:$0xff]  ;;  %v448_v41 = vld [vmem:[#allocation2 + $0x3c8] sm:$0xff] }
 0x105   : > { %v885_v44 = vpop.f32.mrf.mxu2  ;;  %v1046_v45 = vpop.f32.mrf.mxu3 }
 0x106   : > { %v886_v46 = vadd.f32 %v885_v44, %v725_v42 }
 0x108   : > { %v3051_v49 = vadd.f32 %v1046_v45, %v886_v46 }
 0x109   : > { %v566_v50 = vpop.f32.mrf.mxu0  ;;  %v727_v51 = vpop.f32.mrf.mxu1 }
 0x10a   : > { %935 = vmatmul.f32.gmra.mxu2 %v433_v47  ;;  %v728_v57 = vadd.f32 %v727_v51, %v566_v50  ;;  %1096 = vmatmul.f32.gmra.mxu3 %v434_v48  ;;  %v453_v47 = vld [vmem:[#allocation2 + $0x3f0] sm:$0xff]  ;;  %v454_v48 = vld [vmem:[#allocation2 + $0x3f8] sm:$0xff] }
 0x10c   : > { %613 = vmatmul.f32.gmra.mxu0 %v431_v52  ;;  %774 = vmatmul.f32.gmra.mxu1 %v432_v53  ;;  %v451_v53 = vld [vmem:[#allocation2 + $0x3e0] sm:$0xff] }
 0x10d   : > { %v888_v58 = vpop.f32.mrf.mxu2  ;;  %v1049_v59 = vpop.f32.mrf.mxu3 }
 0x10e   : > { %v889_v60 = vadd.f32 %v888_v58, %v728_v57  ;;  %v452_v57 = vld [vmem:[#allocation2 + $0x3e8] sm:$0xff] }
 0x110   : > { %v3053_v63 = vadd.f32 %v1049_v59, %v889_v60 }
 0x111   : > { %v569_v55 = vpop.f32.mrf.mxu0  ;;  %v730_v54 = vpop.f32.mrf.mxu1 }
 0x112   : > { %938 = vmatmul.f32.gmra.mxu2 %v437_v61  ;;  %v731_v3 = vadd.f32 %v730_v54, %v569_v55  ;;  %1099 = vmatmul.f32.gmra.mxu3 %v438_v62  ;;  %v457_v62 = vld [vmem:[#allocation2 + $0x410] sm:$0xff]  ;;  %v458_v55 = vld [vmem:[#allocation2 + $0x418] sm:$0xff] }
 0x114   : > { %616 = vmatmul.f32.gmra.mxu0 %v435_v0  ;;  %777 = vmatmul.f32.gmra.mxu1 %v436_v2 }
 0x115   : > { %v891_v4 = vpop.f32.mrf.mxu2  ;;  %v1052_v5 = vpop.f32.mrf.mxu3 }
 0x116   : > { %v892_v6 = vadd.f32 %v891_v4, %v731_v3  ;;  %v455_v3 = vld [vmem:[#allocation2 + $0x400] sm:$0xff]  ;;  %v456_v4 = vld [vmem:[#allocation2 + $0x408] sm:$0xff] }
 0x118   : > { %v3055_v9 = vadd.f32 %v1052_v5, %v892_v6 }
 0x119   : > { %v572_v11 = vpop.f32.mrf.mxu0  ;;  %v733_v12 = vpop.f32.mrf.mxu1 }
 0x11a   : > { %941 = vmatmul.f32.gmra.mxu2 %v441_v7  ;;  %v734_v16 = vadd.f32 %v733_v12, %v572_v11  ;;  %1102 = vmatmul.f32.gmra.mxu3 %v442_v8  ;;  %v461_v11 = vld [vmem:[#allocation2 + $0x430] sm:$0xff]  ;;  %v462_v12 = vld [vmem:[#allocation2 + $0x438] sm:$0xff] }
 0x11c   : > { %619 = vmatmul.f32.gmra.mxu0 %v439_v14  ;;  %780 = vmatmul.f32.gmra.mxu1 %v440_v15 }
 0x11d   : > { %v894_v17 = vpop.f32.mrf.mxu2  ;;  %v1055_v18 = vpop.f32.mrf.mxu3 }
 0x11e   : > { %v895_v19 = vadd.f32 %v894_v17, %v734_v16  ;;  %v459_v17 = vld [vmem:[#allocation2 + $0x420] sm:$0xff] }
 0x120   : > { %v3057_v23 = vadd.f32 %v1055_v18, %v895_v19  ;;  %v460_v18 = vld [vmem:[#allocation2 + $0x428] sm:$0xff] }
 0x121   : > { %v575_v24 = vpop.f32.mrf.mxu0  ;;  %v736_v26 = vpop.f32.mrf.mxu1 }
 0x122   : > { %944 = vmatmul.f32.gmra.mxu2 %v445_v20  ;;  %v737_v29 = vadd.f32 %v736_v26, %v575_v24  ;;  %1105 = vmatmul.f32.gmra.mxu3 %v446_v22  ;;  %v465_v26 = vld [vmem:[#allocation2 + $0x450] sm:$0xff] }
 0x124   : > { %622 = vmatmul.f32.gmra.mxu0 %v443_v27  ;;  %783 = vmatmul.f32.gmra.mxu1 %v444_v28  ;;  %v466_v27 = vld [vmem:[#allocation2 + $0x458] sm:$0xff] }
 0x125   : > { %v897_v30 = vpop.f32.mrf.mxu2  ;;  %v1058_v31 = vpop.f32.mrf.mxu3 }
 0x126   : > { %v898_v33 = vadd.f32 %v897_v30, %v737_v29 }
 0x128   : > { %v3059_v36 = vadd.f32 %v1058_v31, %v898_v33  ;;  %v463_v31 = vld [vmem:[#allocation2 + $0x440] sm:$0xff]  ;;  %v464_v33 = vld [vmem:[#allocation2 + $0x448] sm:$0xff] }
 0x129   : > { %v578_v38 = vpop.f32.mrf.mxu0  ;;  %v739_v39 = vpop.f32.mrf.mxu1 }
 0x12a   : > { %947 = vmatmul.f32.gmra.mxu2 %v449_v34  ;;  %v740_v42 = vadd.f32 %v739_v39, %v578_v38  ;;  %1108 = vmatmul.f32.gmra.mxu3 %v450_v35 }
 0x12c   : > { %625 = vmatmul.f32.gmra.mxu0 %v447_v40  ;;  %786 = vmatmul.f32.gmra.mxu1 %v448_v41  ;;  %v469_v40 = vld [vmem:[#allocation2 + $0x470] sm:$0xff]  ;;  %v470_v41 = vld [vmem:[#allocation2 + $0x478] sm:$0xff] }
 0x12d   : > { %v900_v44 = vpop.f32.mrf.mxu2  ;;  %v1061_v45 = vpop.f32.mrf.mxu3 }
 0x12e   : > { %v901_v46 = vadd.f32 %v900_v44, %v740_v42 }
 0x130   : > { %v3061_v50 = vadd.f32 %v1061_v45, %v901_v46  ;;  %v467_v46 = vld [vmem:[#allocation2 + $0x460] sm:$0xff] }
 0x131   : > { %v581_v51 = vpop.f32.mrf.mxu0  ;;  %v742_v52 = vpop.f32.mrf.mxu1 }
 0x132   : > { %950 = vmatmul.f32.gmra.mxu2 %v453_v47  ;;  %v743_v58 = vadd.f32 %v742_v52, %v581_v51  ;;  %1111 = vmatmul.f32.gmra.mxu3 %v454_v48  ;;  %v468_v47 = vld [vmem:[#allocation2 + $0x468] sm:$0xff] }
 0x134   : > { %628 = vmatmul.f32.gmra.mxu0 %v451_v53  ;;  %789 = vmatmul.f32.gmra.mxu1 %v452_v57  ;;  %v473_v57 = vld [vmem:[#allocation2 + $0x490] sm:$0xff] }
 0x135   : > { %v903_v59 = vpop.f32.mrf.mxu2  ;;  %v1064_v60 = vpop.f32.mrf.mxu3 }
 0x136   : > { %v904_v61 = vadd.f32 %v903_v59, %v743_v58  ;;  %v474_v58 = vld [vmem:[#allocation2 + $0x498] sm:$0xff] }
 0x138   : > { %v3063_v54 = vadd.f32 %v1064_v60, %v904_v61 }
 0x139   : > { %v584_v0 = vpop.f32.mrf.mxu0  ;;  %v745_v2 = vpop.f32.mrf.mxu1 }
 0x13a   : > { %953 = vmatmul.f32.gmra.mxu2 %v457_v62  ;;  %v746_v5 = vadd.f32 %v745_v2, %v584_v0  ;;  %1114 = vmatmul.f32.gmra.mxu3 %v458_v55  ;;  %v471_v62 = vld [vmem:[#allocation2 + $0x480] sm:$0xff]  ;;  %v472_v55 = vld [vmem:[#allocation2 + $0x488] sm:$0xff] }
 0x13c   : > { %631 = vmatmul.f32.gmra.mxu0 %v455_v3  ;;  %792 = vmatmul.f32.gmra.mxu1 %v456_v4 }
 0x13d   : > { %v906_v6 = vpop.f32.mrf.mxu2  ;;  %v1067_v7 = vpop.f32.mrf.mxu3 }
 0x13e   : > { %v907_v8 = vadd.f32 %v906_v6, %v746_v5  ;;  %v477_v5 = vld [vmem:[#allocation2 + $0x4b0] sm:$0xff]  ;;  %v478_v6 = vld [vmem:[#allocation2 + $0x4b8] sm:$0xff] }
 0x140   : > { %v3065_v14 = vadd.f32 %v1067_v7, %v907_v8 }
 0x141   : > { %v587_v15 = vpop.f32.mrf.mxu0  ;;  %v748_v16 = vpop.f32.mrf.mxu1 }
 0x142   : > { %956 = vmatmul.f32.gmra.mxu2 %v461_v11  ;;  %v749_v19 = vadd.f32 %v748_v16, %v587_v15  ;;  %1117 = vmatmul.f32.gmra.mxu3 %v462_v12  ;;  %v475_v12 = vld [vmem:[#allocation2 + $0x4a0] sm:$0xff]  ;;  %v476_v15 = vld [vmem:[#allocation2 + $0x4a8] sm:$0xff] }
 0x144   : > { %634 = vmatmul.f32.gmra.mxu0 %v459_v17  ;;  %795 = vmatmul.f32.gmra.mxu1 %v460_v18 }
 0x145   : > { %v909_v20 = vpop.f32.mrf.mxu2  ;;  %v1070_v22 = vpop.f32.mrf.mxu3 }
 0x146   : > { %v910_v24 = vadd.f32 %v909_v20, %v749_v19  ;;  %v481_v20 = vld [vmem:[#allocation2 + $0x4d0] sm:$0xff] }
 0x148   : > { %v3067_v28 = vadd.f32 %v1070_v22, %v910_v24  ;;  %v482_v22 = vld [vmem:[#allocation2 + $0x4d8] sm:$0xff] }
 0x149   : > { %v590_v29 = vpop.f32.mrf.mxu0  ;;  %v751_v30 = vpop.f32.mrf.mxu1 }
 0x14a   : > { %959 = vmatmul.f32.gmra.mxu2 %v465_v26  ;;  %v752_v34 = vadd.f32 %v751_v30, %v590_v29  ;;  %1120 = vmatmul.f32.gmra.mxu3 %v466_v27  ;;  %v479_v29 = vld [vmem:[#allocation2 + $0x4c0] sm:$0xff]  ;;  %v480_v30 = vld [vmem:[#allocation2 + $0x4c8] sm:$0xff] }
 0x14c   : > { %637 = vmatmul.f32.gmra.mxu0 %v463_v31  ;;  %798 = vmatmul.f32.gmra.mxu1 %v464_v33 }
 0x14d   : > { %v912_v35 = vpop.f32.mrf.mxu2  ;;  %v1073_v38 = vpop.f32.mrf.mxu3 }
 0x14e   : > { %v913_v39 = vadd.f32 %v912_v35, %v752_v34 }
 0x150   : > { %v3069_v42 = vadd.f32 %v1073_v38, %v913_v39  ;;  %v485_v38 = vld [vmem:[#allocation2 + $0x4f0] sm:$0xff]  ;;  %v486_v39 = vld [vmem:[#allocation2 + $0x4f8] sm:$0xff] }
 0x151   : > { %v593_v44 = vpop.f32.mrf.mxu0  ;;  %v754_v45 = vpop.f32.mrf.mxu1 }
 0x152   : > { %962 = vmatmul.f32.gmra.mxu2 %v469_v40  ;;  %v755_v48 = vadd.f32 %v754_v45, %v593_v44  ;;  %1123 = vmatmul.f32.gmra.mxu3 %v470_v41  ;;  %v483_v45 = vld [vmem:[#allocation2 + $0x4e0] sm:$0xff] }
 0x154   : > { %640 = vmatmul.f32.gmra.mxu0 %v467_v46  ;;  %801 = vmatmul.f32.gmra.mxu1 %v468_v47  ;;  %v484_v46 = vld [vmem:[#allocation2 + $0x4e8] sm:$0xff] }
 0x155   : > { %v915_v51 = vpop.f32.mrf.mxu2  ;;  %v1076_v52 = vpop.f32.mrf.mxu3 }
 0x156   : > { %v916_v53 = vadd.f32 %v915_v51, %v755_v48 }
 0x158   : > { %v3071_v59 = vadd.f32 %v1076_v52, %v916_v53  ;;  %v489_v53 = vld [vmem:[#allocation2 + $0x510] sm:$0xff] }
 0x159   : > { %v596_v60 = vpop.f32.mrf.mxu0  ;;  %v757_v61 = vpop.f32.mrf.mxu1 }
 0x15a   : > { %965 = vmatmul.f32.gmra.mxu2 %v473_v57  ;;  %v758_v0 = vadd.f32 %v757_v61, %v596_v60  ;;  %1126 = vmatmul.f32.gmra.mxu3 %v474_v58  ;;  %v490_v57 = vld [vmem:[#allocation2 + $0x518] sm:$0xff] }
 0x15c   : > { %643 = vmatmul.f32.gmra.mxu0 %v471_v62  ;;  %804 = vmatmul.f32.gmra.mxu1 %v472_v55  ;;  %v487_v62 = vld [vmem:[#allocation2 + $0x500] sm:$0xff]  ;;  %v488_v55 = vld [vmem:[#allocation2 + $0x508] sm:$0xff] }
 0x15d   : > { %v918_v2 = vpop.f32.mrf.mxu2  ;;  %v1079_v3 = vpop.f32.mrf.mxu3 }
 0x15e   : > { %v919_v4 = vadd.f32 %v918_v2, %v758_v0 }
 0x160   : > { %v3073_v7 = vadd.f32 %v1079_v3, %v919_v4 }
 0x161   : > { %v599_v8 = vpop.f32.mrf.mxu0  ;;  %v760_v11 = vpop.f32.mrf.mxu1 }
 0x162   : > { %968 = vmatmul.f32.gmra.mxu2 %v477_v5  ;;  %v761_v16 = vadd.f32 %v760_v11, %v599_v8  ;;  %1129 = vmatmul.f32.gmra.mxu3 %v478_v6  ;;  %v493_v5 = vld [vmem:[#allocation2 + $0x530] sm:$0xff]  ;;  %v494_v6 = vld [vmem:[#allocation2 + $0x538] sm:$0xff] }
 0x164   : > { %646 = vmatmul.f32.gmra.mxu0 %v475_v12  ;;  %807 = vmatmul.f32.gmra.mxu1 %v476_v15  ;;  %v491_v15 = vld [vmem:[#allocation2 + $0x520] sm:$0xff] }
 0x165   : > { %v921_v17 = vpop.f32.mrf.mxu2  ;;  %v1082_v18 = vpop.f32.mrf.mxu3 }
 0x166   : > { %v922_v19 = vadd.f32 %v921_v17, %v761_v16  ;;  %v492_v16 = vld [vmem:[#allocation2 + $0x528] sm:$0xff] }
 0x168   : > { %v3075_v24 = vadd.f32 %v1082_v18, %v922_v19 }
 0x169   : > { %v602_v26 = vpop.f32.mrf.mxu0  ;;  %v763_v27 = vpop.f32.mrf.mxu1 }
 0x16a   : > { %971 = vmatmul.f32.gmra.mxu2 %v481_v20  ;;  %v764_v31 = vadd.f32 %v763_v27, %v602_v26  ;;  %1132 = vmatmul.f32.gmra.mxu3 %v482_v22  ;;  %v497_v22 = vld [vmem:[#allocation2 + $0x550] sm:$0xff]  ;;  %v498_v26 = vld [vmem:[#allocation2 + $0x558] sm:$0xff] }
 0x16c   : > { %649 = vmatmul.f32.gmra.mxu0 %v479_v29  ;;  %810 = vmatmul.f32.gmra.mxu1 %v480_v30 }
 0x16d   : > { %v924_v33 = vpop.f32.mrf.mxu2  ;;  %v1085_v34 = vpop.f32.mrf.mxu3 }
 0x16e   : > { %v925_v35 = vadd.f32 %v924_v33, %v764_v31  ;;  %v495_v31 = vld [vmem:[#allocation2 + $0x540] sm:$0xff]  ;;  %v496_v33 = vld [vmem:[#allocation2 + $0x548] sm:$0xff] }
 0x170   : > { %v3077_v40 = vadd.f32 %v1085_v34, %v925_v35 }
 0x171   : > { %v605_v41 = vpop.f32.mrf.mxu0  ;;  %v766_v44 = vpop.f32.mrf.mxu1 }
 0x172   : > { %974 = vmatmul.f32.gmra.mxu2 %v485_v38  ;;  %v767_v47 = vadd.f32 %v766_v44, %v605_v41  ;;  %1135 = vmatmul.f32.gmra.mxu3 %v486_v39  ;;  %v501_v41 = vld [vmem:[#allocation2 + $0x570] sm:$0xff]  ;;  %v502_v44 = vld [vmem:[#allocation2 + $0x578] sm:$0xff] }
 0x174   : > { %652 = vmatmul.f32.gmra.mxu0 %v483_v45  ;;  %813 = vmatmul.f32.gmra.mxu1 %v484_v46 }
 0x175   : > { %v927_v48 = vpop.f32.mrf.mxu2  ;;  %v1088_v51 = vpop.f32.mrf.mxu3 }
 0x176   : > { %v928_v52 = vadd.f32 %v927_v48, %v767_v47  ;;  %v499_v48 = vld [vmem:[#allocation2 + $0x560] sm:$0xff] }
 0x178   : > { %v3079_v58 = vadd.f32 %v1088_v51, %v928_v52  ;;  %v500_v51 = vld [vmem:[#allocation2 + $0x568] sm:$0xff] }
 0x179   : > { %v608_v60 = vpop.f32.mrf.mxu0  ;;  %v769_v61 = vpop.f32.mrf.mxu1 }
 0x17a   : > { %977 = vmatmul.f32.gmra.mxu2 %v489_v53  ;;  %v770_v0 = vadd.f32 %v769_v61, %v608_v60  ;;  %1138 = vmatmul.f32.gmra.mxu3 %v490_v57  ;;  %v505_v61 = vld [vmem:[#allocation2 + $0x590] sm:$0xff] }
 0x17c   : > { %655 = vmatmul.f32.gmra.mxu0 %v487_v62  ;;  %816 = vmatmul.f32.gmra.mxu1 %v488_v55  ;;  %v506_v62 = vld [vmem:[#allocation2 + $0x598] sm:$0xff] }
 0x17d   : > { %v930_v2 = vpop.f32.mrf.mxu2  ;;  %v1091_v3 = vpop.f32.mrf.mxu3 }
 0x17e   : > { %v931_v4 = vadd.f32 %v930_v2, %v770_v0 }
 0x180   : > { %v3081_v8 = vadd.f32 %v1091_v3, %v931_v4  ;;  %v503_v3 = vld [vmem:[#allocation2 + $0x580] sm:$0xff]  ;;  %v504_v4 = vld [vmem:[#allocation2 + $0x588] sm:$0xff] }
 0x181   : > { %v611_v11 = vpop.f32.mrf.mxu0  ;;  %v772_v12 = vpop.f32.mrf.mxu1 }
 0x182   : > { %3520 = vst [vmem:[#allocation8_spill] sm:$0xff] %v3081_v8  ;;  %980 = vmatmul.f32.gmra.mxu2 %v493_v5  ;;  %v773_v17 = vadd.f32 %v772_v12, %v611_v11  ;;  %1141 = vmatmul.f32.gmra.mxu3 %v494_v6 }
 0x184   : > { %658 = vmatmul.f32.gmra.mxu0 %v491_v15  ;;  %819 = vmatmul.f32.gmra.mxu1 %v492_v16  ;;  %v509_v15 = vld [vmem:[#allocation2 + $0x5b0] sm:$0xff]  ;;  %v510_v16 = vld [vmem:[#allocation2 + $0x5b8] sm:$0xff] }
 0x185   : > { %v933_v18 = vpop.f32.mrf.mxu2  ;;  %v1094_v19 = vpop.f32.mrf.mxu3 }
 0x186   : > { %v934_v20 = vadd.f32 %v933_v18, %v773_v17 }
 0x188   : > { %v3083_v27 = vadd.f32 %v1094_v19, %v934_v20  ;;  %v507_v20 = vld [vmem:[#allocation2 + $0x5a0] sm:$0xff] }
 0x189   : > { %v614_v29 = vpop.f32.mrf.mxu0  ;;  %v775_v30 = vpop.f32.mrf.mxu1 }
 0x18a   : > { %3521 = vst [vmem:[#allocation9_spill] sm:$0xff] %v3083_v27  ;;  %983 = vmatmul.f32.gmra.mxu2 %v497_v22  ;;  %v776_v34 = vadd.f32 %v775_v30, %v614_v29  ;;  %1144 = vmatmul.f32.gmra.mxu3 %v498_v26  ;;  %v508_v22 = vld [vmem:[#allocation2 + $0x5a8] sm:$0xff] }
 0x18c   : > { %661 = vmatmul.f32.gmra.mxu0 %v495_v31  ;;  %822 = vmatmul.f32.gmra.mxu1 %v496_v33  ;;  %v513_v33 = vld [vmem:[#allocation2 + $0x5d0] sm:$0xff] }
 0x18d   : > { %v936_v35 = vpop.f32.mrf.mxu2  ;;  %v1097_v38 = vpop.f32.mrf.mxu3 }
 0x18e   : > { %v937_v39 = vadd.f32 %v936_v35, %v776_v34  ;;  %v514_v34 = vld [vmem:[#allocation2 + $0x5d8] sm:$0xff] }
 0x190   : > { %v3085_v45 = vadd.f32 %v1097_v38, %v937_v39 }
 0x191   : > { %v617_v46 = vpop.f32.mrf.mxu0  ;;  %v778_v47 = vpop.f32.mrf.mxu1 }
 0x192   : > { %3522 = vst [vmem:[#allocation10_spill] sm:$0xff] %v3085_v45  ;;  %986 = vmatmul.f32.gmra.mxu2 %v501_v41  ;;  %v779_v52 = vadd.f32 %v778_v47, %v617_v46  ;;  %1147 = vmatmul.f32.gmra.mxu3 %v502_v44  ;;  %v511_v41 = vld [vmem:[#allocation2 + $0x5c0] sm:$0xff]  ;;  %v512_v44 = vld [vmem:[#allocation2 + $0x5c8] sm:$0xff]  ;;  %v1289_v45 = vld [vmem:[#allocation4 + $0x3f0] sm:$0xff] }
 0x194   : > { %664 = vmatmul.f32.gmra.mxu0 %v499_v48  ;;  %825 = vmatmul.f32.gmra.mxu1 %v500_v51 }
 0x195   : > { %v939_v53 = vpop.f32.mrf.mxu2  ;;  %v1100_v57 = vpop.f32.mrf.mxu3 }
 0x196   : > { %v940_v60 = vadd.f32 %v939_v53, %v779_v52  ;;  %v517_v52 = vld [vmem:[#allocation2 + $0x5f0] sm:$0xff]  ;;  %v518_v53 = vld [vmem:[#allocation2 + $0x5f8] sm:$0xff] }
 0x198   : > { %v3087_v55 = vadd.f32 %v1100_v57, %v940_v60 }
 0x199   : > { %v620_v0 = vpop.f32.mrf.mxu0  ;;  %v781_v2 = vpop.f32.mrf.mxu1 }
 0x19a   : > { %3523 = vst [vmem:[#allocation11_spill] sm:$0xff] %v3087_v55  ;;  %989 = vmatmul.f32.gmra.mxu2 %v505_v61  ;;  %v782_v5 = vadd.f32 %v781_v2, %v620_v0  ;;  %1150 = vmatmul.f32.gmra.mxu3 %v506_v62  ;;  %v515_v62 = vld [vmem:[#allocation2 + $0x5e0] sm:$0xff]  ;;  %v516_v0 = vld [vmem:[#allocation2 + $0x5e8] sm:$0xff] }
 0x19b   : > { %v1287_v55 = vld [vmem:[#allocation4 + $0x3e0] sm:$0xff] }
 0x19c   : > { %667 = vmatmul.f32.gmra.mxu0 %v503_v3  ;;  %828 = vmatmul.f32.gmra.mxu1 %v504_v4 }
 0x19d   : > { %v942_v6 = vpop.f32.mrf.mxu2  ;;  %v1103_v11 = vpop.f32.mrf.mxu3 }
 0x19e   : > { %v943_v12 = vadd.f32 %v942_v6, %v782_v5  ;;  %v1165_v6 = vld [vmem:[#allocation4 + $0x10] sm:$0xff] }
 0x1a0   : > { %v3089_v17 = vadd.f32 %v1103_v11, %v943_v12  ;;  %v1166_v11 = vld [vmem:[#allocation4 + $0x18] sm:$0xff] }
 0x1a1   : > { %v623_v18 = vpop.f32.mrf.mxu0  ;;  %v784_v19 = vpop.f32.mrf.mxu1 }
 0x1a2   : > { %3524 = vst [vmem:[#allocation12_spill] sm:$0xff] %v3089_v17  ;;  %992 = vmatmul.f32.gmra.mxu2 %v509_v15  ;;  %v785_v26 = vadd.f32 %v784_v19, %v623_v18  ;;  %1153 = vmatmul.f32.gmra.mxu3 %v510_v16  ;;  %v1163_v18 = vld [vmem:[#allocation4] sm:$0xff]  ;;  %v1164_v19 = vld [vmem:[#allocation4 + $0x8] sm:$0xff] }
 0x1a3   : > { %v1288_v17 = vld [vmem:[#allocation4 + $0x3e8] sm:$0xff] }
 0x1a4   : > { %670 = vmatmul.f32.gmra.mxu0 %v507_v20  ;;  %831 = vmatmul.f32.gmra.mxu1 %v508_v22 }
 0x1a5   : > { %v945_v29 = vpop.f32.mrf.mxu2  ;;  %v1106_v30 = vpop.f32.mrf.mxu3 }
 0x1a6   : > { %v946_v31 = vadd.f32 %v945_v29, %v785_v26 }
 0x1a8   : > { %v3091_v35 = vadd.f32 %v1106_v30, %v946_v31  ;;  %v1169_v30 = vld [vmem:[#allocation4 + $0x30] sm:$0xff]  ;;  %v1170_v31 = vld [vmem:[#allocation4 + $0x38] sm:$0xff] }
 0x1a9   : > { %v626_v38 = vpop.f32.mrf.mxu0  ;;  %v787_v39 = vpop.f32.mrf.mxu1 }
 0x1aa   : > { %3525 = vst [vmem:[#allocation13_spill] sm:$0xff] %v3091_v35  ;;  %995 = vmatmul.f32.gmra.mxu2 %v513_v33  ;;  %v788_v46 = vadd.f32 %v787_v39, %v626_v38  ;;  %1156 = vmatmul.f32.gmra.mxu3 %v514_v34  ;;  %v1167_v39 = vld [vmem:[#allocation4 + $0x20] sm:$0xff] }
 0x1ac   : > { %673 = vmatmul.f32.gmra.mxu0 %v511_v41  ;;  %834 = vmatmul.f32.gmra.mxu1 %v512_v44  ;;  %v1168_v41 = vld [vmem:[#allocation4 + $0x28] sm:$0xff] }
 0x1ad   : > { %v948_v47 = vpop.f32.mrf.mxu2  ;;  %v1109_v48 = vpop.f32.mrf.mxu3 }
 0x1ae   : > { %v949_v51 = vadd.f32 %v948_v47, %v788_v46 }
 0x1b0   : > { %v3093_v57 = vadd.f32 %v1109_v48, %v949_v51  ;;  %v1173_v51 = vld [vmem:[#allocation4 + $0x50] sm:$0xff] }
 0x1b1   : > { %v629_v60 = vpop.f32.mrf.mxu0  ;;  %v790_v61 = vpop.f32.mrf.mxu1 }
 0x1b2   : > { %3526 = vst [vmem:[#allocation14_spill] sm:$0xff] %v3093_v57  ;;  %998 = vmatmul.f32.gmra.mxu2 %v517_v52  ;;  %v791_v2 = vadd.f32 %v790_v61, %v629_v60  ;;  %1159 = vmatmul.f32.gmra.mxu3 %v518_v53  ;;  %v1174_v52 = vld [vmem:[#allocation4 + $0x58] sm:$0xff] }
 0x1b4   : > { %676 = vmatmul.f32.gmra.mxu0 %v515_v62  ;;  %837 = vmatmul.f32.gmra.mxu1 %v516_v0  ;;  %v1171_v62 = vld [vmem:[#allocation4 + $0x40] sm:$0xff]  ;;  %v1172_v0 = vld [vmem:[#allocation4 + $0x48] sm:$0xff] }
 0x1b5   : > { %v951_v3 = vpop.f32.mrf.mxu2  ;;  %v1112_v4 = vpop.f32.mrf.mxu3 }
 0x1b6   : > { %v952_v5 = vadd.f32 %v951_v3, %v791_v2 }
 0x1b8   : > { %v3095_v12 = vadd.f32 %v1112_v4, %v952_v5 }
 0x1b9   : > { %v632_v15 = vpop.f32.mrf.mxu0  ;;  %v793_v16 = vpop.f32.mrf.mxu1 }
 0x1ba   : > { %3527 = vst [vmem:[#allocation15_spill] sm:$0xff] %v3095_v12  ;;  %1693 = vmatmul.f32.vlgmr.msrb.gmra.mxu2 %v1165_v6  ;;  %v794_v20 = vadd.f32 %v793_v16, %v632_v15  ;;  %1854 = vmatmul.f32.vlgmr.msrb.gmra.mxu3 %v1166_v11  ;;  %v1177_v6 = vld [vmem:[#allocation4 + $0x70] sm:$0xff]  ;;  %v1178_v11 = vld [vmem:[#allocation4 + $0x78] sm:$0xff] }
 0x1bc   : > { %1371 = vmatmul.f32.vlgmr.msrb.gmra.mxu0 %v1163_v18  ;;  %1532 = vmatmul.f32.vlgmr.msrb.gmra.mxu1 %v1164_v19  ;;  %v1175_v19 = vld [vmem:[#allocation4 + $0x60] sm:$0xff] }
 0x1bd   : > { %v954_v22 = vpop.f32.mrf.mxu2  ;;  %v1115_v26 = vpop.f32.mrf.mxu3 }
 0x1be   : > { %v955_v29 = vadd.f32 %v954_v22, %v794_v20  ;;  %v1176_v20 = vld [vmem:[#allocation4 + $0x68] sm:$0xff] }
 0x1c0   : > { %v3097_v33 = vadd.f32 %v1115_v26, %v955_v29 }
 0x1c1   : > { %v635_v34 = vpop.f32.mrf.mxu0  ;;  %v796_v38 = vpop.f32.mrf.mxu1 }
 0x1c2   : > { %3528 = vst [vmem:[#allocation16_spill] sm:$0xff] %v3097_v33  ;;  %1696 = vmatmul.f32.gmra.mxu2 %v1169_v30  ;;  %v797_v44 = vadd.f32 %v796_v38, %v635_v34  ;;  %1857 = vmatmul.f32.gmra.mxu3 %v1170_v31  ;;  %v1181_v31 = vld [vmem:[#allocation4 + $0x90] sm:$0xff]  ;;  %v1182_v34 = vld [vmem:[#allocation4 + $0x98] sm:$0xff] }
 0x1c4   : > { %1374 = vmatmul.f32.gmra.mxu0 %v1167_v39  ;;  %1535 = vmatmul.f32.gmra.mxu1 %v1168_v41 }
 0x1c5   : > { %v957_v46 = vpop.f32.mrf.mxu2  ;;  %v1118_v47 = vpop.f32.mrf.mxu3 }
 0x1c6   : > { %v958_v48 = vadd.f32 %v957_v46, %v797_v44  ;;  %v1179_v44 = vld [vmem:[#allocation4 + $0x80] sm:$0xff]  ;;  %v1180_v46 = vld [vmem:[#allocation4 + $0x88] sm:$0xff] }
 0x1c8   : > { %v3099_v53 = vadd.f32 %v1118_v47, %v958_v48 }
 0x1c9   : > { %v638_v60 = vpop.f32.mrf.mxu0  ;;  %v799_v61 = vpop.f32.mrf.mxu1 }
 0x1ca   : > { %3529 = vst [vmem:[#allocation17_spill] sm:$0xff] %v3099_v53  ;;  %1699 = vmatmul.f32.gmra.mxu2 %v1173_v51  ;;  %v800_v2 = vadd.f32 %v799_v61, %v638_v60  ;;  %1860 = vmatmul.f32.gmra.mxu3 %v1174_v52  ;;  %v1185_v60 = vld [vmem:[#allocation4 + $0xb0] sm:$0xff]  ;;  %v1186_v61 = vld [vmem:[#allocation4 + $0xb8] sm:$0xff] }
 0x1cc   : > { %1377 = vmatmul.f32.gmra.mxu0 %v1171_v62  ;;  %1538 = vmatmul.f32.gmra.mxu1 %v1172_v0 }
 0x1cd   : > { %v960_v3 = vpop.f32.mrf.mxu2  ;;  %v1121_v4 = vpop.f32.mrf.mxu3 }
 0x1ce   : > { %v961_v5 = vadd.f32 %v960_v3, %v800_v2  ;;  %v1183_v3 = vld [vmem:[#allocation4 + $0xa0] sm:$0xff] }
 0x1d0   : > { %v3101_v15 = vadd.f32 %v1121_v4, %v961_v5  ;;  %v1184_v4 = vld [vmem:[#allocation4 + $0xa8] sm:$0xff] }
 0x1d1   : > { %v641_v16 = vpop.f32.mrf.mxu0  ;;  %v802_v18 = vpop.f32.mrf.mxu1 }
 0x1d2   : > { %3530 = vst [vmem:[#allocation18_spill] sm:$0xff] %v3101_v15  ;;  %1702 = vmatmul.f32.gmra.mxu2 %v1177_v6  ;;  %v803_v22 = vadd.f32 %v802_v18, %v641_v16  ;;  %1863 = vmatmul.f32.gmra.mxu3 %v1178_v11  ;;  %v1189_v18 = vld [vmem:[#allocation4 + $0xd0] sm:$0xff]  ;;  %v1286_v15 = vld [vmem:[#allocation4 + $0x3d8] sm:$0xff] }
 0x1d4   : > { %1380 = vmatmul.f32.gmra.mxu0 %v1175_v19  ;;  %1541 = vmatmul.f32.gmra.mxu1 %v1176_v20  ;;  %v1190_v19 = vld [vmem:[#allocation4 + $0xd8] sm:$0xff] }
 0x1d5   : > { %v963_v26 = vpop.f32.mrf.mxu2  ;;  %v1124_v29 = vpop.f32.mrf.mxu3 }
 0x1d6   : > { %v964_v30 = vadd.f32 %v963_v26, %v803_v22 }
 0x1d8   : > { %v3103_v38 = vadd.f32 %v1124_v29, %v964_v30  ;;  %v1187_v29 = vld [vmem:[#allocation4 + $0xc0] sm:$0xff]  ;;  %v1188_v30 = vld [vmem:[#allocation4 + $0xc8] sm:$0xff] }
 0x1d9   : > { %v644_v39 = vpop.f32.mrf.mxu0  ;;  %v805_v41 = vpop.f32.mrf.mxu1 }
 0x1da   : > { %3531 = vst [vmem:[#allocation19_spill] sm:$0xff] %v3103_v38  ;;  %1705 = vmatmul.f32.gmra.mxu2 %v1181_v31  ;;  %v806_v47 = vadd.f32 %v805_v41, %v644_v39  ;;  %1866 = vmatmul.f32.gmra.mxu3 %v1182_v34  ;;  %v1285_v38 = vld [vmem:[#allocation4 + $0x3d0] sm:$0xff] }
 0x1dc   : > { %1383 = vmatmul.f32.gmra.mxu0 %v1179_v44  ;;  %1544 = vmatmul.f32.gmra.mxu1 %v1180_v46  ;;  %v1193_v44 = vld [vmem:[#allocation4 + $0xf0] sm:$0xff]  ;;  %v1194_v46 = vld [vmem:[#allocation4 + $0xf8] sm:$0xff] }
 0x1dd   : > { %v966_v48 = vpop.f32.mrf.mxu2  ;;  %v1127_v51 = vpop.f32.mrf.mxu3 }
 0x1de   : > { %v967_v52 = vadd.f32 %v966_v48, %v806_v47 }
 0x1e0   : > { %v3105_v62 = vadd.f32 %v1127_v51, %v967_v52  ;;  %v1191_v52 = vld [vmem:[#allocation4 + $0xe0] sm:$0xff] }
 0x1e1   : > { %v647_v0 = vpop.f32.mrf.mxu0  ;;  %v808_v2 = vpop.f32.mrf.mxu1 }
 0x1e2   : > { %3532 = vst [vmem:[#allocation20_spill] sm:$0xff] %v3105_v62  ;;  %1708 = vmatmul.f32.gmra.mxu2 %v1185_v60  ;;  %v809_v5 = vadd.f32 %v808_v2, %v647_v0  ;;  %1869 = vmatmul.f32.gmra.mxu3 %v1186_v61  ;;  %v1192_v60 = vld [vmem:[#allocation4 + $0xe8] sm:$0xff] }
 0x1e4   : > { %1386 = vmatmul.f32.gmra.mxu0 %v1183_v3  ;;  %1547 = vmatmul.f32.gmra.mxu1 %v1184_v4  ;;  %v1197_v4 = vld [vmem:[#allocation4 + $0x110] sm:$0xff] }
 0x1e5   : > { %v969_v6 = vpop.f32.mrf.mxu2  ;;  %v1130_v11 = vpop.f32.mrf.mxu3 }
 0x1e6   : > { %v970_v16 = vadd.f32 %v969_v6, %v809_v5  ;;  %v1198_v5 = vld [vmem:[#allocation4 + $0x118] sm:$0xff] }
 0x1e8   : > { %v3107_v20 = vadd.f32 %v1130_v11, %v970_v16 }
 0x1e9   : > { %v650_v22 = vpop.f32.mrf.mxu0  ;;  %v811_v26 = vpop.f32.mrf.mxu1 }
 0x1ea   : > { %3533 = vst [vmem:[#allocation21_spill] sm:$0xff] %v3107_v20  ;;  %1711 = vmatmul.f32.gmra.mxu2 %v1189_v18  ;;  %v812_v31 = vadd.f32 %v811_v26, %v650_v22  ;;  %1872 = vmatmul.f32.gmra.mxu3 %v1190_v19  ;;  %v1195_v18 = vld [vmem:[#allocation4 + $0x100] sm:$0xff]  ;;  %v1196_v19 = vld [vmem:[#allocation4 + $0x108] sm:$0xff] }
 0x1ec   : > { %1389 = vmatmul.f32.gmra.mxu0 %v1187_v29  ;;  %1550 = vmatmul.f32.gmra.mxu1 %v1188_v30 }
 0x1ed   : > { %v972_v34 = vpop.f32.mrf.mxu2  ;;  %v1133_v39 = vpop.f32.mrf.mxu3 }
 0x1ee   : > { %v973_v41 = vadd.f32 %v972_v34, %v812_v31  ;;  %v1201_v31 = vld [vmem:[#allocation4 + $0x130] sm:$0xff]  ;;  %v1202_v34 = vld [vmem:[#allocation4 + $0x138] sm:$0xff] }
 0x1f0   : > { %v3109_v47 = vadd.f32 %v1133_v39, %v973_v41 }
 0x1f1   : > { %v653_v48 = vpop.f32.mrf.mxu0  ;;  %v814_v51 = vpop.f32.mrf.mxu1 }
 0x1f2   : > { %3534 = vst [vmem:[#allocation22_spill] sm:$0xff] %v3109_v47  ;;  %1714 = vmatmul.f32.gmra.mxu2 %v1193_v44  ;;  %v815_v61 = vadd.f32 %v814_v51, %v653_v48  ;;  %1875 = vmatmul.f32.gmra.mxu3 %v1194_v46  ;;  %v1199_v46 = vld [vmem:[#allocation4 + $0x120] sm:$0xff]  ;;  %v1200_v48 = vld [vmem:[#allocation4 + $0x128] sm:$0xff] }
 0x1f3   : > { %v1280_v47 = vld [vmem:[#allocation4 + $0x3a8] sm:$0xff] }
 0x1f4   : > { %1392 = vmatmul.f32.gmra.mxu0 %v1191_v52  ;;  %1553 = vmatmul.f32.gmra.mxu1 %v1192_v60 }
 0x1f5   : > { %v975_v0 = vpop.f32.mrf.mxu2  ;;  %v1136_v2 = vpop.f32.mrf.mxu3 }
 0x1f6   : > { %v976_v3 = vadd.f32 %v975_v0, %v815_v61  ;;  %v1205_v0 = vld [vmem:[#allocation4 + $0x150] sm:$0xff] }
 0x1f8   : > { %v3111_v6 = vadd.f32 %v1136_v2, %v976_v3  ;;  %v1206_v2 = vld [vmem:[#allocation4 + $0x158] sm:$0xff] }
 0x1f9   : > { %v656_v11 = vpop.f32.mrf.mxu0  ;;  %v817_v16 = vpop.f32.mrf.mxu1 }
 0x1fa   : > { %3535 = vst [vmem:[#allocation23_spill] sm:$0xff] %v3111_v6  ;;  %1717 = vmatmul.f32.gmra.mxu2 %v1197_v4  ;;  %v818_v22 = vadd.f32 %v817_v16, %v656_v11  ;;  %1878 = vmatmul.f32.gmra.mxu3 %v1198_v5  ;;  %v1203_v11 = vld [vmem:[#allocation4 + $0x140] sm:$0xff]  ;;  %v1204_v16 = vld [vmem:[#allocation4 + $0x148] sm:$0xff] }
 0x1fb   : > { %v1279_v6 = vld [vmem:[#allocation4 + $0x3a0] sm:$0xff] }
 0x1fc   : > { %1395 = vmatmul.f32.gmra.mxu0 %v1195_v18  ;;  %1556 = vmatmul.f32.gmra.mxu1 %v1196_v19 }
 0x1fd   : > { %v978_v26 = vpop.f32.mrf.mxu2  ;;  %v1139_v29 = vpop.f32.mrf.mxu3 }
 0x1fe   : > { %v979_v30 = vadd.f32 %v978_v26, %v818_v22 }
 0x200   : > { %v3113_v39 = vadd.f32 %v1139_v29, %v979_v30  ;;  %v1209_v29 = vld [vmem:[#allocation4 + $0x170] sm:$0xff]  ;;  %v1210_v30 = vld [vmem:[#allocation4 + $0x178] sm:$0xff] }
 0x201   : > { %v659_v41 = vpop.f32.mrf.mxu0  ;;  %v820_v44 = vpop.f32.mrf.mxu1 }
 0x202   : > { %3536 = vst [vmem:[#allocation24_spill] sm:$0xff] %v3113_v39  ;;  %1720 = vmatmul.f32.gmra.mxu2 %v1201_v31  ;;  %v821_v51 = vadd.f32 %v820_v44, %v659_v41  ;;  %1881 = vmatmul.f32.gmra.mxu3 %v1202_v34  ;;  %v1207_v44 = vld [vmem:[#allocation4 + $0x160] sm:$0xff] }
 0x204   : > { %1398 = vmatmul.f32.gmra.mxu0 %v1199_v46  ;;  %1559 = vmatmul.f32.gmra.mxu1 %v1200_v48  ;;  %v1208_v46 = vld [vmem:[#allocation4 + $0x168] sm:$0xff] }
 0x205   : > { %v981_v52 = vpop.f32.mrf.mxu2  ;;  %v1142_v60 = vpop.f32.mrf.mxu3 }
 0x206   : > { %v982_v61 = vadd.f32 %v981_v52, %v821_v51 }
 0x208   : > { %v3115_v3 = vadd.f32 %v1142_v60, %v982_v61  ;;  %v1213_v61 = vld [vmem:[#allocation4 + $0x190] sm:$0xff] }
 0x209   : > { %v662_v4 = vpop.f32.mrf.mxu0  ;;  %v823_v5 = vpop.f32.mrf.mxu1 }
 0x20a   : > { %3537 = vst [vmem:[#allocation25_spill] sm:$0xff] %v3115_v3  ;;  %1723 = vmatmul.f32.gmra.mxu2 %v1205_v0  ;;  %v824_v18 = vadd.f32 %v823_v5, %v662_v4  ;;  %1884 = vmatmul.f32.gmra.mxu3 %v1206_v2  ;;  %v1214_v0 = vld [vmem:[#allocation4 + $0x198] sm:$0xff] }
 0x20c   : > { %1401 = vmatmul.f32.gmra.mxu0 %v1203_v11  ;;  %1562 = vmatmul.f32.gmra.mxu1 %v1204_v16  ;;  %v1211_v11 = vld [vmem:[#allocation4 + $0x180] sm:$0xff]  ;;  %v1212_v16 = vld [vmem:[#allocation4 + $0x188] sm:$0xff] }
 0x20d   : > { %v984_v19 = vpop.f32.mrf.mxu2  ;;  %v1145_v22 = vpop.f32.mrf.mxu3 }
 0x20e   : > { %v985_v26 = vadd.f32 %v984_v19, %v824_v18 }
 0x210   : > { %v3117_v31 = vadd.f32 %v1145_v22, %v985_v26 }
 0x211   : > { %v665_v34 = vpop.f32.mrf.mxu0  ;;  %v826_v41 = vpop.f32.mrf.mxu1 }
 0x212   : > { %3538 = vst [vmem:[#allocation26_spill] sm:$0xff] %v3117_v31  ;;  %1726 = vmatmul.f32.gmra.mxu2 %v1209_v29  ;;  %v827_v48 = vadd.f32 %v826_v41, %v665_v34  ;;  %1887 = vmatmul.f32.gmra.mxu3 %v1210_v30  ;;  %v1217_v29 = vld [vmem:[#allocation4 + $0x1b0] sm:$0xff]  ;;  %v1218_v30 = vld [vmem:[#allocation4 + $0x1b8] sm:$0xff]  ;;  %v1231_v31 = vld [vmem:[#allocation4 + $0x220] sm:$0xff] }
 0x214   : > { %1404 = vmatmul.f32.gmra.mxu0 %v1207_v44  ;;  %1565 = vmatmul.f32.gmra.mxu1 %v1208_v46  ;;  %v1215_v46 = vld [vmem:[#allocation4 + $0x1a0] sm:$0xff] }
 0x215   : > { %v987_v51 = vpop.f32.mrf.mxu2  ;;  %v1148_v52 = vpop.f32.mrf.mxu3 }
 0x216   : > { %v988_v60 = vadd.f32 %v987_v51, %v827_v48  ;;  %v1216_v48 = vld [vmem:[#allocation4 + $0x1a8] sm:$0xff] }
 0x218   : > { %v3119_v2 = vadd.f32 %v1148_v52, %v988_v60 }
 0x219   : > { %v668_v4 = vpop.f32.mrf.mxu0  ;;  %v829_v5 = vpop.f32.mrf.mxu1 }
 0x21a   : > { %3539 = vst [vmem:[#allocation27_spill] sm:$0xff] %v3119_v2  ;;  %1729 = vmatmul.f32.gmra.mxu2 %v1213_v61  ;;  %v830_v18 = vadd.f32 %v829_v5, %v668_v4  ;;  %1890 = vmatmul.f32.gmra.mxu3 %v1214_v0  ;;  %v1221_v0 = vld [vmem:[#allocation4 + $0x1d0] sm:$0xff]  ;;  %v1222_v4 = vld [vmem:[#allocation4 + $0x1d8] sm:$0xff] }
 0x21c   : > { %1407 = vmatmul.f32.gmra.mxu0 %v1211_v11  ;;  %1568 = vmatmul.f32.gmra.mxu1 %v1212_v16 }
 0x21d   : > { %v990_v19 = vpop.f32.mrf.mxu2  ;;  %v1151_v22 = vpop.f32.mrf.mxu3 }
 0x21e   : > { %v991_v26 = vadd.f32 %v990_v19, %v830_v18  ;;  %v1219_v18 = vld [vmem:[#allocation4 + $0x1c0] sm:$0xff]  ;;  %v1220_v19 = vld [vmem:[#allocation4 + $0x1c8] sm:$0xff] }
 0x220   : > { %v3121_v34 = vadd.f32 %v1151_v22, %v991_v26 }
 0x221   : > { %v671_v41 = vpop.f32.mrf.mxu0  ;;  %v832_v44 = vpop.f32.mrf.mxu1 }
 0x222   : > { %3540 = vst [vmem:[#allocation28_spill] sm:$0xff] %v3121_v34  ;;  %1732 = vmatmul.f32.gmra.mxu2 %v1217_v29  ;;  %v833_v51 = vadd.f32 %v832_v44, %v671_v41  ;;  %1893 = vmatmul.f32.gmra.mxu3 %v1218_v30  ;;  %v1225_v41 = vld [vmem:[#allocation4 + $0x1f0] sm:$0xff]  ;;  %v1226_v44 = vld [vmem:[#allocation4 + $0x1f8] sm:$0xff]  ;;  %v1235_v34 = vld [vmem:[#allocation4 + $0x240] sm:$0xff] }
 0x224   : > { %1410 = vmatmul.f32.gmra.mxu0 %v1215_v46  ;;  %1571 = vmatmul.f32.gmra.mxu1 %v1216_v48 }
 0x225   : > { %v993_v52 = vpop.f32.mrf.mxu2  ;;  %v1154_v60 = vpop.f32.mrf.mxu3 }
 0x226   : > { %v994_v61 = vadd.f32 %v993_v52, %v833_v51  ;;  %v1223_v52 = vld [vmem:[#allocation4 + $0x1e0] sm:$0xff] }
 0x228   : > { %v3123_v5 = vadd.f32 %v1154_v60, %v994_v61  ;;  %v1224_v60 = vld [vmem:[#allocation4 + $0x1e8] sm:$0xff] }
 0x229   : > { %v674_v11 = vpop.f32.mrf.mxu0  ;;  %v835_v16 = vpop.f32.mrf.mxu1 }
 0x22a   : > { %3541 = vst [vmem:[#allocation29_spill] sm:$0xff] %v3123_v5  ;;  %1735 = vmatmul.f32.gmra.mxu2 %v1221_v0  ;;  %v836_v22 = vadd.f32 %v835_v16, %v674_v11  ;;  %1896 = vmatmul.f32.gmra.mxu3 %v1222_v4  ;;  %v1229_v16 = vld [vmem:[#allocation4 + $0x210] sm:$0xff]  ;;  %v1236_v5 = vld [vmem:[#allocation4 + $0x248] sm:$0xff] }
 0x22c   : > { %1413 = vmatmul.f32.gmra.mxu0 %v1219_v18  ;;  %1574 = vmatmul.f32.gmra.mxu1 %v1220_v19  ;;  %v1230_v18 = vld [vmem:[#allocation4 + $0x218] sm:$0xff] }
 0x22d   : > { %v996_v26 = vpop.f32.mrf.mxu2  ;;  %v1157_v29 = vpop.f32.mrf.mxu3 }
 0x22e   : > { %v997_v30 = vadd.f32 %v996_v26, %v836_v22 }
 0x230   : > { %v3125_v46 = vadd.f32 %v1157_v29, %v997_v30  ;;  %v1227_v29 = vld [vmem:[#allocation4 + $0x200] sm:$0xff]  ;;  %v1228_v30 = vld [vmem:[#allocation4 + $0x208] sm:$0xff] }
 0x231   : > { %v677_v48 = vpop.f32.mrf.mxu0  ;;  %v838_v51 = vpop.f32.mrf.mxu1 }
 0x232   : > { %3542 = vst [vmem:[#allocation30_spill] sm:$0xff] %v3125_v46  ;;  %1738 = vmatmul.f32.gmra.mxu2 %v1225_v41  ;;  %v839_v61 = vadd.f32 %v838_v51, %v677_v48  ;;  %1899 = vmatmul.f32.gmra.mxu3 %v1226_v44  ;;  %v1233_v51 = vld [vmem:[#allocation4 + $0x230] sm:$0xff]  ;;  %v1276_v46 = vld [vmem:[#allocation4 + $0x388] sm:$0xff] }
 0x234   : > { %1416 = vmatmul.f32.gmra.mxu0 %v1223_v52  ;;  %1577 = vmatmul.f32.gmra.mxu1 %v1224_v60  ;;  %v1234_v52 = vld [vmem:[#allocation4 + $0x238] sm:$0xff] }
 0x235   : > { %v999_v0 = vpop.f32.mrf.mxu2  ;;  %v1160_v4 = vpop.f32.mrf.mxu3 }
 0x236   : > { %v1000_v11 = vadd.f32 %v999_v0, %v839_v61 }
 0x238   : > { %v3127_v19 = vadd.f32 %v1160_v4, %v1000_v11  ;;  %v1232_v4 = vld [vmem:[#allocation4 + $0x228] sm:$0xff]  ;;  %v1999_v11 = vmul.f32 %v3033_v10, %v3033_v10  ;;  %v2000_v10 = vmul.f32 %v3035_v21, %v3035_v21  ;;  %v2001_v21 = vmul.f32 %v3037_v32, %v3037_v32 }
 0x239   : > { %v1372_v22 = vpop.f32.mrf.mxu0  ;;  %v1533_v26 = vpop.f32.mrf.mxu1  ;;  %v2002_v32 = vmul.f32 %v3039_v43, %v3039_v43  ;;  %v2003_v43 = vmul.f32 %v3041_v56, %v3041_v56  ;;  %v2004_v56 = vmul.f32 %v3043_v1, %v3043_v1  ;;  %v2005_v1 = vmul.f32 %v3045_v13, %v3045_v13 }
 0x23a   : > { %3543 = vst [vmem:[#allocation31_spill] sm:$0xff] %v3127_v19  ;;  %1741 = vmatmul.f32.gmra.mxu2 %v1229_v16  ;;  %v1534_v3 = vadd.f32 %v1533_v26, %v1372_v22  ;;  %1902 = vmatmul.f32.gmra.mxu3 %v1230_v18  ;;  %v2006_v13 = vmul.f32 %v3047_v25, %v3047_v25  ;;  %v1264_v25 = vld [vmem:[#allocation4 + $0x328] sm:$0xff] }
 0x23c   : > { %1419 = vmatmul.f32.gmra.mxu0 %v1227_v29  ;;  %1580 = vmatmul.f32.gmra.mxu1 %v1228_v30  ;;  %v1237_v29 = vld [vmem:[#allocation4 + $0x250] sm:$0xff]  ;;  %v1238_v30 = vld [vmem:[#allocation4 + $0x258] sm:$0xff] }
 0x23d   : > { %v1694_v41 = vpop.f32.mrf.mxu2  ;;  %v1855_v44 = vpop.f32.mrf.mxu3 }
 0x23e   : > { %v1695_v48 = vadd.f32 %v1694_v41, %v1534_v3 }
 0x240   : > { %v1856_v60 = vadd.f32 %v1855_v44, %v1695_v48 }
 0x241   : > { %v1375_v61 = vpop.f32.mrf.mxu0  ;;  %v1536_v0 = vpop.f32.mrf.mxu1 }
 0x242   : > { %v2047_v2 = vmul.f32 %v1856_v60, %v1856_v60  ;;  %1744 = vmatmul.f32.gmra.mxu2 %v1233_v51  ;;  %v1537_v16 = vadd.f32 %v1536_v0, %v1375_v61  ;;  %1905 = vmatmul.f32.gmra.mxu3 %v1234_v52  ;;  %v1241_v0 = vld [vmem:[#allocation4 + $0x270] sm:$0xff] }
 0x244   : > { %1422 = vmatmul.f32.gmra.mxu0 %v1231_v31  ;;  %1583 = vmatmul.f32.gmra.mxu1 %v1232_v4  ;;  %v3131_v18 = vadd.f32 %v2047_v2, %v1999_v11  ;;  %v1242_v4 = vld [vmem:[#allocation4 + $0x278] sm:$0xff] }
 0x245   : > { %v1697_v22 = vpop.f32.mrf.mxu2  ;;  %v1858_v3 = vpop.f32.mrf.mxu3 }
 0x246   : > { %v1698_v26 = vadd.f32 %v1697_v22, %v1537_v16 }
 0x248   : > { %v1859_v41 = vadd.f32 %v1858_v3, %v1698_v26  ;;  %v1239_v3 = vld [vmem:[#allocation4 + $0x260] sm:$0xff]  ;;  %v1240_v26 = vld [vmem:[#allocation4 + $0x268] sm:$0xff] }
 0x249   : > { %v1378_v44 = vpop.f32.mrf.mxu0  ;;  %v1539_v48 = vpop.f32.mrf.mxu1 }
 0x24a   : > { %v2048_v51 = vmul.f32 %v1859_v41, %v1859_v41  ;;  %1747 = vmatmul.f32.gmra.mxu2 %v1237_v29  ;;  %v1540_v52 = vadd.f32 %v1539_v48, %v1378_v44  ;;  %1908 = vmatmul.f32.gmra.mxu3 %v1238_v30  ;;  %v1245_v48 = vld [vmem:[#allocation4 + $0x290] sm:$0xff] }
 0x24c   : > { %1425 = vmatmul.f32.gmra.mxu0 %v1235_v34  ;;  %1586 = vmatmul.f32.gmra.mxu1 %v1236_v5  ;;  %v3135_v31 = vadd.f32 %v2048_v51, %v2000_v10  ;;  %v1246_v10 = vld [vmem:[#allocation4 + $0x298] sm:$0xff] }
 0x24d   : > { %v1700_v2 = vpop.f32.mrf.mxu2  ;;  %v1861_v60 = vpop.f32.mrf.mxu3 }
 0x24e   : > { %v1701_v61 = vadd.f32 %v1700_v2, %v1540_v52 }
 0x250   : > { %v1862_v11 = vadd.f32 %v1861_v60, %v1701_v61  ;;  %v1243_v60 = vld [vmem:[#allocation4 + $0x280] sm:$0xff]  ;;  %v1244_v61 = vld [vmem:[#allocation4 + $0x288] sm:$0xff] }
 0x251   : > { %v1381_v16 = vpop.f32.mrf.mxu0  ;;  %v1542_v22 = vpop.f32.mrf.mxu1 }
 0x252   : > { %v2049_v29 = vmul.f32 %v1862_v11, %v1862_v11  ;;  %1750 = vmatmul.f32.gmra.mxu2 %v1241_v0  ;;  %v1543_v30 = vadd.f32 %v1542_v22, %v1381_v16  ;;  %1911 = vmatmul.f32.gmra.mxu3 %v1242_v4 }
 0x254   : > { %1428 = vmatmul.f32.gmra.mxu0 %v1239_v3  ;;  %1589 = vmatmul.f32.gmra.mxu1 %v1240_v26  ;;  %v3139_v34 = vadd.f32 %v2049_v29, %v2001_v21  ;;  %v1249_v26 = vld [vmem:[#allocation4 + $0x2b0] sm:$0xff]  ;;  %v1250_v21 = vld [vmem:[#allocation4 + $0x2b8] sm:$0xff] }
 0x255   : > { %v1703_v5 = vpop.f32.mrf.mxu2  ;;  %v1864_v41 = vpop.f32.mrf.mxu3 }
 0x256   : > { %v1704_v44 = vadd.f32 %v1703_v5, %v1543_v30 }
 0x258   : > { %v1865_v51 = vadd.f32 %v1864_v41, %v1704_v44  ;;  %v1247_v41 = vld [vmem:[#allocation4 + $0x2a0] sm:$0xff]  ;;  %v1248_v44 = vld [vmem:[#allocation4 + $0x2a8] sm:$0xff] }
 0x259   : > { %v1384_v52 = vpop.f32.mrf.mxu0  ;;  %v1545_v2 = vpop.f32.mrf.mxu1 }
 0x25a   : > { %v2050_v0 = vmul.f32 %v1865_v51, %v1865_v51  ;;  %1753 = vmatmul.f32.gmra.mxu2 %v1245_v48  ;;  %v1546_v4 = vadd.f32 %v1545_v2, %v1384_v52  ;;  %1914 = vmatmul.f32.gmra.mxu3 %v1246_v10 }
 0x25c   : > { %1431 = vmatmul.f32.gmra.mxu0 %v1243_v60  ;;  %1592 = vmatmul.f32.gmra.mxu1 %v1244_v61  ;;  %v3143_v11 = vadd.f32 %v2050_v0, %v2002_v32  ;;  %v1253_v61 = vld [vmem:[#allocation4 + $0x2d0] sm:$0xff]  ;;  %v1254_v32 = vld [vmem:[#allocation4 + $0x2d8] sm:$0xff] }
 0x25d   : > { %v1706_v16 = vpop.f32.mrf.mxu2  ;;  %v1867_v22 = vpop.f32.mrf.mxu3 }
 0x25e   : > { %v1707_v3 = vadd.f32 %v1706_v16, %v1546_v4 }
 0x260   : > { %v1868_v29 = vadd.f32 %v1867_v22, %v1707_v3  ;;  %v1251_v22 = vld [vmem:[#allocation4 + $0x2c0] sm:$0xff]  ;;  %v1252_v3 = vld [vmem:[#allocation4 + $0x2c8] sm:$0xff] }
 0x261   : > { %v1387_v30 = vpop.f32.mrf.mxu0  ;;  %v1548_v5 = vpop.f32.mrf.mxu1 }
 0x262   : > { %v2051_v48 = vmul.f32 %v1868_v29, %v1868_v29  ;;  %1756 = vmatmul.f32.gmra.mxu2 %v1249_v26  ;;  %v1549_v10 = vadd.f32 %v1548_v5, %v1387_v30  ;;  %1917 = vmatmul.f32.gmra.mxu3 %v1250_v21 }
 0x264   : > { %1434 = vmatmul.f32.gmra.mxu0 %v1247_v41  ;;  %1595 = vmatmul.f32.gmra.mxu1 %v1248_v44  ;;  %v3147_v51 = vadd.f32 %v2051_v48, %v2003_v43  ;;  %v1257_v44 = vld [vmem:[#allocation4 + $0x2f0] sm:$0xff]  ;;  %v1258_v43 = vld [vmem:[#allocation4 + $0x2f8] sm:$0xff] }
 0x265   : > { %v1709_v52 = vpop.f32.mrf.mxu2  ;;  %v1870_v2 = vpop.f32.mrf.mxu3 }
 0x266   : > { %v1710_v60 = vadd.f32 %v1709_v52, %v1549_v10 }
 0x268   : > { %v1871_v0 = vadd.f32 %v1870_v2, %v1710_v60  ;;  %v1255_v2 = vld [vmem:[#allocation4 + $0x2e0] sm:$0xff]  ;;  %v1256_v60 = vld [vmem:[#allocation4 + $0x2e8] sm:$0xff] }
 0x269   : > { %v1390_v4 = vpop.f32.mrf.mxu0  ;;  %v1551_v16 = vpop.f32.mrf.mxu1 }
 0x26a   : > { %v2052_v26 = vmul.f32 %v1871_v0, %v1871_v0  ;;  %1759 = vmatmul.f32.gmra.mxu2 %v1253_v61  ;;  %v1552_v21 = vadd.f32 %v1551_v16, %v1390_v4  ;;  %1920 = vmatmul.f32.gmra.mxu3 %v1254_v32 }
 0x26c   : > { %1437 = vmatmul.f32.gmra.mxu0 %v1251_v22  ;;  %1598 = vmatmul.f32.gmra.mxu1 %v1252_v3  ;;  %v3151_v29 = vadd.f32 %v2052_v26, %v2004_v56  ;;  %v1261_v3 = vld [vmem:[#allocation4 + $0x310] sm:$0xff]  ;;  %v1262_v56 = vld [vmem:[#allocation4 + $0x318] sm:$0xff] }
 0x26d   : > { %v1712_v30 = vpop.f32.mrf.mxu2  ;;  %v1873_v5 = vpop.f32.mrf.mxu3 }
 0x26e   : > { %v1713_v41 = vadd.f32 %v1712_v30, %v1552_v21 }
 0x270   : > { %v1874_v48 = vadd.f32 %v1873_v5, %v1713_v41  ;;  %v1259_v5 = vld [vmem:[#allocation4 + $0x300] sm:$0xff]  ;;  %v1260_v41 = vld [vmem:[#allocation4 + $0x308] sm:$0xff] }
 0x271   : > { %v1393_v10 = vpop.f32.mrf.mxu0  ;;  %v1554_v52 = vpop.f32.mrf.mxu1 }
 0x272   : > { %v2053_v61 = vmul.f32 %v1874_v48, %v1874_v48  ;;  %1762 = vmatmul.f32.gmra.mxu2 %v1257_v44  ;;  %v1555_v32 = vadd.f32 %v1554_v52, %v1393_v10  ;;  %1923 = vmatmul.f32.gmra.mxu3 %v1258_v43 }
 0x274   : > { %1440 = vmatmul.f32.gmra.mxu0 %v1255_v2  ;;  %1601 = vmatmul.f32.gmra.mxu1 %v1256_v60  ;;  %v3155_v0 = vadd.f32 %v2053_v61, %v2005_v1  ;;  %v1265_v60 = vld [vmem:[#allocation4 + $0x330] sm:$0xff]  ;;  %v1266_v1 = vld [vmem:[#allocation4 + $0x338] sm:$0xff] }
 0x275   : > { %v1715_v4 = vpop.f32.mrf.mxu2  ;;  %v1876_v16 = vpop.f32.mrf.mxu3 }
 0x276   : > { %v1716_v22 = vadd.f32 %v1715_v4, %v1555_v32 }
 0x278   : > { %v1877_v26 = vadd.f32 %v1876_v16, %v1716_v22  ;;  %v1263_v16 = vld [vmem:[#allocation4 + $0x320] sm:$0xff]  ;;  %v2007_v22 = vmul.f32 %v3049_v37, %v3049_v37 }
 0x279   : > { %v1396_v21 = vpop.f32.mrf.mxu0  ;;  %v1557_v30 = vpop.f32.mrf.mxu1 }
 0x27a   : > { %v2054_v44 = vmul.f32 %v1877_v26, %v1877_v26  ;;  %1765 = vmatmul.f32.gmra.mxu2 %v1261_v3  ;;  %v1558_v43 = vadd.f32 %v1557_v30, %v1396_v21  ;;  %1926 = vmatmul.f32.gmra.mxu3 %v1262_v56  ;;  %v1269_v30 = vld [vmem:[#allocation4 + $0x350] sm:$0xff] }
 0x27c   : > { %1443 = vmatmul.f32.gmra.mxu0 %v1259_v5  ;;  %1604 = vmatmul.f32.gmra.mxu1 %v1260_v41  ;;  %v3159_v48 = vadd.f32 %v2054_v44, %v2006_v13  ;;  %v1270_v5 = vld [vmem:[#allocation4 + $0x358] sm:$0xff]  ;;  %v1267_v44 = vld [vmem:[#allocation4 + $0x340] sm:$0xff] }
 0x27d   : > { %v1718_v10 = vpop.f32.mrf.mxu2  ;;  %v1879_v52 = vpop.f32.mrf.mxu3 }
 0x27e   : > { %v1719_v2 = vadd.f32 %v1718_v10, %v1558_v43  ;;  %v1268_v43 = vld [vmem:[#allocation4 + $0x348] sm:$0xff] }
 0x280   : > { %v1880_v61 = vadd.f32 %v1879_v52, %v1719_v2  ;;  %v1273_v52 = vld [vmem:[#allocation4 + $0x370] sm:$0xff]  ;;  %v1274_v2 = vld [vmem:[#allocation4 + $0x378] sm:$0xff] }
 0x281   : > { %v3161_v32 = vpop.f32.mrf.mxu0  ;;  %v3163_v4 = vpop.f32.mrf.mxu1 }
 0x282   : > { %v2055_v3 = vmul.f32 %v1880_v61, %v1880_v61  ;;  %1768 = vmatmul.f32.gmra.mxu2 %v1265_v60  ;;  %1929 = vmatmul.f32.gmra.mxu3 %v1266_v1  ;;  %v1271_v61 = vld [vmem:[#allocation4 + $0x360] sm:$0xff] }
 0x284   : > { %1446 = vmatmul.f32.gmra.mxu0 %v1263_v16  ;;  %1607 = vmatmul.f32.gmra.mxu1 %v1264_v25  ;;  %v3167_v56 = vadd.f32 %v2055_v3, %v2007_v22  ;;  %v1272_v16 = vld [vmem:[#allocation4 + $0x368] sm:$0xff]  ;;  %v1277_v3 = vld [vmem:[#allocation4 + $0x390] sm:$0xff] }
 0x285   : > { %v3169_v26 = vpop.f32.mrf.mxu2  ;;  %v3171_v21 = vpop.f32.mrf.mxu3 }
 0x289   : > { %v3173_v41 = vpop.f32.mrf.mxu0  ;;  %v3175_v13 = vpop.f32.mrf.mxu1 }
 0x28a   : > { %1771 = vmatmul.f32.gmra.mxu2 %v1269_v30  ;;  %1932 = vmatmul.f32.gmra.mxu3 %v1270_v5  ;;  %v1278_v30 = vld [vmem:[#allocation4 + $0x398] sm:$0xff] }
 0x28c   : > { %1449 = vmatmul.f32.gmra.mxu0 %v1267_v44  ;;  %1610 = vmatmul.f32.gmra.mxu1 %v1268_v43  ;;  %v1275_v43 = vld [vmem:[#allocation4 + $0x380] sm:$0xff] }
 0x28d   : > { %v3177_v37 = vpop.f32.mrf.mxu2  ;;  %v3179_v10 = vpop.f32.mrf.mxu3 }
 0x291   : > { %v1405_v60 = vpop.f32.mrf.mxu0  ;;  %v1566_v1 = vpop.f32.mrf.mxu1 }
 0x292   : > { %1774 = vmatmul.f32.gmra.mxu2 %v1273_v52  ;;  %1935 = vmatmul.f32.gmra.mxu3 %v1274_v2  ;;  %v1281_v52 = vld [vmem:[#allocation4 + $0x3b0] sm:$0xff]  ;;  %v1282_v2 = vld [vmem:[#allocation4 + $0x3b8] sm:$0xff]  ;;  %v1567_v12 = vadd.f32 %v1566_v1, %v1405_v60 }
 0x294   : > { %1452 = vmatmul.f32.gmra.mxu0 %v1271_v61  ;;  %1613 = vmatmul.f32.gmra.mxu1 %v1272_v16 }
 0x295   : > { %v3181_v25 = vpop.f32.mrf.mxu2  ;;  %v3183_v22 = vpop.f32.mrf.mxu3 }
 0x299   : > { %v1408_v5 = vpop.f32.mrf.mxu0  ;;  %v1569_v44 = vpop.f32.mrf.mxu1 }
 0x29a   : > { %1777 = vmatmul.f32.gmra.mxu2 %v1277_v3  ;;  %1938 = vmatmul.f32.gmra.mxu3 %v1278_v30 }
 0x29c   : > { %1455 = vmatmul.f32.gmra.mxu0 %v1275_v43  ;;  %1616 = vmatmul.f32.gmra.mxu1 %v1276_v46  ;;  %v1283_v43 = vld [vmem:[#allocation4 + $0x3c0] sm:$0xff]  ;;  %v1284_v46 = vld [vmem:[#allocation4 + $0x3c8] sm:$0xff] }
 0x29d   : > { %v1730_v19 = vpop.f32.mrf.mxu2  ;;  %v1891_v39 = vpop.f32.mrf.mxu3 }
 0x2a1   : > { %v1411_v61 = vpop.f32.mrf.mxu0  ;;  %v1572_v16 = vpop.f32.mrf.mxu1 }
 0x2a2   : > { %1780 = vmatmul.f32.gmra.mxu2 %v1281_v52  ;;  %1941 = vmatmul.f32.gmra.mxu3 %v1282_v2  ;;  %v1290_v52 = vld [vmem:[#allocation4 + $0x3f8] sm:$0xff]  ;;  %v1573_v2 = vadd.f32 %v1572_v16, %v1411_v61  ;;  %v1293_v16 = vld [vmem:[#allocation4 + $0x410] sm:$0xff] }
 0x2a4   : > { %1458 = vmatmul.f32.gmra.mxu0 %v1279_v6  ;;  %1619 = vmatmul.f32.gmra.mxu1 %v1280_v47  ;;  %v1570_v6 = vadd.f32 %v1569_v44, %v1408_v5  ;;  %v1561_v44 = vadd.f32 %v3163_v4, %v3161_v32 }
 0x2a5   : > { %v1733_v20 = vpop.f32.mrf.mxu2  ;;  %v1894_v62 = vpop.f32.mrf.mxu3 }
 0x2a9   : > { %v1414_v3 = vpop.f32.mrf.mxu0  ;;  %v1575_v30 = vpop.f32.mrf.mxu1 }
 0x2aa   : > { %1783 = vmatmul.f32.gmra.mxu2 %v1285_v38  ;;  %1944 = vmatmul.f32.gmra.mxu3 %v1286_v15  ;;  %v1576_v27 = vadd.f32 %v1575_v30, %v1414_v3  ;;  %v1734_v38 = vadd.f32 %v1733_v20, %v1573_v2  ;;  %v1564_v15 = vadd.f32 %v3175_v13, %v3173_v41  ;;  %v1291_v13 = vld [vmem:[#allocation4 + $0x400] sm:$0xff]  ;;  %v1297_v2 = vld [vmem:[#allocation4 + $0x430] sm:$0xff] }
 0x2ab   : > { %v1731_v3 = vadd.f32 %v1730_v19, %v1570_v6 }
 0x2ac   : > { %1461 = vmatmul.f32.gmra.mxu0 %v1283_v43  ;;  %1622 = vmatmul.f32.gmra.mxu1 %v1284_v46 }
 0x2ad   : > { %v1736_v53 = vpop.f32.mrf.mxu2  ;;  %v1897_v8 = vpop.f32.mrf.mxu3  ;;  %v1892_v20 = vadd.f32 %v1891_v39, %v1731_v3  ;;  %v2012_v39 = vmul.f32 %v3059_v36, %v3059_v36 }
 0x2ae   : > { %v1737_v35 = vadd.f32 %v1736_v53, %v1576_v27  ;;  %v1294_v27 = vld [vmem:[#allocation4 + $0x418] sm:$0xff] }
 0x2af   : > { %v2059_v46 = vmul.f32 %v1892_v20, %v1892_v20 }
 0x2b0   : > { %v1898_v61 = vadd.f32 %v1897_v8, %v1737_v35  ;;  %v1292_v8 = vld [vmem:[#allocation4 + $0x408] sm:$0xff] }
 0x2b1   : > { %v1417_v47 = vpop.f32.mrf.mxu0  ;;  %v1578_v33 = vpop.f32.mrf.mxu1 }
 0x2b2   : > { %1786 = vmatmul.f32.gmra.mxu2 %v1289_v45  ;;  %v1579_v57 = vadd.f32 %v1578_v33, %v1417_v47  ;;  %1947 = vmatmul.f32.gmra.mxu3 %v1290_v52  ;;  %v1728_v45 = vadd.f32 %v3181_v25, %v1567_v12  ;;  %v1895_v33 = vadd.f32 %v1894_v62, %v1734_v38 }
 0x2b3   : > { %v2061_v35 = vmul.f32 %v1898_v61, %v1898_v61  ;;  %v2013_v12 = vmul.f32 %v3061_v50, %v3061_v50  ;;  %v1722_v62 = vadd.f32 %v3169_v26, %v1561_v44  ;;  %v2011_v26 = vmul.f32 %v3057_v23, %v3057_v23 }
 0x2b4   : > { %1464 = vmatmul.f32.gmra.mxu0 %v1287_v55  ;;  %1625 = vmatmul.f32.gmra.mxu1 %v1288_v17  ;;  %v2014_v55 = vmul.f32 %v3063_v54, %v3063_v54  ;;  %v1725_v17 = vadd.f32 %v3177_v37, %v1564_v15  ;;  %v1889_v4 = vadd.f32 %v3183_v22, %v1728_v45 }
 0x2b5   : > { %v1739_v30 = vpop.f32.mrf.mxu2  ;;  %v1900_v43 = vpop.f32.mrf.mxu3  ;;  %v2060_v54 = vmul.f32 %v1895_v33, %v1895_v33  ;;  %v2109_v50 = vadd.f32 %v2061_v35, %v2013_v12  ;;  %v1883_v22 = vadd.f32 %v3171_v21, %v1722_v62  ;;  %v2015_v38 = vmul.f32 %v3065_v14, %v3065_v14  ;;  %v1300_v12 = vld [vmem:[#allocation4 + $0x448] sm:$0xff] }
 0x2b6   : > { %v1740_v5 = vadd.f32 %v1739_v30, %v1579_v57  ;;  %v1886_v37 = vadd.f32 %v3179_v10, %v1725_v17  ;;  %v2058_v6 = vmul.f32 %v1889_v4, %v1889_v4  ;;  %v2010_v10 = vmul.f32 %v3055_v9, %v3055_v9 }
 0x2b7   : > { %v2108_v36 = vadd.f32 %v2060_v54, %v2012_v39  ;;  %v2107_v21 = vadd.f32 %v2059_v46, %v2011_v26  ;;  %v2009_v44 = vmul.f32 %v3053_v63, %v3053_v63  ;;  %v1301_v63 = vld [vmem:[#allocation4 + $0x450] sm:$0xff]  ;;  %v2016_v35 = vmul.f32 %v3067_v28, %v3067_v28 }
 0x2b8   : > { %v1901_v53 = vadd.f32 %v1900_v43, %v1740_v5  ;;  %v2057_v15 = vmul.f32 %v1886_v37, %v1886_v37  ;;  %v1298_v43 = vld [vmem:[#allocation4 + $0x438] sm:$0xff]  ;;  %v1295_v5 = vld [vmem:[#allocation4 + $0x420] sm:$0xff]  ;;  %v2106_v9 = vadd.f32 %v2058_v6, %v2010_v10  ;;  %v1305_v28 = vld [vmem:[#allocation4 + $0x470] sm:$0xff] }
 0x2b9   : > { %v1420_v19 = vpop.f32.mrf.mxu0  ;;  %v1581_v41 = vpop.f32.mrf.mxu1 }
 0x2ba   : > { %v2062_v57 = vmul.f32 %v1901_v53, %v1901_v53  ;;  %1789 = vmatmul.f32.gmra.mxu2 %v1293_v16  ;;  %v1582_v32 = vadd.f32 %v1581_v41, %v1420_v19  ;;  %1950 = vmatmul.f32.gmra.mxu3 %v1294_v27  ;;  %v1296_v16 = vld [vmem:[#allocation4 + $0x428] sm:$0xff]  ;;  %v2056_v27 = vmul.f32 %v1883_v22, %v1883_v22 }
 0x2bb   : > { %v2008_v53 = vmul.f32 %v3051_v49, %v3051_v49  ;;  %v2105_v17 = vadd.f32 %v2057_v15, %v2009_v44  ;;  %v1307_v15 = vld [vmem:[#allocation4 + $0x480] sm:$0xff] }
 0x2bc   : > { %v2110_v60 = vadd.f32 %v2062_v57, %v2014_v55  ;;  %1467 = vmatmul.f32.gmra.mxu0 %v1291_v13  ;;  %1628 = vmatmul.f32.gmra.mxu1 %v1292_v8  ;;  %v1302_v8 = vld [vmem:[#allocation4 + $0x458] sm:$0xff] }
 0x2bd   : > { %v1742_v1 = vpop.f32.mrf.mxu2  ;;  %v1903_v25 = vpop.f32.mrf.mxu3  ;;  %v2104_v19 = vadd.f32 %v2056_v27, %v2008_v53  ;;  %v1311_v27 = vld [vmem:[#allocation4 + $0x4a0] sm:$0xff] }
 0x2be   : > { %v1743_v52 = vadd.f32 %v1742_v1, %v1582_v32  ;;  %2167 = vmatpush.msra.mxu0 %v2110_v60  ;;  %2438 = vmatpush.msra.mxu3 %v2110_v60  ;;  %v1299_v32 = vld [vmem:[#allocation4 + $0x440] sm:$0xff] }
 0x2c0   : > { %v1904_v47 = vadd.f32 %v1903_v25, %v1743_v52  ;;  %2168 = vmatpush.msra.mxu0 %v2109_v50  ;;  %2439 = vmatpush.msra.mxu3 %v2109_v50  ;;  %v1306_v25 = vld [vmem:[#allocation4 + $0x478] sm:$0xff]  ;;  %v1303_v50 = vld [vmem:[#allocation4 + $0x460] sm:$0xff] }
 0x2c1   : > { %v1423_v3 = vpop.f32.mrf.mxu0  ;;  %v1584_v30 = vpop.f32.mrf.mxu1 }
 0x2c2   : > { %v2063_v61 = vmul.f32 %v1904_v47, %v1904_v47  ;;  %1792 = vmatmul.f32.gmra.mxu2 %v1297_v2  ;;  %2169 = vmatpush.msra.mxu0 %v2108_v36  ;;  %v1585_v23 = vadd.f32 %v1584_v30, %v1423_v3  ;;  %v1309_v2 = vld [vmem:[#allocation4 + $0x490] sm:$0xff] }
 0x2c3   : > { %2440 = vmatpush.msra.mxu3 %v2108_v36  ;;  %v1310_v36 = vld [vmem:[#allocation4 + $0x498] sm:$0xff] }
 0x2c4   : > { %1953 = vmatmul.f32.gmra.mxu3 %v1298_v43  ;;  %2170 = vmatpush.msra.mxu0 %v2107_v21  ;;  %v3209_v14 = vadd.f32 %v2063_v61, %v2015_v38  ;;  %v1313_v43 = vld [vmem:[#allocation4 + $0x4b0] sm:$0xff] }
 0x2c5   : > { %2441 = vmatpush.msra.mxu3 %v2107_v21  ;;  %v1745_v45 = vpop.f32.mrf.mxu2  ;;  %1470 = vmatmul.f32.gmra.mxu0 %v1295_v5  ;;  %v1906_v33 = vpop.f32.mrf.mxu3  ;;  %v1314_v5 = vld [vmem:[#allocation4 + $0x4b8] sm:$0xff] }
 0x2c6   : > { %v1746_v55 = vadd.f32 %v1745_v45, %v1585_v23  ;;  %1631 = vmatmul.f32.gmra.mxu1 %v1296_v16  ;;  %2171 = vmatpush.msra.mxu0 %v2106_v9 }
 0x2c7   : > { %2442 = vmatpush.msra.mxu3 %v2106_v9  ;;  %v1312_v9 = vld [vmem:[#allocation4 + $0x4a8] sm:$0xff] }
 0x2c8   : > { %v1907_v20 = vadd.f32 %v1906_v33, %v1746_v55  ;;  %2172 = vmatpush.msra.mxu0 %v2105_v17  ;;  %v1317_v55 = vld [vmem:[#allocation4 + $0x4d0] sm:$0xff] }
 0x2c9   : > { %2443 = vmatpush.msra.mxu3 %v2105_v17  ;;  %v1426_v41 = vpop.f32.mrf.mxu0  ;;  %v1587_v13 = vpop.f32.mrf.mxu1 }
 0x2ca   : > { %v2064_v57 = vmul.f32 %v1907_v20, %v1907_v20  ;;  %1795 = vmatmul.f32.gmra.mxu2 %v1301_v63  ;;  %2173 = vmatpush.msra.mxu0 %v2104_v19  ;;  %v1588_v49 = vadd.f32 %v1587_v13, %v1426_v41 }
 0x2cb   : > { %2444 = vmatpush.msra.mxu3 %v2104_v19  ;;  %v1318_v19 = vld [vmem:[#allocation4 + $0x4d8] sm:$0xff] }
 0x2cc   : > { %1956 = vmatmul.f32.gmra.mxu3 %v1302_v8  ;;  %2174 = vmatpush.msra.mxu0 %v3167_v56  ;;  %v3216_v62 = vadd.f32 %v2064_v57, %v2016_v35  ;;  %v1315_v8 = vld [vmem:[#allocation4 + $0x4c0] sm:$0xff]  ;;  %v1316_v35 = vld [vmem:[#allocation4 + $0x4c8] sm:$0xff] }
 0x2cd   : > { %2445 = vmatpush.msra.mxu3 %v3167_v56  ;;  %v1748_v4 = vpop.f32.mrf.mxu2  ;;  %1473 = vmatmul.f32.gmra.mxu0 %v1299_v32  ;;  %v1909_v54 = vpop.f32.mrf.mxu3  ;;  %v2017_v56 = vmul.f32 %v3069_v42, %v3069_v42 }
 0x2ce   : > { %v1749_v60 = vadd.f32 %v1748_v4, %v1588_v49  ;;  %1634 = vmatmul.f32.gmra.mxu1 %v1300_v12  ;;  %2175 = vmatpush.msra.mxu0 %v3159_v48  ;;  %v1321_v4 = vld [vmem:[#allocation4 + $0x4f0] sm:$0xff] }
 0x2cf   : > { %2446 = vmatpush.msra.mxu3 %v3159_v48  ;;  %v1304_v48 = vld [vmem:[#allocation4 + $0x468] sm:$0xff] }
 0x2d0   : > { %v1910_v39 = vadd.f32 %v1909_v54, %v1749_v60  ;;  %2176 = vmatpush.msra.mxu0 %v3155_v0 }
 0x2d1   : > { %2447 = vmatpush.msra.mxu3 %v3155_v0  ;;  %v1429_v37 = vpop.f32.mrf.mxu0  ;;  %v1590_v1 = vpop.f32.mrf.mxu1 }
 0x2d2   : > { %v2065_v46 = vmul.f32 %v1910_v39, %v1910_v39  ;;  %1798 = vmatmul.f32.gmra.mxu2 %v1305_v28  ;;  %2177 = vmatpush.msra.mxu0 %v3151_v29  ;;  %v1591_v52 = vadd.f32 %v1590_v1, %v1429_v37  ;;  %v1322_v39 = vld [vmem:[#allocation4 + $0x4f8] sm:$0xff] }
 0x2d3   : > { %2448 = vmatpush.msra.mxu3 %v3151_v29 }
 0x2d4   : > { %1959 = vmatmul.f32.gmra.mxu3 %v1306_v25  ;;  %2178 = vmatpush.msra.mxu0 %v3147_v51  ;;  %v3228_v26 = vadd.f32 %v2065_v46, %v2017_v56  ;;  %v1319_v25 = vld [vmem:[#allocation4 + $0x4e0] sm:$0xff]  ;;  %v1320_v56 = vld [vmem:[#allocation4 + $0x4e8] sm:$0xff] }
 0x2d5   : > { %2449 = vmatpush.msra.mxu3 %v3147_v51  ;;  %v1751_v0 = vpop.f32.mrf.mxu2  ;;  %1476 = vmatmul.f32.gmra.mxu0 %v1303_v50  ;;  %v1912_v22 = vpop.f32.mrf.mxu3  ;;  %v2018_v51 = vmul.f32 %v3071_v59, %v3071_v59 }
 0x2d6   : > { %v1752_v42 = vadd.f32 %v1751_v0, %v1591_v52  ;;  %1637 = vmatmul.f32.gmra.mxu1 %v1304_v48  ;;  %2179 = vmatpush.msra.mxu0 %v3143_v11  ;;  %v1325_v0 = vld [vmem:[#allocation4 + $0x510] sm:$0xff] }
 0x2d7   : > { %2450 = vmatpush.msra.mxu3 %v3143_v11  ;;  %v1308_v11 = vld [vmem:[#allocation4 + $0x488] sm:$0xff] }
 0x2d8   : > { %v1913_v6 = vadd.f32 %v1912_v22, %v1752_v42  ;;  %2180 = vmatpush.msra.mxu0 %v3139_v34 }
 0x2d9   : > { %2451 = vmatpush.msra.mxu3 %v3139_v34  ;;  %v1432_v29 = vpop.f32.mrf.mxu0  ;;  %v1593_v47 = vpop.f32.mrf.mxu1 }
 0x2da   : > { %v2066_v10 = vmul.f32 %v1913_v6, %v1913_v6  ;;  %1801 = vmatmul.f32.gmra.mxu2 %v1309_v2  ;;  %2181 = vmatpush.msra.mxu0 %v3135_v31  ;;  %v1594_v38 = vadd.f32 %v1593_v47, %v1432_v29  ;;  %v2022_v6 = vmul.f32 %v3079_v58, %v3079_v58  ;;  %v1323_v47 = vld [vmem:[#allocation4 + $0x500] sm:$0xff] }
 0x2db   : > { %2452 = vmatpush.msra.mxu3 %v3135_v31  ;;  %v2019_v31 = vmul.f32 %v3073_v7, %v3073_v7  ;;  %v2020_v7 = vmul.f32 %v3075_v24, %v3075_v24  ;;  %v2021_v24 = vmul.f32 %v3077_v40, %v3077_v40  ;;  %v1326_v40 = vld [vmem:[#allocation4 + $0x518] sm:$0xff]  ;;  %v1327_v58 = vld [vmem:[#allocation4 + $0x520] sm:$0xff] }
 0x2dc   : > { %1962 = vmatmul.f32.gmra.mxu3 %v1310_v36  ;;  %2182 = vmatpush.msra.mxu0 %v3131_v18  ;;  %v3240_v3 = vadd.f32 %v2066_v10, %v2018_v51  ;;  %v1324_v36 = vld [vmem:[#allocation4 + $0x508] sm:$0xff] }
 0x2dd   : > { %2453 = vmatpush.msra.mxu3 %v3131_v18  ;;  %v1754_v34 = vpop.f32.mrf.mxu2  ;;  %1479 = vmatmul.f32.gmra.mxu0 %v1307_v15  ;;  %v1915_v30 = vpop.f32.mrf.mxu3  ;;  %v1329_v15 = vld [vmem:[#allocation4 + $0x530] sm:$0xff] }
 0x2de   : > { %v1755_v59 = vadd.f32 %v1754_v34, %v1594_v38  ;;  %1640 = vmatmul.f32.gmra.mxu1 %v1308_v11 }
 0x2e0   : > { %v1916_v61 = vadd.f32 %v1915_v30, %v1755_v59  ;;  %v1330_v30 = vld [vmem:[#allocation4 + $0x538] sm:$0xff]  ;;  %v1328_v59 = vld [vmem:[#allocation4 + $0x528] sm:$0xff] }
 0x2e1   : > { %v1435_v23 = vpop.f32.mrf.mxu0  ;;  %v1596_v21 = vpop.f32.mrf.mxu1 }
 0x2e2   : > { %v2067_v44 = vmul.f32 %v1916_v61, %v1916_v61  ;;  %1804 = vmatmul.f32.gmra.mxu2 %v1313_v43  ;;  %v1597_v16 = vadd.f32 %v1596_v21, %v1435_v23  ;;  %v1333_v23 = vld [vmem:[#allocation4 + $0x550] sm:$0xff] }
 0x2e4   : > { %1965 = vmatmul.f32.gmra.mxu3 %v1314_v5  ;;  %v3245_v18 = vadd.f32 %v2067_v44, %v2019_v31  ;;  %v1334_v31 = vld [vmem:[#allocation4 + $0x558] sm:$0xff]  ;;  %v1331_v44 = vld [vmem:[#allocation4 + $0x540] sm:$0xff] }
 0x2e5   : > { %v1757_v45 = vpop.f32.mrf.mxu2  ;;  %1482 = vmatmul.f32.gmra.mxu0 %v1311_v27  ;;  %v1918_v33 = vpop.f32.mrf.mxu3 }
 0x2e6   : > { %v1758_v53 = vadd.f32 %v1757_v45, %v1597_v16  ;;  %1643 = vmatmul.f32.gmra.mxu1 %v1312_v9  ;;  %v1332_v16 = vld [vmem:[#allocation4 + $0x548] sm:$0xff]  ;;  %v1337_v45 = vld [vmem:[#allocation4 + $0x570] sm:$0xff] }
 0x2e8   : > { %v1919_v17 = vadd.f32 %v1918_v33, %v1758_v53 }
 0x2e9   : > { %v1438_v63 = vpop.f32.mrf.mxu0  ;;  %v1599_v20 = vpop.f32.mrf.mxu1 }
 0x2ea   : > { %v2068_v41 = vmul.f32 %v1919_v17, %v1919_v17  ;;  %1807 = vmatmul.f32.gmra.mxu2 %v1317_v55  ;;  %v1600_v13 = vadd.f32 %v1599_v20, %v1438_v63  ;;  %v1338_v55 = vld [vmem:[#allocation4 + $0x578] sm:$0xff]  ;;  %v1335_v17 = vld [vmem:[#allocation4 + $0x560] sm:$0xff]  ;;  %v1336_v63 = vld [vmem:[#allocation4 + $0x568] sm:$0xff] }
 0x2ec   : > { %1968 = vmatmul.f32.gmra.mxu3 %v1318_v19  ;;  %v3249_v57 = vadd.f32 %v2068_v41, %v2020_v7  ;;  %v1341_v7 = vld [vmem:[#allocation4 + $0x590] sm:$0xff] }
 0x2ed   : > { %v1760_v49 = vpop.f32.mrf.mxu2  ;;  %1485 = vmatmul.f32.gmra.mxu0 %v1315_v8  ;;  %v1921_v32 = vpop.f32.mrf.mxu3  ;;  %v1342_v8 = vld [vmem:[#allocation4 + $0x598] sm:$0xff] }
 0x2ee   : > { %v1761_v12 = vadd.f32 %v1760_v49, %v1600_v13  ;;  %1646 = vmatmul.f32.gmra.mxu1 %v1316_v35  ;;  %v1339_v35 = vld [vmem:[#allocation4 + $0x580] sm:$0xff]  ;;  %v1340_v49 = vld [vmem:[#allocation4 + $0x588] sm:$0xff] }
 0x2f0   : > { %v1922_v54 = vadd.f32 %v1921_v32, %v1761_v12 }
 0x2f1   : > { %v1441_v60 = vpop.f32.mrf.mxu0  ;;  %v1602_v28 = vpop.f32.mrf.mxu1 }
 0x2f2   : > { %v2069_v37 = vmul.f32 %v1922_v54, %v1922_v54  ;;  %1810 = vmatmul.f32.gmra.mxu2 %v1321_v4  ;;  %v1603_v1 = vadd.f32 %v1602_v28, %v1441_v60  ;;  %v1345_v4 = vld [vmem:[#allocation4 + $0x5b0] sm:$0xff]  ;;  %v1346_v28 = vld [vmem:[#allocation4 + $0x5b8] sm:$0xff] }
 0x2f4   : > { %1971 = vmatmul.f32.gmra.mxu3 %v1322_v39  ;;  %v3253_v46 = vadd.f32 %v2069_v37, %v2021_v24  ;;  %v1343_v39 = vld [vmem:[#allocation4 + $0x5a0] sm:$0xff]  ;;  %v1344_v24 = vld [vmem:[#allocation4 + $0x5a8] sm:$0xff] }
 0x2f5   : > { %v1763_v52 = vpop.f32.mrf.mxu2  ;;  %1488 = vmatmul.f32.gmra.mxu0 %v1319_v25  ;;  %v1924_v50 = vpop.f32.mrf.mxu3  ;;  %v1349_v25 = vld [vmem:[#allocation4 + $0x5d0] sm:$0xff] }
 0x2f6   : > { %v1764_v48 = vadd.f32 %v1763_v52, %v1603_v1  ;;  %1649 = vmatmul.f32.gmra.mxu1 %v1320_v56 }
 0x2f8   : > { %v1925_v22 = vadd.f32 %v1924_v50, %v1764_v48  ;;  %v1350_v50 = vld [vmem:[#allocation4 + $0x5d8] sm:$0xff]  ;;  %v1347_v48 = vld [vmem:[#allocation4 + $0x5c0] sm:$0xff] }
 0x2f9   : > { %v3255_v42 = vpop.f32.mrf.mxu0  ;;  %v3257_v2 = vpop.f32.mrf.mxu1 }
 0x2fa   : > { %v2070_v29 = vmul.f32 %v1925_v22, %v1925_v22  ;;  %1813 = vmatmul.f32.gmra.mxu2 %v1325_v0  ;;  %v1348_v0 = vld [vmem:[#allocation4 + $0x5c8] sm:$0xff] }
 0x2fc   : > { %1974 = vmatmul.f32.gmra.mxu3 %v1326_v40  ;;  %v3261_v51 = vadd.f32 %v2070_v29, %v2022_v6  ;;  %v1353_v29 = vld [vmem:[#allocation4 + $0x5f0] sm:$0xff] }
 0x2fd   : > { %v3263_v10 = vpop.f32.mrf.mxu2  ;;  %1491 = vmatmul.f32.gmra.mxu0 %v1323_v47  ;;  %v3265_v38 = vpop.f32.mrf.mxu3 }
 0x2fe   : > { %1652 = vmatmul.f32.gmra.mxu1 %v1324_v36 }
 0x301   : > { %v3267_v11 = vpop.f32.mrf.mxu0  ;;  %v3269_v34 = vpop.f32.mrf.mxu1 }
 0x302   : > { %1816 = vmatmul.f32.gmra.mxu2 %v1329_v15 }
 0x304   : > { %1977 = vmatmul.f32.gmra.mxu3 %v1330_v30  ;;  %v1354_v30 = vld [vmem:[#allocation4 + $0x5f8] sm:$0xff] }
 0x305   : > { %v3271_v43 = vpop.f32.mrf.mxu2  ;;  %1494 = vmatmul.f32.gmra.mxu0 %v1327_v58  ;;  %v3273_v61 = vpop.f32.mrf.mxu3 }
 0x306   : > { %1655 = vmatmul.f32.gmra.mxu1 %v1328_v59 }
 0x309   : > { %v3275_v21 = vpop.f32.mrf.mxu0  ;;  %v3277_v5 = vpop.f32.mrf.mxu1 }
 0x30a   : > { %1819 = vmatmul.f32.gmra.mxu2 %v1333_v23 }
 0x30c   : > { %1980 = vmatmul.f32.gmra.mxu3 %v1334_v31  ;;  %v1351_v31 = vld [vmem:[#allocation4 + $0x5e0] sm:$0xff] }
 0x30d   : > { %v3279_v27 = vpop.f32.mrf.mxu2  ;;  %1497 = vmatmul.f32.gmra.mxu0 %v1331_v44  ;;  %v3281_v9 = vpop.f32.mrf.mxu3  ;;  %v1352_v44 = vld [vmem:[#allocation4 + $0x5e8] sm:$0xff] }
 0x30e   : > { %1658 = vmatmul.f32.gmra.mxu1 %v1332_v16 }
 0x311   : > { %v1453_v33 = vpop.f32.mrf.mxu0  ;;  %v1614_v53 = vpop.f32.mrf.mxu1 }
 0x312   : > { %1822 = vmatmul.f32.gmra.mxu2 %v1337_v45  ;;  %v1615_v16 = vadd.f32 %v1614_v53, %v1453_v33  ;;  %v3544_v33 = vld [vmem:[#allocation15_spill] sm:$0xff] }
 0x313   : > { %v2030_v53 = vmul.f32 %v3544_v33, %v3544_v33 }
 0x314   : > { %1983 = vmatmul.f32.gmra.mxu3 %v1338_v55  ;;  %v1612_v55 = vadd.f32 %v3277_v5, %v3275_v21  ;;  %v1606_v21 = vadd.f32 %v3257_v2, %v3255_v42 }
 0x315   : > { %v3283_v20 = vpop.f32.mrf.mxu2  ;;  %1500 = vmatmul.f32.gmra.mxu0 %v1335_v17  ;;  %v3285_v19 = vpop.f32.mrf.mxu3 }
 0x316   : > { %1661 = vmatmul.f32.gmra.mxu1 %v1336_v63  ;;  %v1773_v5 = vadd.f32 %v3279_v27, %v1612_v55  ;;  %v1767_v2 = vadd.f32 %v3263_v10, %v1606_v21  ;;  %v3548_v10 = vld [vmem:[#allocation11_spill] sm:$0xff]  ;;  %v3553_v21 = vld [vmem:[#allocation17_spill] sm:$0xff] }
 0x318   : > { %v1934_v27 = vadd.f32 %v3281_v9, %v1773_v5  ;;  %v2026_v9 = vmul.f32 %v3548_v10, %v3548_v10  ;;  %v2032_v5 = vmul.f32 %v3553_v21, %v3553_v21 }
 0x319   : > { %v1456_v41 = vpop.f32.mrf.mxu0  ;;  %v1617_v13 = vpop.f32.mrf.mxu1 }
 0x31a   : > { %1825 = vmatmul.f32.gmra.mxu2 %v1341_v7  ;;  %v1618_v58 = vadd.f32 %v1617_v13, %v1456_v41  ;;  %v1609_v41 = vadd.f32 %v3269_v34, %v3267_v11  ;;  %v1776_v13 = vadd.f32 %v3283_v20, %v1615_v16  ;;  %v3545_v34 = vld [vmem:[#allocation14_spill] sm:$0xff] }
 0x31b   : > { %v2029_v20 = vmul.f32 %v3545_v34, %v3545_v34 }
 0x31c   : > { %1986 = vmatmul.f32.gmra.mxu3 %v1342_v8  ;;  %v1770_v11 = vadd.f32 %v3271_v43, %v1609_v41  ;;  %v3547_v43 = vld [vmem:[#allocation12_spill] sm:$0xff] }
 0x31d   : > { %v1778_v32 = vpop.f32.mrf.mxu2  ;;  %1503 = vmatmul.f32.gmra.mxu0 %v1339_v35  ;;  %v1939_v12 = vpop.f32.mrf.mxu3 }
 0x31e   : > { %1664 = vmatmul.f32.gmra.mxu1 %v1340_v49  ;;  %v1779_v7 = vadd.f32 %v1778_v32, %v1618_v58 }
 0x321   : > { %v1459_v54 = vpop.f32.mrf.mxu0  ;;  %v1620_v60 = vpop.f32.mrf.mxu1 }
 0x322   : > { %1828 = vmatmul.f32.gmra.mxu2 %v1345_v4  ;;  %v1621_v47 = vadd.f32 %v1620_v60, %v1459_v54  ;;  %v1940_v60 = vadd.f32 %v1939_v12, %v1779_v7 }
 0x324   : > { %1989 = vmatmul.f32.gmra.mxu3 %v1346_v28 }
 0x325   : > { %v1781_v37 = vpop.f32.mrf.mxu2  ;;  %1506 = vmatmul.f32.gmra.mxu0 %v1343_v39  ;;  %v1942_v1 = vpop.f32.mrf.mxu3 }
 0x326   : > { %1667 = vmatmul.f32.gmra.mxu1 %v1344_v24  ;;  %v1782_v45 = vadd.f32 %v1781_v37, %v1621_v47  ;;  %v1937_v37 = vadd.f32 %v3285_v19, %v1776_v13  ;;  %v1931_v19 = vadd.f32 %v3273_v61, %v1770_v11  ;;  %v3549_v47 = vld [vmem:[#allocation16_spill] sm:$0xff]  ;;  %v3550_v61 = vld [vmem:[#allocation10_spill] sm:$0xff] }
 0x328   : > { %v1943_v49 = vadd.f32 %v1942_v1, %v1782_v45 }
 0x329   : > { %v1462_v56 = vpop.f32.mrf.mxu0  ;;  %v1623_v52 = vpop.f32.mrf.mxu1 }
 0x32a   : > { %1831 = vmatmul.f32.gmra.mxu2 %v1349_v25  ;;  %v1624_v6 = vadd.f32 %v1623_v52, %v1462_v56  ;;  %v2076_v1 = vmul.f32 %v1943_v49, %v1943_v49  ;;  %v3546_v56 = vld [vmem:[#allocation13_spill] sm:$0xff]  ;;  %v3552_v49 = vld [vmem:[#allocation8_spill] sm:$0xff] }
 0x32b   : > { %v2028_v42 = vmul.f32 %v3546_v56, %v3546_v56 }
 0x32c   : > { %1992 = vmatmul.f32.gmra.mxu3 %v1350_v50  ;;  %v2075_v50 = vmul.f32 %v1940_v60, %v1940_v60 }
 0x32d   : > { %v1784_v22 = vpop.f32.mrf.mxu2  ;;  %1509 = vmatmul.f32.gmra.mxu0 %v1347_v48  ;;  %v1945_v40 = vpop.f32.mrf.mxu3 }
 0x32e   : > { %1670 = vmatmul.f32.gmra.mxu1 %v1348_v0  ;;  %v1785_v59 = vadd.f32 %v1784_v22, %v1624_v6  ;;  %v2027_v22 = vmul.f32 %v3547_v43, %v3547_v43  ;;  %v2124_v6 = vadd.f32 %v2076_v1, %v2028_v42  ;;  %v3554_v1 = vld [vmem:[#allocation18_spill] sm:$0xff] }
 0x330   : > { %v1946_v8 = vadd.f32 %v1945_v40, %v1785_v59  ;;  %v2074_v40 = vmul.f32 %v1937_v37, %v1937_v37  ;;  %v2123_v58 = vadd.f32 %v2075_v50, %v2027_v22 }
 0x331   : > { %v1465_v36 = vpop.f32.mrf.mxu0  ;;  %v1626_v15 = vpop.f32.mrf.mxu1 }
 0x332   : > { %1834 = vmatmul.f32.gmra.mxu2 %v1353_v29  ;;  %v1627_v23 = vadd.f32 %v1626_v15, %v1465_v36  ;;  %v2077_v28 = vmul.f32 %v1946_v8, %v1946_v8  ;;  %v2031_v36 = vmul.f32 %v3549_v47, %v3549_v47  ;;  %v1928_v15 = vadd.f32 %v3265_v38, %v1767_v2 }
 0x333   : > { %v2122_v45 = vadd.f32 %v2074_v40, %v2026_v9 }
 0x334   : > { %1995 = vmatmul.f32.gmra.mxu3 %v1354_v30  ;;  %v2125_v48 = vadd.f32 %v2077_v28, %v2029_v20  ;;  %v2073_v30 = vmul.f32 %v1934_v27, %v1934_v27  ;;  %v2071_v8 = vmul.f32 %v1928_v15, %v1928_v15 }
 0x335   : > { %v1787_v17 = vpop.f32.mrf.mxu2  ;;  %1512 = vmatmul.f32.gmra.mxu0 %v1351_v31  ;;  %v1948_v63 = vpop.f32.mrf.mxu3  ;;  %v2025_v31 = vmul.f32 %v3550_v61, %v3550_v61  ;;  %v3557_v61 = vld [vmem:[#allocation21_spill] sm:$0xff] }
 0x336   : > { %v1788_v35 = vadd.f32 %v1787_v17, %v1627_v23  ;;  %1673 = vmatmul.f32.gmra.mxu1 %v1352_v44  ;;  %v2072_v44 = vmul.f32 %v1931_v19, %v1931_v19 }
 0x337   : > { %v2121_v41 = vadd.f32 %v2073_v30, %v2025_v31 }
 0x338   : > { %v1949_v4 = vadd.f32 %v1948_v63, %v1788_v35  ;;  %v3551_v63 = vld [vmem:[#allocation9_spill] sm:$0xff] }
 0x339   : > { %v1468_v54 = vpop.f32.mrf.mxu0  ;;  %v1629_v32 = vpop.f32.mrf.mxu1  ;;  %v2024_v38 = vmul.f32 %v3551_v63, %v3551_v63 }
 0x33a   : > { %v2078_v39 = vmul.f32 %v1949_v4, %v1949_v4  ;;  %v1630_v24 = vadd.f32 %v1629_v32, %v1468_v54  ;;  %v2023_v4 = vmul.f32 %v3552_v49, %v3552_v49 }
 0x33c   : > { %v2126_v25 = vadd.f32 %v2078_v39, %v2030_v53  ;;  %v2120_v53 = vadd.f32 %v2072_v44, %v2024_v38  ;;  %v2119_v60 = vadd.f32 %v2071_v8, %v2023_v4 }
 0x33d   : > { %v1790_v12 = vpop.f32.mrf.mxu2  ;;  %v1951_v52 = vpop.f32.mrf.mxu3 }
 0x33e   : > { %v1791_v0 = vadd.f32 %v1790_v12, %v1630_v24  ;;  %2208 = vmatpush.msra.mxu1 %v2126_v25  ;;  %2454 = vmatpush.msrb.mxu3 %v2126_v25  ;;  %v2033_v25 = vmul.f32 %v3554_v1, %v3554_v1 }
 0x340   : > { %v1952_v29 = vadd.f32 %v1951_v52, %v1791_v0  ;;  %2209 = vmatpush.msra.mxu1 %v2125_v48  ;;  %2455 = vmatpush.msrb.mxu3 %v2125_v48 }
 0x342   : > { %v2079_v59 = vmul.f32 %v1952_v29, %v1952_v29  ;;  %2210 = vmatpush.msra.mxu1 %v2124_v6  ;;  %2456 = vmatpush.msrb.mxu3 %v2124_v6  ;;  %v1471_v23 = vpop.f32.mrf.mxu0  ;;  %v3556_v29 = vld [vmem:[#allocation20_spill] sm:$0xff] }
 0x343   : > { %v1632_v16 = vpop.f32.mrf.mxu1  ;;  %v2035_v10 = vmul.f32 %v3556_v29, %v3556_v29 }
 0x344   : > { %v3315_v55 = vadd.f32 %v2079_v59, %v2031_v36  ;;  %v1633_v17 = vadd.f32 %v1632_v16, %v1471_v23  ;;  %2211 = vmatpush.msra.mxu1 %v2123_v58  ;;  %2457 = vmatpush.msrb.mxu3 %v2123_v58 }
 0x345   : > { %v1793_v7 = vpop.f32.mrf.mxu2 }
 0x346   : > { %v1794_v35 = vadd.f32 %v1793_v7, %v1633_v17  ;;  %2212 = vmatpush.msra.mxu1 %v2122_v45  ;;  %2458 = vmatpush.msrb.mxu3 %v2122_v45 }
 0x347   : > { %v1954_v13 = vpop.f32.mrf.mxu3 }
 0x348   : > { %v1955_v33 = vadd.f32 %v1954_v13, %v1794_v35  ;;  %2213 = vmatpush.msra.mxu1 %v2121_v41  ;;  %2459 = vmatpush.msrb.mxu3 %v2121_v41  ;;  %v3558_v35 = vld [vmem:[#allocation22_spill] sm:$0xff] }
 0x349   : > { %v2037_v41 = vmul.f32 %v3558_v35, %v3558_v35 }
 0x34a   : > { %v2080_v54 = vmul.f32 %v1955_v33, %v1955_v33  ;;  %2214 = vmatpush.msra.mxu1 %v2120_v53  ;;  %2460 = vmatpush.msrb.mxu3 %v2120_v53  ;;  %v1474_v32 = vpop.f32.mrf.mxu0 }
 0x34b   : > { %v1635_v28 = vpop.f32.mrf.mxu1 }
 0x34c   : > { %v3323_v39 = vadd.f32 %v2080_v54, %v2032_v5  ;;  %v1636_v24 = vadd.f32 %v1635_v28, %v1474_v32  ;;  %2215 = vmatpush.msra.mxu1 %v2119_v60  ;;  %2461 = vmatpush.msrb.mxu3 %v2119_v60  ;;  %v3559_v60 = vld [vmem:[#allocation23_spill] sm:$0xff] }
 0x34d   : > { %v1796_v11 = vpop.f32.mrf.mxu2  ;;  %v2038_v28 = vmul.f32 %v3559_v60, %v3559_v60 }
 0x34e   : > { %v1797_v34 = vadd.f32 %v1796_v11, %v1636_v24  ;;  %2216 = vmatpush.msra.mxu1 %v3261_v51  ;;  %2462 = vmatpush.msrb.mxu3 %v3261_v51 }
 0x34f   : > { %v1957_v20 = vpop.f32.mrf.mxu3 }
 0x350   : > { %v1958_v37 = vadd.f32 %v1957_v20, %v1797_v34  ;;  %2217 = vmatpush.msra.mxu1 %v3253_v46  ;;  %2463 = vmatpush.msrb.mxu3 %v3253_v46 }
 0x352   : > { %v2081_v56 = vmul.f32 %v1958_v37, %v1958_v37  ;;  %2218 = vmatpush.msra.mxu1 %v3249_v57  ;;  %2464 = vmatpush.msrb.mxu3 %v3249_v57  ;;  %v1477_v42 = vpop.f32.mrf.mxu0  ;;  %v3555_v57 = vld [vmem:[#allocation19_spill] sm:$0xff] }
 0x353   : > { %v1638_v2 = vpop.f32.mrf.mxu1  ;;  %v2034_v48 = vmul.f32 %v3555_v57, %v3555_v57 }
 0x354   : > { %v3333_v27 = vadd.f32 %v2081_v56, %v2033_v25  ;;  %v1639_v12 = vadd.f32 %v1638_v2, %v1477_v42  ;;  %2219 = vmatpush.msra.mxu1 %v3245_v18  ;;  %2465 = vmatpush.msrb.mxu3 %v3245_v18  ;;  %v3560_v2 = vld [vmem:[#allocation24_spill] sm:$0xff] }
 0x355   : > { %v1799_v51 = vpop.f32.mrf.mxu2 }
 0x356   : > { %v1800_v52 = vadd.f32 %v1799_v51, %v1639_v12  ;;  %2220 = vmatpush.msra.mxu1 %v3240_v3  ;;  %2466 = vmatpush.msrb.mxu3 %v3240_v3  ;;  %v2039_v12 = vmul.f32 %v3560_v2, %v3560_v2 }
 0x357   : > { %v1960_v46 = vpop.f32.mrf.mxu3 }
 0x358   : > { %v1961_v50 = vadd.f32 %v1960_v46, %v1800_v52  ;;  %2221 = vmatpush.msra.mxu1 %v3228_v26  ;;  %2467 = vmatpush.msrb.mxu3 %v3228_v26 }
 0x35a   : > { %v2082_v0 = vmul.f32 %v1961_v50, %v1961_v50  ;;  %2222 = vmatpush.msra.mxu1 %v3216_v62  ;;  %2468 = vmatpush.msrb.mxu3 %v3216_v62  ;;  %v1480_v18 = vpop.f32.mrf.mxu0 }
 0x35b   : > { %v1641_v43 = vpop.f32.mrf.mxu1 }
 0x35c   : > { %v3345_v22 = vadd.f32 %v2082_v0, %v2034_v48  ;;  %v1642_v19 = vadd.f32 %v1641_v43, %v1480_v18  ;;  %2223 = vmatpush.msra.mxu1 %v3209_v14  ;;  %2469 = vmatpush.msrb.mxu3 %v3209_v14  ;;  %v2036_v14 = vmul.f32 %v3557_v61, %v3557_v61 }
 0x35d   : > { %v1802_v3 = vpop.f32.mrf.mxu2 }
 0x35e   : > { %v1803_v40 = vadd.f32 %v1802_v3, %v1642_v19 }
 0x35f   : > { %v1963_v26 = vpop.f32.mrf.mxu3 }
 0x360   : > { %v1964_v6 = vadd.f32 %v1963_v26, %v1803_v40 }
 0x362   : > { %v2083_v9 = vmul.f32 %v1964_v6, %v1964_v6  ;;  %v1483_v47 = vpop.f32.mrf.mxu0 }
 0x363   : > { %v1644_v36 = vpop.f32.mrf.mxu1 }
 0x364   : > { %v3351_v62 = vadd.f32 %v2083_v9, %v2035_v10  ;;  %v1645_v15 = vadd.f32 %v1644_v36, %v1483_v47 }
 0x365   : > { %v1805_v30 = vpop.f32.mrf.mxu2 }
 0x366   : > { %v1806_v58 = vadd.f32 %v1805_v30, %v1645_v15 }
 0x367   : > { %v1966_v59 = vpop.f32.mrf.mxu3 }
 0x368   : > { %v1967_v23 = vadd.f32 %v1966_v59, %v1806_v58 }
 0x36a   : > { %v2084_v31 = vmul.f32 %v1967_v23, %v1967_v23  ;;  %v1486_v44 = vpop.f32.mrf.mxu0 }
 0x36b   : > { %v1647_v16 = vpop.f32.mrf.mxu1 }
 0x36c   : > { %v3355_v45 = vadd.f32 %v2084_v31, %v2036_v14  ;;  %v1648_v17 = vadd.f32 %v1647_v16, %v1486_v44 }
 0x36d   : > { %v1808_v63 = vpop.f32.mrf.mxu2 }
 0x36e   : > { %v1809_v38 = vadd.f32 %v1808_v63, %v1648_v17 }
 0x36f   : > { %v1969_v7 = vpop.f32.mrf.mxu3 }
 0x370   : > { %v1970_v8 = vadd.f32 %v1969_v7, %v1809_v38 }
 0x372   : > { %v2085_v13 = vmul.f32 %v1970_v8, %v1970_v8  ;;  %v1489_v49 = vpop.f32.mrf.mxu0 }
 0x373   : > { %v1650_v4 = vpop.f32.mrf.mxu1 }
 0x374   : > { %v3359_v33 = vadd.f32 %v2085_v13, %v2037_v41  ;;  %v1651_v53 = vadd.f32 %v1650_v4, %v1489_v49 }
 0x375   : > { %v1811_v21 = vpop.f32.mrf.mxu2 }
 0x376   : > { %v1812_v5 = vadd.f32 %v1811_v21, %v1651_v53 }
 0x377   : > { %v1972_v54 = vpop.f32.mrf.mxu3 }
 0x378   : > { %v1973_v32 = vadd.f32 %v1972_v54, %v1812_v5 }
 0x37a   : > { %v2086_v24 = vmul.f32 %v1973_v32, %v1973_v32  ;;  %v1492_v11 = vpop.f32.mrf.mxu0 }
 0x37b   : > { %v1653_v34 = vpop.f32.mrf.mxu1 }
 0x37c   : > { %v3363_v20 = vadd.f32 %v2086_v24, %v2038_v28  ;;  %v1654_v37 = vadd.f32 %v1653_v34, %v1492_v11  ;;  %v3561_v28 = vld [vmem:[#allocation31_spill] sm:$0xff] }
 0x37d   : > { %v1814_v1 = vpop.f32.mrf.mxu2  ;;  %v2046_v24 = vmul.f32 %v3561_v28, %v3561_v28 }
 0x37e   : > { %v1815_v25 = vadd.f32 %v1814_v1, %v1654_v37 }
 0x37f   : > { %v1975_v56 = vpop.f32.mrf.mxu3 }
 0x380   : > { %v1976_v42 = vadd.f32 %v1975_v56, %v1815_v25  ;;  %v3562_v25 = vld [vmem:[#allocation30_spill] sm:$0xff] }
 0x381   : > { %v2045_v56 = vmul.f32 %v3562_v25, %v3562_v25 }
 0x382   : > { %v2087_v51 = vmul.f32 %v1976_v42, %v1976_v42  ;;  %v1495_v52 = vpop.f32.mrf.mxu0  ;;  %v2144_v42 = vld [vmem:[%s3498_s3 + $0x8] sm:$0xff] }
 0x383   : > { %v1656_v46 = vpop.f32.mrf.mxu1  ;;  %2224 = vmatmul.f32.vlgmr.msra.gmra.mxu1 %v2144_v42 }
 0x384   : > { %v3367_v50 = vadd.f32 %v2087_v51, %v2039_v12  ;;  %v1657_v5 = vadd.f32 %v1656_v46, %v1495_v52  ;;  %v3563_v46 = vld [vmem:[#allocation29_spill] sm:$0xff] }
 0x385   : > { %v1817_v57 = vpop.f32.mrf.mxu2 }
 0x386   : > { %v1818_v2 = vadd.f32 %v1817_v57, %v1657_v5 }
 0x387   : > { %v1978_v48 = vpop.f32.mrf.mxu3 }
 0x388   : > { %v1979_v57 = vadd.f32 %v1978_v48, %v1818_v2  ;;  %v2146_v48 = vld [vmem:[%s3498_s3 + $0x18] sm:$0xff] }
 0x38a   : > { %v1498_v0 = vpop.f32.mrf.mxu0 }
 0x38b   : > { %v1659_v18 = vpop.f32.mrf.mxu1 }
 0x38c   : > { %v1660_v13 = vadd.f32 %v1659_v18, %v1498_v0  ;;  %v2044_v0 = vmul.f32 %v3563_v46, %v3563_v46  ;;  %v2143_v18 = vld [vmem:[%s3498_s3] sm:$0xff] }
 0x38d   : > { %v1820_v43 = vpop.f32.mrf.mxu2  ;;  %2183 = vmatmul.f32.vlgmr.msra.gmra.mxu0 %v2143_v18 }
 0x38e   : > { %v1821_v11 = vadd.f32 %v1820_v43, %v1660_v13  ;;  %v2160_v13 = vld [vmem:[%s3498_s3 + $0x88] sm:$0xff] }
 0x38f   : > { %v1981_v19 = vpop.f32.mrf.mxu3 }
 0x390   : > { %v1982_v43 = vadd.f32 %v1981_v19, %v1821_v11  ;;  %v2147_v19 = vld [vmem:[%s3498_s3 + $0x20] sm:$0xff] }
 0x391   : > { %2227 = vmatmul.f32.gmra.mxu1 %v2147_v19 }
 0x392   : > { %v1501_v3 = vpop.f32.mrf.mxu0 }
 0x393   : > { %v1662_v40 = vpop.f32.mrf.mxu1 }
 0x394   : > { %v1663_v7 = vadd.f32 %v1662_v40, %v1501_v3 }
 0x395   : > { %v1823_v26 = vpop.f32.mrf.mxu2  ;;  %2186 = vmatmul.f32.gmra.mxu0 %v2146_v48 }
 0x396   : > { %v1824_v54 = vadd.f32 %v1823_v26, %v1663_v7  ;;  %v3564_v26 = vld [vmem:[#allocation28_spill] sm:$0xff]  ;;  %v2162_v7 = vld [vmem:[%s3498_s3 + $0x98] sm:$0xff] }
 0x397   : > { %v1984_v6 = vpop.f32.mrf.mxu3 }
 0x398   : > { %v1985_v12 = vadd.f32 %v1984_v6, %v1824_v54 }
 0x39a   : > { %v1504_v29 = vpop.f32.mrf.mxu0  ;;  %v2090_v6 = vmul.f32 %v1985_v12, %v1985_v12 }
 0x39b   : > { %v1665_v10 = vpop.f32.mrf.mxu1 }
 0x39c   : > { %v1666_v16 = vadd.f32 %v1665_v10, %v1504_v29  ;;  %v2043_v29 = vmul.f32 %v3564_v26, %v3564_v26 }
 0x39d   : > { %v1826_v9 = vpop.f32.mrf.mxu2 }
 0x39e   : > { %v1827_v49 = vadd.f32 %v1826_v9, %v1666_v16  ;;  %v3565_v9 = vld [vmem:[#allocation27_spill] sm:$0xff] }
 0x39f   : > { %v1987_v47 = vpop.f32.mrf.mxu3  ;;  %v2150_v16 = vld [vmem:[%s3498_s3 + $0x38] sm:$0xff] }
 0x3a0   : > { %v1988_v34 = vadd.f32 %v1987_v47, %v1827_v49  ;;  %v2042_v47 = vmul.f32 %v3565_v9, %v3565_v9  ;;  %2230 = vmatmul.f32.gmra.mxu1 %v2150_v16  ;;  %v2163_v49 = vld [vmem:[%s3498_s3 + $0xa0] sm:$0xff] }
 0x3a2   : > { %v1507_v36 = vpop.f32.mrf.mxu0  ;;  %v2091_v3 = vmul.f32 %v1988_v34, %v1988_v34 }
 0x3a3   : > { %v1668_v15 = vpop.f32.mrf.mxu1 }
 0x3a4   : > { %v1669_v44 = vadd.f32 %v1668_v15, %v1507_v36  ;;  %v2089_v36 = vmul.f32 %v1982_v43, %v1982_v43  ;;  %v2139_v15 = vadd.f32 %v2091_v3, %v2043_v29 }
 0x3a5   : > { %v1829_v30 = vpop.f32.mrf.mxu2 }
 0x3a6   : > { %v1830_v8 = vadd.f32 %v1829_v30, %v1669_v44  ;;  %v3566_v30 = vld [vmem:[#allocation26_spill] sm:$0xff] }
 0x3a7   : > { %v1990_v58 = vpop.f32.mrf.mxu3 }
 0x3a8   : > { %v1991_v32 = vadd.f32 %v1990_v58, %v1830_v8  ;;  %v2041_v58 = vmul.f32 %v3566_v30, %v3566_v30  ;;  %v2165_v8 = vld [vmem:[%s3498_s3 + $0xb0] sm:$0xff] }
 0x3aa   : > { %v1510_v59 = vpop.f32.mrf.mxu0  ;;  %v2092_v51 = vmul.f32 %v1991_v32, %v1991_v32 }
 0x3ab   : > { %v1671_v23 = vpop.f32.mrf.mxu1 }
 0x3ac   : > { %v1672_v14 = vadd.f32 %v1671_v23, %v1510_v59  ;;  %v2140_v10 = vadd.f32 %v2092_v51, %v2044_v0  ;;  %v2088_v59 = vmul.f32 %v1979_v57, %v1979_v57  ;;  %v2138_v23 = vadd.f32 %v2090_v6, %v2042_v47 }
 0x3ad   : > { %v1832_v61 = vpop.f32.mrf.mxu2 }
 0x3ae   : > { %v1833_v17 = vadd.f32 %v1832_v61, %v1672_v14  ;;  %v3567_v61 = vld [vmem:[#allocation25_spill] sm:$0xff] }
 0x3af   : > { %v1993_v31 = vpop.f32.mrf.mxu3  ;;  %v2040_v14 = vmul.f32 %v3567_v61, %v3567_v61 }
 0x3b0   : > { %v1994_v4 = vadd.f32 %v1993_v31, %v1833_v17  ;;  %v2137_v31 = vadd.f32 %v2089_v36, %v2041_v58  ;;  %v2149_v17 = vld [vmem:[%s3498_s3 + $0x30] sm:$0xff] }
 0x3b1   : > { %v2136_v44 = vadd.f32 %v2088_v59, %v2040_v14  ;;  %2189 = vmatmul.f32.gmra.mxu0 %v2149_v17 }
 0x3b2   : > { %v1513_v63 = vpop.f32.mrf.mxu0  ;;  %v2093_v37 = vmul.f32 %v1994_v4, %v1994_v4  ;;  %v2166_v4 = vld [vmem:[%s3498_s3 + $0xb8] sm:$0xff] }
 0x3b3   : > { %v1674_v38 = vpop.f32.mrf.mxu1 }
 0x3b4   : > { %v1675_v35 = vadd.f32 %v1674_v38, %v1513_v63  ;;  %v2141_v40 = vadd.f32 %v2093_v37, %v2045_v56  ;;  %v2153_v63 = vld [vmem:[%s3498_s3 + $0x50] sm:$0xff]  ;;  %v2151_v38 = vld [vmem:[%s3498_s3 + $0x40] sm:$0xff] }
 0x3b5   : > { %v1835_v41 = vpop.f32.mrf.mxu2  ;;  %2233 = vmatmul.f32.gmra.mxu1 %v2153_v63 }
 0x3b6   : > { %v1836_v53 = vadd.f32 %v1835_v41, %v1675_v35  ;;  %v2154_v35 = vld [vmem:[%s3498_s3 + $0x58] sm:$0xff]  ;;  %v2157_v41 = vld [vmem:[%s3498_s3 + $0x70] sm:$0xff] }
 0x3b7   : > { %v1996_v21 = vpop.f32.mrf.mxu3 }
 0x3b8   : > { %v1997_v60 = vadd.f32 %v1996_v21, %v1836_v53 }
 0x3ba   : > { %v2094_v1 = vmul.f32 %v1997_v60, %v1997_v60 }
 0x3bc   : > { %v2142_v52 = vadd.f32 %v2094_v1, %v2046_v24 }
 0x3be   : > { %2249 = vmatpush.msra.mxu2 %v2142_v52 }
 0x3c0   : > { %2250 = vmatpush.msra.mxu2 %v2141_v40 }
 0x3c2   : > { %2251 = vmatpush.msra.mxu2 %v2140_v10 }
 0x3c4   : > { %2252 = vmatpush.msra.mxu2 %v2139_v15 }
 0x3c6   : > { %2253 = vmatpush.msra.mxu2 %v2138_v23 }
 0x3c8   : > { %2254 = vmatpush.msra.mxu2 %v2137_v31 }
 0x3ca   : > { %2255 = vmatpush.msra.mxu2 %v2136_v44 }
 0x3cc   : > { %2256 = vmatpush.msra.mxu2 %v3367_v50  ;;  %v2152_v50 = vld [vmem:[%s3498_s3 + $0x48] sm:$0xff] }
 0x3cd   : > { %2192 = vmatmul.f32.gmra.mxu0 %v2152_v50 }
 0x3ce   : > { %2257 = vmatpush.msra.mxu2 %v3363_v20  ;;  %v2158_v20 = vld [vmem:[%s3498_s3 + $0x78] sm:$0xff] }
 0x3d0   : > { %2258 = vmatpush.msra.mxu2 %v3359_v33  ;;  %v2164_v33 = vld [vmem:[%s3498_s3 + $0xa8] sm:$0xff] }
 0x3d2   : > { %2259 = vmatpush.msra.mxu2 %v3355_v45  ;;  %v2145_v45 = vld [vmem:[%s3498_s3 + $0x10] sm:$0xff] }
 0x3d4   : > { %2260 = vmatpush.msra.mxu2 %v3351_v62  ;;  %v2156_v62 = vld [vmem:[%s3498_s3 + $0x68] sm:$0xff] }
 0x3d5   : > { %2236 = vmatmul.f32.gmra.mxu1 %v2156_v62 }
 0x3d6   : > { %2261 = vmatpush.msra.mxu2 %v3345_v22  ;;  %v2161_v22 = vld [vmem:[%s3498_s3 + $0x90] sm:$0xff] }
 0x3d7   : > { %2201 = vmatmul.f32.vlgmr.msra.gmra.mxu3 %v2161_v22 }
 0x3d8   : > { %2262 = vmatpush.msra.mxu2 %v3333_v27  ;;  %v2148_v27 = vld [vmem:[%s3498_s3 + $0x28] sm:$0xff] }
 0x3da   : > { %2263 = vmatpush.msra.mxu2 %v3323_v39  ;;  %v2155_v39 = vld [vmem:[%s3498_s3 + $0x60] sm:$0xff] }
 0x3db   : > { %2195 = vmatmul.f32.gmra.mxu0 %v2155_v39 }
 0x3dc   : > { %2264 = vmatpush.msra.mxu2 %v3315_v55  ;;  %v2159_v55 = vld [vmem:[%s3498_s3 + $0x80] sm:$0xff] }
 0x3dd   : > { %2265 = vmatmul.f32.vlgmr.msra.gmra.mxu2 %v2145_v45  ;;  %2239 = vmatmul.f32.gmra.mxu1 %v2159_v55 }
 0x3df   : > { %2204 = vmatmul.f32.gmra.mxu3 %v2164_v33 }
 0x3e3   : > { %2198 = vmatmul.f32.gmra.mxu0 %v2158_v20 }
 0x3e5   : > { %2268 = vmatmul.f32.gmra.mxu2 %v2148_v27  ;;  %2242 = vmatmul.f32.gmra.mxu1 %v2162_v7 }
 0x3e7   : > { %2245 = vmatmul.f32.vlgmr.msrb.gmra.mxu3 %v2165_v8 }
 0x3ed   : > { %2271 = vmatmul.f32.gmra.mxu2 %v2151_v38 }
 0x3f5   : > { %2274 = vmatmul.f32.gmra.mxu2 %v2154_v35 }
 0x3fd   : > { %2277 = vmatmul.f32.gmra.mxu2 %v2157_v41 }
 0x400   : > { %v2225_v21 = vpop.f32.mrf.mxu1 }
 0x405   : > { %2280 = vmatmul.f32.gmra.mxu2 %v2160_v13 }
 0x40a   : > { %v2184_v53 = vpop.f32.mrf.mxu0 }
 0x40b   : > { %v2185_v54 = vadd.f32 1e-20, %v2184_v53 }
 0x40d   : > { %2283 = vmatmul.f32.gmra.mxu2 %v2163_v49  ;;  %v2226_v60 = vadd.f32 %v2225_v21, %v2185_v54 }
 0x40e   : > { %v2228_v32 = vpop.f32.mrf.mxu1 }
 0x412   : > { %v2187_v5 = vpop.f32.mrf.mxu0 }
 0x413   : > { %v2188_v34 = vadd.f32 1e-20, %v2187_v5 }
 0x415   : > { %2286 = vmatmul.f32.gmra.mxu2 %v2166_v4  ;;  %v2229_v1 = vadd.f32 %v2228_v32, %v2188_v34 }
 0x41d   : > { %v2231_v37 = vpop.f32.mrf.mxu1 }
 0x42e   : > { %v2190_v24 = vpop.f32.mrf.mxu0 }
 0x42f   : > { %v2191_v2 = vadd.f32 1e-20, %v2190_v24 }
 0x431   : > { %v2232_v52 = vadd.f32 %v2231_v37, %v2191_v2 }
 0x432   : > { %v2234_v46 = vpop.f32.mrf.mxu1 }
 0x44a   : > { %v2193_v51 = vpop.f32.mrf.mxu0 }
 0x44b   : > { %v2194_v3 = vadd.f32 1e-20, %v2193_v51 }
 0x44d   : > { %v2235_v29 = vadd.f32 %v2234_v46, %v2194_v3 }
 0x452   : > { %v2237_v6 = vpop.f32.mrf.mxu1 }
 0x458   : > { %v2196_v26 = vpop.f32.mrf.mxu0 }
 0x459   : > { %v2197_v47 = vadd.f32 1e-20, %v2196_v26 }
 0x45a   : > { %v2202_v58 = vpop.f32.mrf.mxu3  ;;  %v2240_v14 = vpop.f32.mrf.mxu1 }
 0x45b   : > { %v2238_v15 = vadd.f32 %v2237_v6, %v2197_v47  ;;  %v2203_v45 = vadd.f32 1e-20, %v2202_v58 }
 0x460   : > { %v2266_v28 = vpop.f32.mrf.mxu2  ;;  %v2199_v19 = vpop.f32.mrf.mxu0 }
 0x461   : > { %v2267_v11 = vadd.f32 %v2266_v28, %v2226_v60  ;;  %v2200_v48 = vadd.f32 1e-20, %v2199_v19 }
 0x462   : > { %v2205_v50 = vpop.f32.mrf.mxu3  ;;  %v2243_v62 = vpop.f32.mrf.mxu1 }
 0x463   : > { %2517 = vlog2.f32 %v2267_v11  ;;  %v2241_v31 = vadd.f32 %v2240_v14, %v2200_v48  ;;  %v2244_v22 = vadd.f32 %v2243_v62, %v2203_v45  ;;  %v2206_v20 = vadd.f32 1e-20, %v2205_v50 }
 0x468   : > { %v2269_v25 = vpop.f32.mrf.mxu2 }
 0x469   : > { %v2518_v56 = vpop.eup %2517  ;;  %v2270_v42 = vadd.f32 %v2269_v25, %v2229_v1 }
 0x46a   : > { %v2291_v12 = vmul.f32 0.6931472, %v2518_v56  ;;  %v2246_v38 = vpop.f32.mrf.mxu3 }
 0x46b   : > { %2519 = vlog2.f32 %v2270_v42  ;;  %v2247_v7 = vadd.f32 %v2246_v38, %v2206_v20 }
 0x46c   : > { %2307 = vst.msk [vmem:[%s3468_s23] sm:$0xff] %vm2306_vm0, %v2291_v12 }
 0x470   : > { %v2272_v0 = vpop.f32.mrf.mxu2 }
 0x471   : > { %v2520_v18 = vpop.eup %2519  ;;  %v2273_v43 = vadd.f32 %v2272_v0, %v2232_v52 }
 0x472   : > { %v2293_v40 = vmul.f32 0.6931472, %v2520_v18 }
 0x473   : > { %2521 = vlog2.f32 %v2273_v43 }
 0x474   : > { %2308 = vst.msk [vmem:[%s3468_s23 + $0x8] sm:$0xff] %vm2306_vm0, %v2293_v40 }
 0x478   : > { %v2275_v57 = vpop.f32.mrf.mxu2 }
 0x479   : > { %v2522_v10 = vpop.eup %2521  ;;  %v2276_v9 = vadd.f32 %v2275_v57, %v2235_v29 }
 0x47a   : > { %v2295_v36 = vmul.f32 0.6931472, %v2522_v10 }
 0x47b   : > { %2523 = vlog2.f32 %v2276_v9 }
 0x47c   : > { %2309 = vst.msk [vmem:[%s3468_s23 + $0x10] sm:$0xff] %vm2306_vm0, %v2295_v36 }
 0x480   : > { %v2278_v30 = vpop.f32.mrf.mxu2 }
 0x481   : > { %v2524_v59 = vpop.eup %2523  ;;  %v2279_v23 = vadd.f32 %v2278_v30, %v2238_v15 }
 0x482   : > { %v2297_v61 = vmul.f32 0.6931472, %v2524_v59 }
 0x483   : > { %2525 = vlog2.f32 %v2279_v23 }
 0x484   : > { %2310 = vst.msk [vmem:[%s3468_s23 + $0x18] sm:$0xff] %vm2306_vm0, %v2297_v61 }
 0x488   : > { %v2281_v44 = vpop.f32.mrf.mxu2 }
 0x489   : > { %v2526_v16 = vpop.eup %2525  ;;  %v2282_v17 = vadd.f32 %v2281_v44, %v2241_v31 }
 0x48a   : > { %v2299_v63 = vmul.f32 0.6931472, %v2526_v16 }
 0x48b   : > { %2527 = vlog2.f32 %v2282_v17 }
 0x48c   : > { %2311 = vst.msk [vmem:[%s3468_s23 + $0x20] sm:$0xff] %vm2306_vm0, %v2299_v63 }
 0x490   : > { %v2284_v39 = vpop.f32.mrf.mxu2 }
 0x491   : > { %v2528_v27 = vpop.eup %2527  ;;  %v2285_v55 = vadd.f32 %v2284_v39, %v2244_v22 }
 0x492   : > { %v2301_v33 = vmul.f32 0.6931472, %v2528_v27 }
 0x493   : > { %2529 = vlog2.f32 %v2285_v55 }
 0x494   : > { %2312 = vst.msk [vmem:[%s3468_s23 + $0x28] sm:$0xff] %vm2306_vm0, %v2301_v33 }
 0x498   : > { %v2287_v8 = vpop.f32.mrf.mxu2 }
 0x499   : > { %v2530_v35 = vpop.eup %2529  ;;  %v2288_v41 = vadd.f32 %v2287_v8, %v2247_v7 }
 0x49a   : > { %v2303_v13 = vmul.f32 0.6931472, %v2530_v35 }
 0x49b   : > { %2531 = vlog2.f32 %v2288_v41 }
 0x49c   : > { %2313 = vst.msk [vmem:[%s3468_s23 + $0x30] sm:$0xff] %vm2306_vm0, %v2303_v13 }
 0x4a1   : > { %v2532_v49 = vpop.eup %2531 }
 0x4a2   : > { %v2305_v4 = vmul.f32 0.6931472, %v2532_v49 }
 0x4a4   : > { %2314 = vst.msk [vmem:[%s3468_s23 + $0x38] sm:$0xff] %vm2306_vm0, %v2305_v4 }
 0x4a5 PF: > { %s16_s17 = sadd.s32 1, %s2623_s17   ;;  %s3568_s15 = smov %s2619_s16 }
 0x4a6   : > { %p13_p8 = scmp.ge.s32.totalorder %s16_s17, 4   ;;  %s3569_s16 = smov %s3571_s19 }
 0x4a8   :  { %15 = sbr.rel (!%p13_p8) target bundleno = 3 (0x3), region = 75 }
 0x4ad   :  { %2342 = vsyncpa [#allocation3], 1 }
 0x4ae   :  { %2344 = vsyncpa [#allocation3 + $0x1], 1 }
 0x4af   :  { %2345 = vsyncpa [#allocation5], 1 }

</bundles_post_ra>
